<compile_context>
chip_gen: v5e
topology: v5e:2x2
jax: 0.10.0
libtpu: 0.0.40
codegen_flags: <defaults>
</compile_context>

<pallas_src>
import functools

import jax
import jax.numpy as jnp
from jax.experimental import pallas as pl
from jax.experimental.pallas import tpu as pltpu

EMBED_DIM = 32
HIDDEN_SIZE = 32
NUM_LAYERS = 2        # kernel below is specialized to 2 layers
OUTPUT_SIZE = 4
FC_HIDDEN = 64


# ---------------------------------------------------------------------------
# Single fused kernel: 2-layer bidirectional LSTM + fc1 -> relu -> fc2.
# ---------------------------------------------------------------------------
def _fused_lstm_mlp_kernel(x_ref,
                           wih0_ref, whh0_ref, b0_ref,
                           wih1a_ref, wih1b_ref, whh1_ref, b1_ref,
                           fc1w_ref, fc1b_ref, fc2w_ref, fc2b_ref,
                           o_ref,
                           hf_scr, hb_scr,
                           *, T, Bp, H):
    G8 = 8 * H
    # Lane mask over the interleaved gate layout [i_f,i_b,f_f,f_b,g_f,g_b,o_f,o_b]:
    # even H-chunks belong to the forward direction.  H is a power of two, so
    # chunk parity is just bit `H` of the column index (no vector division).
    col = jax.lax.broadcasted_iota(jnp.int32, (1, G8), 1)
    fwd_mask = jnp.bitwise_and(col, H) == 0

    def run_layer(gx, whh_bf, write_scratch):
        """gx: (T*Bp, 8H) f32 with bias folded in.  Returns final hc (f32, bf16)."""
        # Per-step combined pre-activations: forward lanes take timestep s,
        # backward lanes take timestep T-1-s.  These selects do not depend on
        # the recurrent state, so they sit off the serial chain.
        gxc = []
        for s in range(T):
            gf = gx[s * Bp:(s + 1) * Bp, :]
            gb = gx[(T - 1 - s) * Bp:(T - s) * Bp, :]
            gxc.append(jnp.where(fwd_mask, gf, gb))

        hc = jnp.zeros((Bp, 2 * H), jnp.float32)   # [h_fwd | h_bwd]
        cc = jnp.zeros((Bp, 2 * H), jnp.float32)   # [c_fwd | c_bwd]
        hc_bf = hc.astype(jnp.bfloat16)
        for s in range(T):                         # static T -> fully unrolled
            # ONE fused recurrent matmul for both directions: (Bp,2H)@(2H,8H).
            gates = gxc[s] + jnp.dot(hc_bf, whh_bf,
                                     preferred_element_type=jnp.float32)
            sg = jax.nn.sigmoid(gates)             # full-vreg EUP pushes
            th = jnp.tanh(gates)
            i_g = sg[:, 0 * H:2 * H]
            f_g = sg[:, 2 * H:4 * H]
            g_g = th[:, 4 * H:6 * H]
            o_g = sg[:, 6 * H:8 * H]
            cc = f_g * cc + i_g * g_g
            hc = o_g * jnp.tanh(cc)
            hc_bf = hc.astype(jnp.bfloat16)
            if write_scratch:
                # Sublane-aligned (Bp=8) writes of the per-timestep outputs,
                # stored in time order for the layer-1 projection.
                hf_scr[s * Bp:(s + 1) * Bp, :] = hc[:, 0:H]
                hb_scr[(T - 1 - s) * Bp:(T - s) * Bp, :] = hc[:, H:2 * H]
        return hc, hc_bf

    # ---- layer 0: hoisted input projection (all timesteps, both dirs) ----
    gx0 = jnp.dot(x_ref[...], wih0_ref[...],
                  preferred_element_type=jnp.float32) + b0_ref[...]
    run_layer(gx0, whh0_ref[...], write_scratch=True)
    # TODO(synk): inter-layer dropout omitted (eval mode -> identity).

    # ---- layer 1: input projection straight from the scratch-resident
    # layer-0 outputs (no per-timestep lane concats, no 8-way sublane concat).
    hf_bf = hf_scr[...].astype(jnp.bfloat16)
    hb_bf = hb_scr[...].astype(jnp.bfloat16)
    gx1 = (jnp.dot(hf_bf, wih1a_ref[...], preferred_element_type=jnp.float32)
           + jnp.dot(hb_bf, wih1b_ref[...], preferred_element_type=jnp.float32)
           + b1_ref[...])
    _, hc1_bf = run_layer(gx1, whh1_ref[...], write_scratch=False)

    # ---- head: hc1 is already concat([h_n[-2], h_n[-1]], -1) ----
    h1 = jnp.dot(hc1_bf, fc1w_ref[...],
                 preferred_element_type=jnp.float32) + fc1b_ref[...]
    h1 = jnp.maximum(h1, 0.0)
    out = jnp.dot(h1.astype(jnp.bfloat16), fc2w_ref[...],
                  preferred_element_type=jnp.float32) + fc2b_ref[...]
    o_ref[...] = out
    # TODO(synk): on v7x the fwd/bwd recurrences could be split across the two
    # TensorCores with pl.core_map; kept single-core here for portability.


# ---------------------------------------------------------------------------
# Full module forward: one pallas_call for the whole model.
# ---------------------------------------------------------------------------
@jax.jit
def lstm_module_forward(x, params):
    """x: (B, T, embed_dim) float32 -> (B, output_size) float32."""
    B, T, D = x.shape
    Bp = max(8, ((B + 7) // 8) * 8)       # pad batch to sublane granularity
    x_pad = jnp.pad(x, ((0, Bp - B), (0, 0), (0, 0)))
    # Time-major flat layout, bf16 operands (accumulation stays f32 in-kernel).
    x_flat = jnp.transpose(x_pad, (1, 0, 2)).reshape(T * Bp, D).astype(jnp.bfloat16)

    args = (x_flat,
            params["wih0"], params["whh0"], params["b0"],
            params["wih1_a"], params["wih1_b"], params["whh1"], params["b1"],
            params["fc1_w"], params["fc1_b"], params["fc2_w"], params["fc2_b"])

    in_specs = [pl.BlockSpec(a.shape, lambda: (0, 0)) for a in args]
    out_spec = pl.BlockSpec((Bp, OUTPUT_SIZE), lambda: (0, 0))

    out = pl.pallas_call(
        functools.partial(_fused_lstm_mlp_kernel, T=T, Bp=Bp, H=HIDDEN_SIZE),
        out_shape=jax.ShapeDtypeStruct((Bp, OUTPUT_SIZE), jnp.float32),
        in_specs=in_specs,
        out_specs=out_spec,
        scratch_shapes=[pltpu.VMEM((T * Bp, HIDDEN_SIZE), jnp.float32),
                        pltpu.VMEM((T * Bp, HIDDEN_SIZE), jnp.float32)],
    )(*args)
    return out[:B]


# ---------------------------------------------------------------------------
# Deterministic parameter construction (PyTorch-style uniform init), laid out
# for the kernel:
#   * W_ih pre-transposed, both directions' gate columns interleaved
#     [i_f,i_b,f_f,f_b,g_f,g_b,o_f,o_b]  ->  (Din, 8H)
#   * W_hh as a permuted block-diagonal (2H, 8H): rows 0:H act on h_fwd and
#     feed forward-gate columns, rows H:2H act on h_bwd.
#   * b = b_ih + b_hh, same interleaved column layout (1, 8H).
#   * matmul operands cast to bf16 on the host; biases stay f32.
# ---------------------------------------------------------------------------
def init_params(key):
    H = HIDDEN_SIZE
    bound = H ** -0.5

    def uni(k, shape, b):
        return jax.random.uniform(k, shape, jnp.float32, -b, b)

    def interleave_cols(f_t, b_t):
        # f_t/b_t: (..., 4H) in PyTorch gate order [i,f,g,o] ->
        # (..., 8H) interleaved [i_f,i_b,f_f,f_b,g_f,g_b,o_f,o_b].
        chunks = []
        for g in range(4):
            chunks.append(f_t[..., g * H:(g + 1) * H])
            chunks.append(b_t[..., g * H:(g + 1) * H])
        return jnp.concatenate(chunks, axis=-1)

    def make_layer(key, din):
        key, k1, k2, k3, k4 = jax.random.split(key, 5)
        key, k5, k6, k7, k8 = jax.random.split(key, 5)
        w_ih_f = uni(k1, (4 * H, din), bound)        # PyTorch layout (4H, Din)
        w_hh_f = uni(k2, (4 * H, H), bound)          # PyTorch layout (4H, H)
        b_f = uni(k3, (4 * H,), bound) + uni(k4, (4 * H,), bound)
        w_ih_b = uni(k5, (4 * H, din), bound)
        w_hh_b = uni(k6, (4 * H, H), bound)
        b_b = uni(k7, (4 * H,), bound) + uni(k8, (4 * H,), bound)

        wih = interleave_cols(w_ih_f.T, w_ih_b.T)                        # (din, 8H)
        bias = interleave_cols(b_f.reshape(1, 4 * H),
                               b_b.reshape(1, 4 * H))                    # (1, 8H)
        zeros = jnp.zeros((H, H), jnp.float32)
        wf_t, wb_t = w_hh_f.T, w_hh_b.T                                  # (H, 4H)
        chunks = []
        for g in range(4):
            chunks.append(jnp.concatenate([wf_t[:, g * H:(g + 1) * H], zeros], axis=0))
            chunks.append(jnp.concatenate([zeros, wb_t[:, g * H:(g + 1) * H]], axis=0))
        whh = jnp.concatenate(chunks, axis=1)                            # (2H, 8H)
        return key, wih, whh, bias

    key, wih0, whh0, b0 = make_layer(key, EMBED_DIM)
    key, wih1, whh1, b1 = make_layer(key, 2 * H)

    key, k1, k2, k3, k4 = jax.random.split(key, 5)
    fc1_bound = (2 * H) ** -0.5
    fc2_bound = FC_HIDDEN ** -0.5
    bf16 = jnp.bfloat16
    return {
        "wih0": wih0.astype(bf16), "whh0": whh0.astype(bf16), "b0": b0,
        "wih1_a": wih1[:H].astype(bf16),      # rows acting on layer-0 fwd output
        "wih1_b": wih1[H:].astype(bf16),      # rows acting on layer-0 bwd output
        "whh1": whh1.astype(bf16), "b1": b1,
        # fc weights pre-transposed to (in, out); bf16 operands, f32 biases.
        "fc1_w": uni(k1, (2 * H, FC_HIDDEN), fc1_bound).astype(bf16),
        "fc1_b": uni(k2, (1, FC_HIDDEN), fc1_bound),
        "fc2_w": uni(k3, (FC_HIDDEN, OUTPUT_SIZE), fc2_bound).astype(bf16),
        "fc2_b": uni(k4, (1, OUTPUT_SIZE), fc2_bound),
    }


if __name__ == "__main__":
    key = jax.random.PRNGKey(0)
    k_x, k_p = jax.random.split(key)

    B, T = 2, 8
    x = jax.random.normal(k_x, (B, T, EMBED_DIM), jnp.float32)
    params = init_params(k_p)

    out = lstm_module_forward(x, params)
    jax.block_until_ready(out)
    assert out.shape == (B, OUTPUT_SIZE)
    assert bool(jnp.all(jnp.isfinite(out)))
    print("KERNEL_OK")
</pallas_src>

<mosaic_0001>
module attributes {stable_mosaic.version = 11 : i64} {
  func.func @_fused_lstm_mlp_kernel(%arg0: memref<64x32xbf16, #tpu.memory_space<vmem>>, %arg1: memref<32x256xbf16, #tpu.memory_space<vmem>>, %arg2: memref<64x256xbf16, #tpu.memory_space<vmem>>, %arg3: memref<1x256xf32, #tpu.memory_space<vmem>>, %arg4: memref<32x256xbf16, #tpu.memory_space<vmem>>, %arg5: memref<32x256xbf16, #tpu.memory_space<vmem>>, %arg6: memref<64x256xbf16, #tpu.memory_space<vmem>>, %arg7: memref<1x256xf32, #tpu.memory_space<vmem>>, %arg8: memref<64x64xbf16, #tpu.memory_space<vmem>>, %arg9: memref<1x64xf32, #tpu.memory_space<vmem>>, %arg10: memref<64x4xbf16, #tpu.memory_space<vmem>>, %arg11: memref<1x4xf32, #tpu.memory_space<vmem>>, %arg12: memref<8x4xf32, #tpu.memory_space<vmem>>, %arg13: memref<64x32xf32, #tpu.memory_space<vmem>>, %arg14: memref<64x32xf32, #tpu.memory_space<vmem>>) attributes {dimension_semantics = [], scalar_prefetch = 0 : i64, scratch_operands = 2 : i64, tpu.core_type = #tpu.core_type<tc>} {
    %0 = tpu.iota {dimensions = array<i32: 1>} : vector<1x256xi32>
    %c32_i32 = arith.constant 32 : i32
    %1 = vector.broadcast %c32_i32 : i32 to vector<1x256xi32>
    %2 = arith.andi %0, %1 : vector<1x256xi32>
    %c0_i32 = arith.constant 0 : i32
    %3 = vector.broadcast %c0_i32 : i32 to vector<1x256xi32>
    %4 = arith.cmpi eq, %2, %3 : vector<1x256xi32>
    %c0 = arith.constant 0 : index
    %c0_0 = arith.constant 0 : index
    %5 = vector.load %arg0[%c0, %c0_0] : memref<64x32xbf16, #tpu.memory_space<vmem>>, vector<64x32xbf16>
    %c0_1 = arith.constant 0 : index
    %c0_2 = arith.constant 0 : index
    %6 = vector.load %arg1[%c0_1, %c0_2] : memref<32x256xbf16, #tpu.memory_space<vmem>>, vector<32x256xbf16>
    %cst = arith.constant dense<0.000000e+00> : vector<64x256xf32>
    %7 = tpu.matmul %5, %6, %cst {dimension_numbers = #tpu.dot_dimension_numbers<[1], [0], [0], [1], [0, 0, 1, 1], [], []>} : vector<64x32xbf16>, vector<32x256xbf16>, vector<64x256xf32> -> vector<64x256xf32>
    %c0_3 = arith.constant 0 : index
    %c0_4 = arith.constant 0 : index
    %8 = vector.load %arg3[%c0_3, %c0_4] : memref<1x256xf32, #tpu.memory_space<vmem>>, vector<1x256xf32>
    %9 = vector.broadcast %8 : vector<1x256xf32> to vector<64x256xf32>
    %10 = arith.addf %7, %9 : vector<64x256xf32>
    %c0_5 = arith.constant 0 : index
    %c0_6 = arith.constant 0 : index
    %11 = vector.load %arg2[%c0_5, %c0_6] : memref<64x256xbf16, #tpu.memory_space<vmem>>, vector<64x256xbf16>
    %12 = vector.extract_strided_slice %10 {offsets = [0, 0], sizes = [8, 256], strides = [1, 1]} : vector<64x256xf32> to vector<8x256xf32>
    %13 = vector.extract_strided_slice %10 {offsets = [56, 0], sizes = [8, 256], strides = [1, 1]} : vector<64x256xf32> to vector<8x256xf32>
    %14 = vector.shape_cast %4 : vector<1x256xi1> to vector<1x256xi1>
    %15 = vector.broadcast %14 : vector<1x256xi1> to vector<8x256xi1>
    %16 = arith.select %15, %12, %13 : vector<8x256xi1>, vector<8x256xf32>
    %17 = vector.extract_strided_slice %10 {offsets = [8, 0], sizes = [8, 256], strides = [1, 1]} : vector<64x256xf32> to vector<8x256xf32>
    %18 = vector.extract_strided_slice %10 {offsets = [48, 0], sizes = [8, 256], strides = [1, 1]} : vector<64x256xf32> to vector<8x256xf32>
    %19 = vector.shape_cast %4 : vector<1x256xi1> to vector<1x256xi1>
    %20 = vector.broadcast %19 : vector<1x256xi1> to vector<8x256xi1>
    %21 = arith.select %20, %17, %18 : vector<8x256xi1>, vector<8x256xf32>
    %22 = vector.extract_strided_slice %10 {offsets = [16, 0], sizes = [8, 256], strides = [1, 1]} : vector<64x256xf32> to vector<8x256xf32>
    %23 = vector.extract_strided_slice %10 {offsets = [40, 0], sizes = [8, 256], strides = [1, 1]} : vector<64x256xf32> to vector<8x256xf32>
    %24 = vector.shape_cast %4 : vector<1x256xi1> to vector<1x256xi1>
    %25 = vector.broadcast %24 : vector<1x256xi1> to vector<8x256xi1>
    %26 = arith.select %25, %22, %23 : vector<8x256xi1>, vector<8x256xf32>
    %27 = vector.extract_strided_slice %10 {offsets = [24, 0], sizes = [8, 256], strides = [1, 1]} : vector<64x256xf32> to vector<8x256xf32>
    %28 = vector.extract_strided_slice %10 {offsets = [32, 0], sizes = [8, 256], strides = [1, 1]} : vector<64x256xf32> to vector<8x256xf32>
    %29 = vector.shape_cast %4 : vector<1x256xi1> to vector<1x256xi1>
    %30 = vector.broadcast %29 : vector<1x256xi1> to vector<8x256xi1>
    %31 = arith.select %30, %27, %28 : vector<8x256xi1>, vector<8x256xf32>
    %32 = vector.extract_strided_slice %10 {offsets = [32, 0], sizes = [8, 256], strides = [1, 1]} : vector<64x256xf32> to vector<8x256xf32>
    %33 = vector.extract_strided_slice %10 {offsets = [24, 0], sizes = [8, 256], strides = [1, 1]} : vector<64x256xf32> to vector<8x256xf32>
    %34 = vector.shape_cast %4 : vector<1x256xi1> to vector<1x256xi1>
    %35 = vector.broadcast %34 : vector<1x256xi1> to vector<8x256xi1>
    %36 = arith.select %35, %32, %33 : vector<8x256xi1>, vector<8x256xf32>
    %37 = vector.extract_strided_slice %10 {offsets = [40, 0], sizes = [8, 256], strides = [1, 1]} : vector<64x256xf32> to vector<8x256xf32>
    %38 = vector.extract_strided_slice %10 {offsets = [16, 0], sizes = [8, 256], strides = [1, 1]} : vector<64x256xf32> to vector<8x256xf32>
    %39 = vector.shape_cast %4 : vector<1x256xi1> to vector<1x256xi1>
    %40 = vector.broadcast %39 : vector<1x256xi1> to vector<8x256xi1>
    %41 = arith.select %40, %37, %38 : vector<8x256xi1>, vector<8x256xf32>
    %42 = vector.extract_strided_slice %10 {offsets = [48, 0], sizes = [8, 256], strides = [1, 1]} : vector<64x256xf32> to vector<8x256xf32>
    %43 = vector.extract_strided_slice %10 {offsets = [8, 0], sizes = [8, 256], strides = [1, 1]} : vector<64x256xf32> to vector<8x256xf32>
    %44 = vector.shape_cast %4 : vector<1x256xi1> to vector<1x256xi1>
    %45 = vector.broadcast %44 : vector<1x256xi1> to vector<8x256xi1>
    %46 = arith.select %45, %42, %43 : vector<8x256xi1>, vector<8x256xf32>
    %47 = vector.extract_strided_slice %10 {offsets = [56, 0], sizes = [8, 256], strides = [1, 1]} : vector<64x256xf32> to vector<8x256xf32>
    %48 = vector.extract_strided_slice %10 {offsets = [0, 0], sizes = [8, 256], strides = [1, 1]} : vector<64x256xf32> to vector<8x256xf32>
    %49 = vector.shape_cast %4 : vector<1x256xi1> to vector<1x256xi1>
    %50 = vector.broadcast %49 : vector<1x256xi1> to vector<8x256xi1>
    %51 = arith.select %50, %47, %48 : vector<8x256xi1>, vector<8x256xf32>
    %cst_7 = arith.constant 0.000000e+00 : f32
    %52 = vector.broadcast %cst_7 : f32 to vector<8x64xf32>
    %cst_8 = arith.constant 0.000000e+00 : f32
    %53 = vector.broadcast %cst_8 : f32 to vector<8x64xf32>
    %54 = arith.truncf %52 : vector<8x64xf32> to vector<8x64xbf16>
    %cst_9 = arith.constant dense<0.000000e+00> : vector<8x256xf32>
    %55 = tpu.matmul %54, %11, %cst_9 {dimension_numbers = #tpu.dot_dimension_numbers<[1], [0], [0], [1], [0, 0, 1, 1], [], []>} : vector<8x64xbf16>, vector<64x256xbf16>, vector<8x256xf32> -> vector<8x256xf32>
    %56 = arith.addf %16, %55 : vector<8x256xf32>
    %57 = arith.negf %56 : vector<8x256xf32>
    %58 = math.exp %57 : vector<8x256xf32>
    %cst_10 = arith.constant 1.000000e+00 : f32
    %59 = vector.broadcast %cst_10 : f32 to vector<8x256xf32>
    %60 = arith.addf %59, %58 : vector<8x256xf32>
    %61 = arith.divf %59, %60 : vector<8x256xf32>
    %62 = math.tanh %56 : vector<8x256xf32>
    %63 = vector.extract_strided_slice %61 {offsets = [0, 0], sizes = [8, 64], strides = [1, 1]} : vector<8x256xf32> to vector<8x64xf32>
    %64 = vector.extract_strided_slice %61 {offsets = [0, 64], sizes = [8, 64], strides = [1, 1]} : vector<8x256xf32> to vector<8x64xf32>
    %65 = vector.extract_strided_slice %62 {offsets = [0, 128], sizes = [8, 64], strides = [1, 1]} : vector<8x256xf32> to vector<8x64xf32>
    %66 = vector.extract_strided_slice %61 {offsets = [0, 192], sizes = [8, 64], strides = [1, 1]} : vector<8x256xf32> to vector<8x64xf32>
    %67 = arith.mulf %64, %53 : vector<8x64xf32>
    %68 = arith.mulf %63, %65 : vector<8x64xf32>
    %69 = arith.addf %67, %68 : vector<8x64xf32>
    %70 = math.tanh %69 : vector<8x64xf32>
    %71 = arith.mulf %66, %70 : vector<8x64xf32>
    %72 = arith.truncf %71 : vector<8x64xf32> to vector<8x64xbf16>
    %73 = vector.extract_strided_slice %71 {offsets = [0, 0], sizes = [8, 32], strides = [1, 1]} : vector<8x64xf32> to vector<8x32xf32>
    %c0_11 = arith.constant 0 : index
    %c0_12 = arith.constant 0 : index
    %74 = vector.load %arg13[%c0_11, %c0_12] : memref<64x32xf32, #tpu.memory_space<vmem>>, vector<8x32xf32>
    tpu.vector_store %arg13[%c0_11, %c0_12], %73 {strides = array<i32>} : memref<64x32xf32, #tpu.memory_space<vmem>>, vector<8x32xf32>,
    %75 = vector.extract_strided_slice %71 {offsets = [0, 32], sizes = [8, 32], strides = [1, 1]} : vector<8x64xf32> to vector<8x32xf32>
    %c56 = arith.constant 56 : index
    %c0_13 = arith.constant 0 : index
    %76 = vector.load %arg14[%c56, %c0_13] : memref<64x32xf32, #tpu.memory_space<vmem>>, vector<8x32xf32>
    tpu.vector_store %arg14[%c56, %c0_13], %75 {strides = array<i32>} : memref<64x32xf32, #tpu.memory_space<vmem>>, vector<8x32xf32>,
    %cst_14 = arith.constant dense<0.000000e+00> : vector<8x256xf32>
    %77 = tpu.matmul %72, %11, %cst_14 {dimension_numbers = #tpu.dot_dimension_numbers<[1], [0], [0], [1], [0, 0, 1, 1], [], []>} : vector<8x64xbf16>, vector<64x256xbf16>, vector<8x256xf32> -> vector<8x256xf32>
    %78 = arith.addf %21, %77 : vector<8x256xf32>
    %79 = arith.negf %78 : vector<8x256xf32>
    %80 = math.exp %79 : vector<8x256xf32>
    %cst_15 = arith.constant 1.000000e+00 : f32
    %81 = vector.broadcast %cst_15 : f32 to vector<8x256xf32>
    %82 = arith.addf %81, %80 : vector<8x256xf32>
    %83 = arith.divf %81, %82 : vector<8x256xf32>
    %84 = math.tanh %78 : vector<8x256xf32>
    %85 = vector.extract_strided_slice %83 {offsets = [0, 0], sizes = [8, 64], strides = [1, 1]} : vector<8x256xf32> to vector<8x64xf32>
    %86 = vector.extract_strided_slice %83 {offsets = [0, 64], sizes = [8, 64], strides = [1, 1]} : vector<8x256xf32> to vector<8x64xf32>
    %87 = vector.extract_strided_slice %84 {offsets = [0, 128], sizes = [8, 64], strides = [1, 1]} : vector<8x256xf32> to vector<8x64xf32>
    %88 = vector.extract_strided_slice %83 {offsets = [0, 192], sizes = [8, 64], strides = [1, 1]} : vector<8x256xf32> to vector<8x64xf32>
    %89 = arith.mulf %86, %69 : vector<8x64xf32>
    %90 = arith.mulf %85, %87 : vector<8x64xf32>
    %91 = arith.addf %89, %90 : vector<8x64xf32>
    %92 = math.tanh %91 : vector<8x64xf32>
    %93 = arith.mulf %88, %92 : vector<8x64xf32>
    %94 = arith.truncf %93 : vector<8x64xf32> to vector<8x64xbf16>
    %95 = vector.extract_strided_slice %93 {offsets = [0, 0], sizes = [8, 32], strides = [1, 1]} : vector<8x64xf32> to vector<8x32xf32>
    %c8 = arith.constant 8 : index
    %c0_16 = arith.constant 0 : index
    %96 = vector.load %arg13[%c8, %c0_16] : memref<64x32xf32, #tpu.memory_space<vmem>>, vector<8x32xf32>
    tpu.vector_store %arg13[%c8, %c0_16], %95 {strides = array<i32>} : memref<64x32xf32, #tpu.memory_space<vmem>>, vector<8x32xf32>,
    %97 = vector.extract_strided_slice %93 {offsets = [0, 32], sizes = [8, 32], strides = [1, 1]} : vector<8x64xf32> to vector<8x32xf32>
    %c48 = arith.constant 48 : index
    %c0_17 = arith.constant 0 : index
    %98 = vector.load %arg14[%c48, %c0_17] : memref<64x32xf32, #tpu.memory_space<vmem>>, vector<8x32xf32>
    tpu.vector_store %arg14[%c48, %c0_17], %97 {strides = array<i32>} : memref<64x32xf32, #tpu.memory_space<vmem>>, vector<8x32xf32>,
    %cst_18 = arith.constant dense<0.000000e+00> : vector<8x256xf32>
    %99 = tpu.matmul %94, %11, %cst_18 {dimension_numbers = #tpu.dot_dimension_numbers<[1], [0], [0], [1], [0, 0, 1, 1], [], []>} : vector<8x64xbf16>, vector<64x256xbf16>, vector<8x256xf32> -> vector<8x256xf32>
    %100 = arith.addf %26, %99 : vector<8x256xf32>
    %101 = arith.negf %100 : vector<8x256xf32>
    %102 = math.exp %101 : vector<8x256xf32>
    %cst_19 = arith.constant 1.000000e+00 : f32
    %103 = vector.broadcast %cst_19 : f32 to vector<8x256xf32>
    %104 = arith.addf %103, %102 : vector<8x256xf32>
    %105 = arith.divf %103, %104 : vector<8x256xf32>
    %106 = math.tanh %100 : vector<8x256xf32>
    %107 = vector.extract_strided_slice %105 {offsets = [0, 0], sizes = [8, 64], strides = [1, 1]} : vector<8x256xf32> to vector<8x64xf32>
    %108 = vector.extract_strided_slice %105 {offsets = [0, 64], sizes = [8, 64], strides = [1, 1]} : vector<8x256xf32> to vector<8x64xf32>
    %109 = vector.extract_strided_slice %106 {offsets = [0, 128], sizes = [8, 64], strides = [1, 1]} : vector<8x256xf32> to vector<8x64xf32>
    %110 = vector.extract_strided_slice %105 {offsets = [0, 192], sizes = [8, 64], strides = [1, 1]} : vector<8x256xf32> to vector<8x64xf32>
    %111 = arith.mulf %108, %91 : vector<8x64xf32>
    %112 = arith.mulf %107, %109 : vector<8x64xf32>
    %113 = arith.addf %111, %112 : vector<8x64xf32>
    %114 = math.tanh %113 : vector<8x64xf32>
    %115 = arith.mulf %110, %114 : vector<8x64xf32>
    %116 = arith.truncf %115 : vector<8x64xf32> to vector<8x64xbf16>
    %117 = vector.extract_strided_slice %115 {offsets = [0, 0], sizes = [8, 32], strides = [1, 1]} : vector<8x64xf32> to vector<8x32xf32>
    %c16 = arith.constant 16 : index
    %c0_20 = arith.constant 0 : index
    %118 = vector.load %arg13[%c16, %c0_20] : memref<64x32xf32, #tpu.memory_space<vmem>>, vector<8x32xf32>
    tpu.vector_store %arg13[%c16, %c0_20], %117 {strides = array<i32>} : memref<64x32xf32, #tpu.memory_space<vmem>>, vector<8x32xf32>,
    %119 = vector.extract_strided_slice %115 {offsets = [0, 32], sizes = [8, 32], strides = [1, 1]} : vector<8x64xf32> to vector<8x32xf32>
    %c40 = arith.constant 40 : index
    %c0_21 = arith.constant 0 : index
    %120 = vector.load %arg14[%c40, %c0_21] : memref<64x32xf32, #tpu.memory_space<vmem>>, vector<8x32xf32>
    tpu.vector_store %arg14[%c40, %c0_21], %119 {strides = array<i32>} : memref<64x32xf32, #tpu.memory_space<vmem>>, vector<8x32xf32>,
    %cst_22 = arith.constant dense<0.000000e+00> : vector<8x256xf32>
    %121 = tpu.matmul %116, %11, %cst_22 {dimension_numbers = #tpu.dot_dimension_numbers<[1], [0], [0], [1], [0, 0, 1, 1], [], []>} : vector<8x64xbf16>, vector<64x256xbf16>, vector<8x256xf32> -> vector<8x256xf32>
    %122 = arith.addf %31, %121 : vector<8x256xf32>
    %123 = arith.negf %122 : vector<8x256xf32>
    %124 = math.exp %123 : vector<8x256xf32>
    %cst_23 = arith.constant 1.000000e+00 : f32
    %125 = vector.broadcast %cst_23 : f32 to vector<8x256xf32>
    %126 = arith.addf %125, %124 : vector<8x256xf32>
    %127 = arith.divf %125, %126 : vector<8x256xf32>
    %128 = math.tanh %122 : vector<8x256xf32>
    %129 = vector.extract_strided_slice %127 {offsets = [0, 0], sizes = [8, 64], strides = [1, 1]} : vector<8x256xf32> to vector<8x64xf32>
    %130 = vector.extract_strided_slice %127 {offsets = [0, 64], sizes = [8, 64], strides = [1, 1]} : vector<8x256xf32> to vector<8x64xf32>
    %131 = vector.extract_strided_slice %128 {offsets = [0, 128], sizes = [8, 64], strides = [1, 1]} : vector<8x256xf32> to vector<8x64xf32>
    %132 = vector.extract_strided_slice %127 {offsets = [0, 192], sizes = [8, 64], strides = [1, 1]} : vector<8x256xf32> to vector<8x64xf32>
    %133 = arith.mulf %130, %113 : vector<8x64xf32>
    %134 = arith.mulf %129, %131 : vector<8x64xf32>
    %135 = arith.addf %133, %134 : vector<8x64xf32>
    %136 = math.tanh %135 : vector<8x64xf32>
    %137 = arith.mulf %132, %136 : vector<8x64xf32>
    %138 = arith.truncf %137 : vector<8x64xf32> to vector<8x64xbf16>
    %139 = vector.extract_strided_slice %137 {offsets = [0, 0], sizes = [8, 32], strides = [1, 1]} : vector<8x64xf32> to vector<8x32xf32>
    %c24 = arith.constant 24 : index
    %c0_24 = arith.constant 0 : index
    %140 = vector.load %arg13[%c24, %c0_24] : memref<64x32xf32, #tpu.memory_space<vmem>>, vector<8x32xf32>
    tpu.vector_store %arg13[%c24, %c0_24], %139 {strides = array<i32>} : memref<64x32xf32, #tpu.memory_space<vmem>>, vector<8x32xf32>,
    %141 = vector.extract_strided_slice %137 {offsets = [0, 32], sizes = [8, 32], strides = [1, 1]} : vector<8x64xf32> to vector<8x32xf32>
    %c32 = arith.constant 32 : index
    %c0_25 = arith.constant 0 : index
    %142 = vector.load %arg14[%c32, %c0_25] : memref<64x32xf32, #tpu.memory_space<vmem>>, vector<8x32xf32>
    tpu.vector_store %arg14[%c32, %c0_25], %141 {strides = array<i32>} : memref<64x32xf32, #tpu.memory_space<vmem>>, vector<8x32xf32>,
    %cst_26 = arith.constant dense<0.000000e+00> : vector<8x256xf32>
    %143 = tpu.matmul %138, %11, %cst_26 {dimension_numbers = #tpu.dot_dimension_numbers<[1], [0], [0], [1], [0, 0, 1, 1], [], []>} : vector<8x64xbf16>, vector<64x256xbf16>, vector<8x256xf32> -> vector<8x256xf32>
    %144 = arith.addf %36, %143 : vector<8x256xf32>
    %145 = arith.negf %144 : vector<8x256xf32>
    %146 = math.exp %145 : vector<8x256xf32>
    %cst_27 = arith.constant 1.000000e+00 : f32
    %147 = vector.broadcast %cst_27 : f32 to vector<8x256xf32>
    %148 = arith.addf %147, %146 : vector<8x256xf32>
    %149 = arith.divf %147, %148 : vector<8x256xf32>
    %150 = math.tanh %144 : vector<8x256xf32>
    %151 = vector.extract_strided_slice %149 {offsets = [0, 0], sizes = [8, 64], strides = [1, 1]} : vector<8x256xf32> to vector<8x64xf32>
    %152 = vector.extract_strided_slice %149 {offsets = [0, 64], sizes = [8, 64], strides = [1, 1]} : vector<8x256xf32> to vector<8x64xf32>
    %153 = vector.extract_strided_slice %150 {offsets = [0, 128], sizes = [8, 64], strides = [1, 1]} : vector<8x256xf32> to vector<8x64xf32>
    %154 = vector.extract_strided_slice %149 {offsets = [0, 192], sizes = [8, 64], strides = [1, 1]} : vector<8x256xf32> to vector<8x64xf32>
    %155 = arith.mulf %152, %135 : vector<8x64xf32>
    %156 = arith.mulf %151, %153 : vector<8x64xf32>
    %157 = arith.addf %155, %156 : vector<8x64xf32>
    %158 = math.tanh %157 : vector<8x64xf32>
    %159 = arith.mulf %154, %158 : vector<8x64xf32>
    %160 = arith.truncf %159 : vector<8x64xf32> to vector<8x64xbf16>
    %161 = vector.extract_strided_slice %159 {offsets = [0, 0], sizes = [8, 32], strides = [1, 1]} : vector<8x64xf32> to vector<8x32xf32>
    %c32_28 = arith.constant 32 : index
    %c0_29 = arith.constant 0 : index
    %162 = vector.load %arg13[%c32_28, %c0_29] : memref<64x32xf32, #tpu.memory_space<vmem>>, vector<8x32xf32>
    tpu.vector_store %arg13[%c32_28, %c0_29], %161 {strides = array<i32>} : memref<64x32xf32, #tpu.memory_space<vmem>>, vector<8x32xf32>,
    %163 = vector.extract_strided_slice %159 {offsets = [0, 32], sizes = [8, 32], strides = [1, 1]} : vector<8x64xf32> to vector<8x32xf32>
    %c24_30 = arith.constant 24 : index
    %c0_31 = arith.constant 0 : index
    %164 = vector.load %arg14[%c24_30, %c0_31] : memref<64x32xf32, #tpu.memory_space<vmem>>, vector<8x32xf32>
    tpu.vector_store %arg14[%c24_30, %c0_31], %163 {strides = array<i32>} : memref<64x32xf32, #tpu.memory_space<vmem>>, vector<8x32xf32>,
    %cst_32 = arith.constant dense<0.000000e+00> : vector<8x256xf32>
    %165 = tpu.matmul %160, %11, %cst_32 {dimension_numbers = #tpu.dot_dimension_numbers<[1], [0], [0], [1], [0, 0, 1, 1], [], []>} : vector<8x64xbf16>, vector<64x256xbf16>, vector<8x256xf32> -> vector<8x256xf32>
    %166 = arith.addf %41, %165 : vector<8x256xf32>
    %167 = arith.negf %166 : vector<8x256xf32>
    %168 = math.exp %167 : vector<8x256xf32>
    %cst_33 = arith.constant 1.000000e+00 : f32
    %169 = vector.broadcast %cst_33 : f32 to vector<8x256xf32>
    %170 = arith.addf %169, %168 : vector<8x256xf32>
    %171 = arith.divf %169, %170 : vector<8x256xf32>
    %172 = math.tanh %166 : vector<8x256xf32>
    %173 = vector.extract_strided_slice %171 {offsets = [0, 0], sizes = [8, 64], strides = [1, 1]} : vector<8x256xf32> to vector<8x64xf32>
    %174 = vector.extract_strided_slice %171 {offsets = [0, 64], sizes = [8, 64], strides = [1, 1]} : vector<8x256xf32> to vector<8x64xf32>
    %175 = vector.extract_strided_slice %172 {offsets = [0, 128], sizes = [8, 64], strides = [1, 1]} : vector<8x256xf32> to vector<8x64xf32>
    %176 = vector.extract_strided_slice %171 {offsets = [0, 192], sizes = [8, 64], strides = [1, 1]} : vector<8x256xf32> to vector<8x64xf32>
    %177 = arith.mulf %174, %157 : vector<8x64xf32>
    %178 = arith.mulf %173, %175 : vector<8x64xf32>
    %179 = arith.addf %177, %178 : vector<8x64xf32>
    %180 = math.tanh %179 : vector<8x64xf32>
    %181 = arith.mulf %176, %180 : vector<8x64xf32>
    %182 = arith.truncf %181 : vector<8x64xf32> to vector<8x64xbf16>
    %183 = vector.extract_strided_slice %181 {offsets = [0, 0], sizes = [8, 32], strides = [1, 1]} : vector<8x64xf32> to vector<8x32xf32>
    %c40_34 = arith.constant 40 : index
    %c0_35 = arith.constant 0 : index
    %184 = vector.load %arg13[%c40_34, %c0_35] : memref<64x32xf32, #tpu.memory_space<vmem>>, vector<8x32xf32>
    tpu.vector_store %arg13[%c40_34, %c0_35], %183 {strides = array<i32>} : memref<64x32xf32, #tpu.memory_space<vmem>>, vector<8x32xf32>,
    %185 = vector.extract_strided_slice %181 {offsets = [0, 32], sizes = [8, 32], strides = [1, 1]} : vector<8x64xf32> to vector<8x32xf32>
    %c16_36 = arith.constant 16 : index
    %c0_37 = arith.constant 0 : index
    %186 = vector.load %arg14[%c16_36, %c0_37] : memref<64x32xf32, #tpu.memory_space<vmem>>, vector<8x32xf32>
    tpu.vector_store %arg14[%c16_36, %c0_37], %185 {strides = array<i32>} : memref<64x32xf32, #tpu.memory_space<vmem>>, vector<8x32xf32>,
    %cst_38 = arith.constant dense<0.000000e+00> : vector<8x256xf32>
    %187 = tpu.matmul %182, %11, %cst_38 {dimension_numbers = #tpu.dot_dimension_numbers<[1], [0], [0], [1], [0, 0, 1, 1], [], []>} : vector<8x64xbf16>, vector<64x256xbf16>, vector<8x256xf32> -> vector<8x256xf32>
    %188 = arith.addf %46, %187 : vector<8x256xf32>
    %189 = arith.negf %188 : vector<8x256xf32>
    %190 = math.exp %189 : vector<8x256xf32>
    %cst_39 = arith.constant 1.000000e+00 : f32
    %191 = vector.broadcast %cst_39 : f32 to vector<8x256xf32>
    %192 = arith.addf %191, %190 : vector<8x256xf32>
    %193 = arith.divf %191, %192 : vector<8x256xf32>
    %194 = math.tanh %188 : vector<8x256xf32>
    %195 = vector.extract_strided_slice %193 {offsets = [0, 0], sizes = [8, 64], strides = [1, 1]} : vector<8x256xf32> to vector<8x64xf32>
    %196 = vector.extract_strided_slice %193 {offsets = [0, 64], sizes = [8, 64], strides = [1, 1]} : vector<8x256xf32> to vector<8x64xf32>
    %197 = vector.extract_strided_slice %194 {offsets = [0, 128], sizes = [8, 64], strides = [1, 1]} : vector<8x256xf32> to vector<8x64xf32>
    %198 = vector.extract_strided_slice %193 {offsets = [0, 192], sizes = [8, 64], strides = [1, 1]} : vector<8x256xf32> to vector<8x64xf32>
    %199 = arith.mulf %196, %179 : vector<8x64xf32>
    %200 = arith.mulf %195, %197 : vector<8x64xf32>
    %201 = arith.addf %199, %200 : vector<8x64xf32>
    %202 = math.tanh %201 : vector<8x64xf32>
    %203 = arith.mulf %198, %202 : vector<8x64xf32>
    %204 = arith.truncf %203 : vector<8x64xf32> to vector<8x64xbf16>
    %205 = vector.extract_strided_slice %203 {offsets = [0, 0], sizes = [8, 32], strides = [1, 1]} : vector<8x64xf32> to vector<8x32xf32>
    %c48_40 = arith.constant 48 : index
    %c0_41 = arith.constant 0 : index
    %206 = vector.load %arg13[%c48_40, %c0_41] : memref<64x32xf32, #tpu.memory_space<vmem>>, vector<8x32xf32>
    tpu.vector_store %arg13[%c48_40, %c0_41], %205 {strides = array<i32>} : memref<64x32xf32, #tpu.memory_space<vmem>>, vector<8x32xf32>,
    %207 = vector.extract_strided_slice %203 {offsets = [0, 32], sizes = [8, 32], strides = [1, 1]} : vector<8x64xf32> to vector<8x32xf32>
    %c8_42 = arith.constant 8 : index
    %c0_43 = arith.constant 0 : index
    %208 = vector.load %arg14[%c8_42, %c0_43] : memref<64x32xf32, #tpu.memory_space<vmem>>, vector<8x32xf32>
    tpu.vector_store %arg14[%c8_42, %c0_43], %207 {strides = array<i32>} : memref<64x32xf32, #tpu.memory_space<vmem>>, vector<8x32xf32>,
    %cst_44 = arith.constant dense<0.000000e+00> : vector<8x256xf32>
    %209 = tpu.matmul %204, %11, %cst_44 {dimension_numbers = #tpu.dot_dimension_numbers<[1], [0], [0], [1], [0, 0, 1, 1], [], []>} : vector<8x64xbf16>, vector<64x256xbf16>, vector<8x256xf32> -> vector<8x256xf32>
    %210 = arith.addf %51, %209 : vector<8x256xf32>
    %211 = arith.negf %210 : vector<8x256xf32>
    %212 = math.exp %211 : vector<8x256xf32>
    %cst_45 = arith.constant 1.000000e+00 : f32
    %213 = vector.broadcast %cst_45 : f32 to vector<8x256xf32>
    %214 = arith.addf %213, %212 : vector<8x256xf32>
    %215 = arith.divf %213, %214 : vector<8x256xf32>
    %216 = math.tanh %210 : vector<8x256xf32>
    %217 = vector.extract_strided_slice %215 {offsets = [0, 0], sizes = [8, 64], strides = [1, 1]} : vector<8x256xf32> to vector<8x64xf32>
    %218 = vector.extract_strided_slice %215 {offsets = [0, 64], sizes = [8, 64], strides = [1, 1]} : vector<8x256xf32> to vector<8x64xf32>
    %219 = vector.extract_strided_slice %216 {offsets = [0, 128], sizes = [8, 64], strides = [1, 1]} : vector<8x256xf32> to vector<8x64xf32>
    %220 = vector.extract_strided_slice %215 {offsets = [0, 192], sizes = [8, 64], strides = [1, 1]} : vector<8x256xf32> to vector<8x64xf32>
    %221 = arith.mulf %218, %201 : vector<8x64xf32>
    %222 = arith.mulf %217, %219 : vector<8x64xf32>
    %223 = arith.addf %221, %222 : vector<8x64xf32>
    %224 = math.tanh %223 : vector<8x64xf32>
    %225 = arith.mulf %220, %224 : vector<8x64xf32>
    %226 = vector.extract_strided_slice %225 {offsets = [0, 0], sizes = [8, 32], strides = [1, 1]} : vector<8x64xf32> to vector<8x32xf32>
    %c56_46 = arith.constant 56 : index
    %c0_47 = arith.constant 0 : index
    %227 = vector.load %arg13[%c56_46, %c0_47] : memref<64x32xf32, #tpu.memory_space<vmem>>, vector<8x32xf32>
    tpu.vector_store %arg13[%c56_46, %c0_47], %226 {strides = array<i32>} : memref<64x32xf32, #tpu.memory_space<vmem>>, vector<8x32xf32>,
    %228 = vector.extract_strided_slice %225 {offsets = [0, 32], sizes = [8, 32], strides = [1, 1]} : vector<8x64xf32> to vector<8x32xf32>
    %c0_48 = arith.constant 0 : index
    %c0_49 = arith.constant 0 : index
    %229 = vector.load %arg14[%c0_48, %c0_49] : memref<64x32xf32, #tpu.memory_space<vmem>>, vector<8x32xf32>
    tpu.vector_store %arg14[%c0_48, %c0_49], %228 {strides = array<i32>} : memref<64x32xf32, #tpu.memory_space<vmem>>, vector<8x32xf32>,
    %c0_50 = arith.constant 0 : index
    %c0_51 = arith.constant 0 : index
    %230 = vector.load %arg13[%c0_50, %c0_51] : memref<64x32xf32, #tpu.memory_space<vmem>>, vector<64x32xf32>
    %231 = arith.truncf %230 : vector<64x32xf32> to vector<64x32xbf16>
    %c0_52 = arith.constant 0 : index
    %c0_53 = arith.constant 0 : index
    %232 = vector.load %arg14[%c0_52, %c0_53] : memref<64x32xf32, #tpu.memory_space<vmem>>, vector<64x32xf32>
    %233 = arith.truncf %232 : vector<64x32xf32> to vector<64x32xbf16>
    %c0_54 = arith.constant 0 : index
    %c0_55 = arith.constant 0 : index
    %234 = vector.load %arg4[%c0_54, %c0_55] : memref<32x256xbf16, #tpu.memory_space<vmem>>, vector<32x256xbf16>
    %cst_56 = arith.constant dense<0.000000e+00> : vector<64x256xf32>
    %235 = tpu.matmul %231, %234, %cst_56 {dimension_numbers = #tpu.dot_dimension_numbers<[1], [0], [0], [1], [0, 0, 1, 1], [], []>} : vector<64x32xbf16>, vector<32x256xbf16>, vector<64x256xf32> -> vector<64x256xf32>
    %c0_57 = arith.constant 0 : index
    %c0_58 = arith.constant 0 : index
    %236 = vector.load %arg5[%c0_57, %c0_58] : memref<32x256xbf16, #tpu.memory_space<vmem>>, vector<32x256xbf16>
    %cst_59 = arith.constant dense<0.000000e+00> : vector<64x256xf32>
    %237 = tpu.matmul %233, %236, %cst_59 {dimension_numbers = #tpu.dot_dimension_numbers<[1], [0], [0], [1], [0, 0, 1, 1], [], []>} : vector<64x32xbf16>, vector<32x256xbf16>, vector<64x256xf32> -> vector<64x256xf32>
    %238 = arith.addf %235, %237 : vector<64x256xf32>
    %c0_60 = arith.constant 0 : index
    %c0_61 = arith.constant 0 : index
    %239 = vector.load %arg7[%c0_60, %c0_61] : memref<1x256xf32, #tpu.memory_space<vmem>>, vector<1x256xf32>
    %240 = vector.broadcast %239 : vector<1x256xf32> to vector<64x256xf32>
    %241 = arith.addf %238, %240 : vector<64x256xf32>
    %c0_62 = arith.constant 0 : index
    %c0_63 = arith.constant 0 : index
    %242 = vector.load %arg6[%c0_62, %c0_63] : memref<64x256xbf16, #tpu.memory_space<vmem>>, vector<64x256xbf16>
    %243 = vector.extract_strided_slice %241 {offsets = [0, 0], sizes = [8, 256], strides = [1, 1]} : vector<64x256xf32> to vector<8x256xf32>
    %244 = vector.extract_strided_slice %241 {offsets = [56, 0], sizes = [8, 256], strides = [1, 1]} : vector<64x256xf32> to vector<8x256xf32>
    %245 = vector.shape_cast %4 : vector<1x256xi1> to vector<1x256xi1>
    %246 = vector.broadcast %245 : vector<1x256xi1> to vector<8x256xi1>
    %247 = arith.select %246, %243, %244 : vector<8x256xi1>, vector<8x256xf32>
    %248 = vector.extract_strided_slice %241 {offsets = [8, 0], sizes = [8, 256], strides = [1, 1]} : vector<64x256xf32> to vector<8x256xf32>
    %249 = vector.extract_strided_slice %241 {offsets = [48, 0], sizes = [8, 256], strides = [1, 1]} : vector<64x256xf32> to vector<8x256xf32>
    %250 = vector.shape_cast %4 : vector<1x256xi1> to vector<1x256xi1>
    %251 = vector.broadcast %250 : vector<1x256xi1> to vector<8x256xi1>
    %252 = arith.select %251, %248, %249 : vector<8x256xi1>, vector<8x256xf32>
    %253 = vector.extract_strided_slice %241 {offsets = [16, 0], sizes = [8, 256], strides = [1, 1]} : vector<64x256xf32> to vector<8x256xf32>
    %254 = vector.extract_strided_slice %241 {offsets = [40, 0], sizes = [8, 256], strides = [1, 1]} : vector<64x256xf32> to vector<8x256xf32>
    %255 = vector.shape_cast %4 : vector<1x256xi1> to vector<1x256xi1>
    %256 = vector.broadcast %255 : vector<1x256xi1> to vector<8x256xi1>
    %257 = arith.select %256, %253, %254 : vector<8x256xi1>, vector<8x256xf32>
    %258 = vector.extract_strided_slice %241 {offsets = [24, 0], sizes = [8, 256], strides = [1, 1]} : vector<64x256xf32> to vector<8x256xf32>
    %259 = vector.extract_strided_slice %241 {offsets = [32, 0], sizes = [8, 256], strides = [1, 1]} : vector<64x256xf32> to vector<8x256xf32>
    %260 = vector.shape_cast %4 : vector<1x256xi1> to vector<1x256xi1>
    %261 = vector.broadcast %260 : vector<1x256xi1> to vector<8x256xi1>
    %262 = arith.select %261, %258, %259 : vector<8x256xi1>, vector<8x256xf32>
    %263 = vector.extract_strided_slice %241 {offsets = [32, 0], sizes = [8, 256], strides = [1, 1]} : vector<64x256xf32> to vector<8x256xf32>
    %264 = vector.extract_strided_slice %241 {offsets = [24, 0], sizes = [8, 256], strides = [1, 1]} : vector<64x256xf32> to vector<8x256xf32>
    %265 = vector.shape_cast %4 : vector<1x256xi1> to vector<1x256xi1>
    %266 = vector.broadcast %265 : vector<1x256xi1> to vector<8x256xi1>
    %267 = arith.select %266, %263, %264 : vector<8x256xi1>, vector<8x256xf32>
    %268 = vector.extract_strided_slice %241 {offsets = [40, 0], sizes = [8, 256], strides = [1, 1]} : vector<64x256xf32> to vector<8x256xf32>
    %269 = vector.extract_strided_slice %241 {offsets = [16, 0], sizes = [8, 256], strides = [1, 1]} : vector<64x256xf32> to vector<8x256xf32>
    %270 = vector.shape_cast %4 : vector<1x256xi1> to vector<1x256xi1>
    %271 = vector.broadcast %270 : vector<1x256xi1> to vector<8x256xi1>
    %272 = arith.select %271, %268, %269 : vector<8x256xi1>, vector<8x256xf32>
    %273 = vector.extract_strided_slice %241 {offsets = [48, 0], sizes = [8, 256], strides = [1, 1]} : vector<64x256xf32> to vector<8x256xf32>
    %274 = vector.extract_strided_slice %241 {offsets = [8, 0], sizes = [8, 256], strides = [1, 1]} : vector<64x256xf32> to vector<8x256xf32>
    %275 = vector.shape_cast %4 : vector<1x256xi1> to vector<1x256xi1>
    %276 = vector.broadcast %275 : vector<1x256xi1> to vector<8x256xi1>
    %277 = arith.select %276, %273, %274 : vector<8x256xi1>, vector<8x256xf32>
    %278 = vector.extract_strided_slice %241 {offsets = [56, 0], sizes = [8, 256], strides = [1, 1]} : vector<64x256xf32> to vector<8x256xf32>
    %279 = vector.extract_strided_slice %241 {offsets = [0, 0], sizes = [8, 256], strides = [1, 1]} : vector<64x256xf32> to vector<8x256xf32>
    %280 = vector.shape_cast %4 : vector<1x256xi1> to vector<1x256xi1>
    %281 = vector.broadcast %280 : vector<1x256xi1> to vector<8x256xi1>
    %282 = arith.select %281, %278, %279 : vector<8x256xi1>, vector<8x256xf32>
    %cst_64 = arith.constant 0.000000e+00 : f32
    %283 = vector.broadcast %cst_64 : f32 to vector<8x64xf32>
    %cst_65 = arith.constant 0.000000e+00 : f32
    %284 = vector.broadcast %cst_65 : f32 to vector<8x64xf32>
    %285 = arith.truncf %283 : vector<8x64xf32> to vector<8x64xbf16>
    %cst_66 = arith.constant dense<0.000000e+00> : vector<8x256xf32>
    %286 = tpu.matmul %285, %242, %cst_66 {dimension_numbers = #tpu.dot_dimension_numbers<[1], [0], [0], [1], [0, 0, 1, 1], [], []>} : vector<8x64xbf16>, vector<64x256xbf16>, vector<8x256xf32> -> vector<8x256xf32>
    %287 = arith.addf %247, %286 : vector<8x256xf32>
    %288 = arith.negf %287 : vector<8x256xf32>
    %289 = math.exp %288 : vector<8x256xf32>
    %cst_67 = arith.constant 1.000000e+00 : f32
    %290 = vector.broadcast %cst_67 : f32 to vector<8x256xf32>
    %291 = arith.addf %290, %289 : vector<8x256xf32>
    %292 = arith.divf %290, %291 : vector<8x256xf32>
    %293 = math.tanh %287 : vector<8x256xf32>
    %294 = vector.extract_strided_slice %292 {offsets = [0, 0], sizes = [8, 64], strides = [1, 1]} : vector<8x256xf32> to vector<8x64xf32>
    %295 = vector.extract_strided_slice %292 {offsets = [0, 64], sizes = [8, 64], strides = [1, 1]} : vector<8x256xf32> to vector<8x64xf32>
    %296 = vector.extract_strided_slice %293 {offsets = [0, 128], sizes = [8, 64], strides = [1, 1]} : vector<8x256xf32> to vector<8x64xf32>
    %297 = vector.extract_strided_slice %292 {offsets = [0, 192], sizes = [8, 64], strides = [1, 1]} : vector<8x256xf32> to vector<8x64xf32>
    %298 = arith.mulf %295, %284 : vector<8x64xf32>
    %299 = arith.mulf %294, %296 : vector<8x64xf32>
    %300 = arith.addf %298, %299 : vector<8x64xf32>
    %301 = math.tanh %300 : vector<8x64xf32>
    %302 = arith.mulf %297, %301 : vector<8x64xf32>
    %303 = arith.truncf %302 : vector<8x64xf32> to vector<8x64xbf16>
    %cst_68 = arith.constant dense<0.000000e+00> : vector<8x256xf32>
    %304 = tpu.matmul %303, %242, %cst_68 {dimension_numbers = #tpu.dot_dimension_numbers<[1], [0], [0], [1], [0, 0, 1, 1], [], []>} : vector<8x64xbf16>, vector<64x256xbf16>, vector<8x256xf32> -> vector<8x256xf32>
    %305 = arith.addf %252, %304 : vector<8x256xf32>
    %306 = arith.negf %305 : vector<8x256xf32>
    %307 = math.exp %306 : vector<8x256xf32>
    %cst_69 = arith.constant 1.000000e+00 : f32
    %308 = vector.broadcast %cst_69 : f32 to vector<8x256xf32>
    %309 = arith.addf %308, %307 : vector<8x256xf32>
    %310 = arith.divf %308, %309 : vector<8x256xf32>
    %311 = math.tanh %305 : vector<8x256xf32>
    %312 = vector.extract_strided_slice %310 {offsets = [0, 0], sizes = [8, 64], strides = [1, 1]} : vector<8x256xf32> to vector<8x64xf32>
    %313 = vector.extract_strided_slice %310 {offsets = [0, 64], sizes = [8, 64], strides = [1, 1]} : vector<8x256xf32> to vector<8x64xf32>
    %314 = vector.extract_strided_slice %311 {offsets = [0, 128], sizes = [8, 64], strides = [1, 1]} : vector<8x256xf32> to vector<8x64xf32>
    %315 = vector.extract_strided_slice %310 {offsets = [0, 192], sizes = [8, 64], strides = [1, 1]} : vector<8x256xf32> to vector<8x64xf32>
    %316 = arith.mulf %313, %300 : vector<8x64xf32>
    %317 = arith.mulf %312, %314 : vector<8x64xf32>
    %318 = arith.addf %316, %317 : vector<8x64xf32>
    %319 = math.tanh %318 : vector<8x64xf32>
    %320 = arith.mulf %315, %319 : vector<8x64xf32>
    %321 = arith.truncf %320 : vector<8x64xf32> to vector<8x64xbf16>
    %cst_70 = arith.constant dense<0.000000e+00> : vector<8x256xf32>
    %322 = tpu.matmul %321, %242, %cst_70 {dimension_numbers = #tpu.dot_dimension_numbers<[1], [0], [0], [1], [0, 0, 1, 1], [], []>} : vector<8x64xbf16>, vector<64x256xbf16>, vector<8x256xf32> -> vector<8x256xf32>
    %323 = arith.addf %257, %322 : vector<8x256xf32>
    %324 = arith.negf %323 : vector<8x256xf32>
    %325 = math.exp %324 : vector<8x256xf32>
    %cst_71 = arith.constant 1.000000e+00 : f32
    %326 = vector.broadcast %cst_71 : f32 to vector<8x256xf32>
    %327 = arith.addf %326, %325 : vector<8x256xf32>
    %328 = arith.divf %326, %327 : vector<8x256xf32>
    %329 = math.tanh %323 : vector<8x256xf32>
    %330 = vector.extract_strided_slice %328 {offsets = [0, 0], sizes = [8, 64], strides = [1, 1]} : vector<8x256xf32> to vector<8x64xf32>
    %331 = vector.extract_strided_slice %328 {offsets = [0, 64], sizes = [8, 64], strides = [1, 1]} : vector<8x256xf32> to vector<8x64xf32>
    %332 = vector.extract_strided_slice %329 {offsets = [0, 128], sizes = [8, 64], strides = [1, 1]} : vector<8x256xf32> to vector<8x64xf32>
    %333 = vector.extract_strided_slice %328 {offsets = [0, 192], sizes = [8, 64], strides = [1, 1]} : vector<8x256xf32> to vector<8x64xf32>
    %334 = arith.mulf %331, %318 : vector<8x64xf32>
    %335 = arith.mulf %330, %332 : vector<8x64xf32>
    %336 = arith.addf %334, %335 : vector<8x64xf32>
    %337 = math.tanh %336 : vector<8x64xf32>
    %338 = arith.mulf %333, %337 : vector<8x64xf32>
    %339 = arith.truncf %338 : vector<8x64xf32> to vector<8x64xbf16>
    %cst_72 = arith.constant dense<0.000000e+00> : vector<8x256xf32>
    %340 = tpu.matmul %339, %242, %cst_72 {dimension_numbers = #tpu.dot_dimension_numbers<[1], [0], [0], [1], [0, 0, 1, 1], [], []>} : vector<8x64xbf16>, vector<64x256xbf16>, vector<8x256xf32> -> vector<8x256xf32>
    %341 = arith.addf %262, %340 : vector<8x256xf32>
    %342 = arith.negf %341 : vector<8x256xf32>
    %343 = math.exp %342 : vector<8x256xf32>
    %cst_73 = arith.constant 1.000000e+00 : f32
    %344 = vector.broadcast %cst_73 : f32 to vector<8x256xf32>
    %345 = arith.addf %344, %343 : vector<8x256xf32>
    %346 = arith.divf %344, %345 : vector<8x256xf32>
    %347 = math.tanh %341 : vector<8x256xf32>
    %348 = vector.extract_strided_slice %346 {offsets = [0, 0], sizes = [8, 64], strides = [1, 1]} : vector<8x256xf32> to vector<8x64xf32>
    %349 = vector.extract_strided_slice %346 {offsets = [0, 64], sizes = [8, 64], strides = [1, 1]} : vector<8x256xf32> to vector<8x64xf32>
    %350 = vector.extract_strided_slice %347 {offsets = [0, 128], sizes = [8, 64], strides = [1, 1]} : vector<8x256xf32> to vector<8x64xf32>
    %351 = vector.extract_strided_slice %346 {offsets = [0, 192], sizes = [8, 64], strides = [1, 1]} : vector<8x256xf32> to vector<8x64xf32>
    %352 = arith.mulf %349, %336 : vector<8x64xf32>
    %353 = arith.mulf %348, %350 : vector<8x64xf32>
    %354 = arith.addf %352, %353 : vector<8x64xf32>
    %355 = math.tanh %354 : vector<8x64xf32>
    %356 = arith.mulf %351, %355 : vector<8x64xf32>
    %357 = arith.truncf %356 : vector<8x64xf32> to vector<8x64xbf16>
    %cst_74 = arith.constant dense<0.000000e+00> : vector<8x256xf32>
    %358 = tpu.matmul %357, %242, %cst_74 {dimension_numbers = #tpu.dot_dimension_numbers<[1], [0], [0], [1], [0, 0, 1, 1], [], []>} : vector<8x64xbf16>, vector<64x256xbf16>, vector<8x256xf32> -> vector<8x256xf32>
    %359 = arith.addf %267, %358 : vector<8x256xf32>
    %360 = arith.negf %359 : vector<8x256xf32>
    %361 = math.exp %360 : vector<8x256xf32>
    %cst_75 = arith.constant 1.000000e+00 : f32
    %362 = vector.broadcast %cst_75 : f32 to vector<8x256xf32>
    %363 = arith.addf %362, %361 : vector<8x256xf32>
    %364 = arith.divf %362, %363 : vector<8x256xf32>
    %365 = math.tanh %359 : vector<8x256xf32>
    %366 = vector.extract_strided_slice %364 {offsets = [0, 0], sizes = [8, 64], strides = [1, 1]} : vector<8x256xf32> to vector<8x64xf32>
    %367 = vector.extract_strided_slice %364 {offsets = [0, 64], sizes = [8, 64], strides = [1, 1]} : vector<8x256xf32> to vector<8x64xf32>
    %368 = vector.extract_strided_slice %365 {offsets = [0, 128], sizes = [8, 64], strides = [1, 1]} : vector<8x256xf32> to vector<8x64xf32>
    %369 = vector.extract_strided_slice %364 {offsets = [0, 192], sizes = [8, 64], strides = [1, 1]} : vector<8x256xf32> to vector<8x64xf32>
    %370 = arith.mulf %367, %354 : vector<8x64xf32>
    %371 = arith.mulf %366, %368 : vector<8x64xf32>
    %372 = arith.addf %370, %371 : vector<8x64xf32>
    %373 = math.tanh %372 : vector<8x64xf32>
    %374 = arith.mulf %369, %373 : vector<8x64xf32>
    %375 = arith.truncf %374 : vector<8x64xf32> to vector<8x64xbf16>
    %cst_76 = arith.constant dense<0.000000e+00> : vector<8x256xf32>
    %376 = tpu.matmul %375, %242, %cst_76 {dimension_numbers = #tpu.dot_dimension_numbers<[1], [0], [0], [1], [0, 0, 1, 1], [], []>} : vector<8x64xbf16>, vector<64x256xbf16>, vector<8x256xf32> -> vector<8x256xf32>
    %377 = arith.addf %272, %376 : vector<8x256xf32>
    %378 = arith.negf %377 : vector<8x256xf32>
    %379 = math.exp %378 : vector<8x256xf32>
    %cst_77 = arith.constant 1.000000e+00 : f32
    %380 = vector.broadcast %cst_77 : f32 to vector<8x256xf32>
    %381 = arith.addf %380, %379 : vector<8x256xf32>
    %382 = arith.divf %380, %381 : vector<8x256xf32>
    %383 = math.tanh %377 : vector<8x256xf32>
    %384 = vector.extract_strided_slice %382 {offsets = [0, 0], sizes = [8, 64], strides = [1, 1]} : vector<8x256xf32> to vector<8x64xf32>
    %385 = vector.extract_strided_slice %382 {offsets = [0, 64], sizes = [8, 64], strides = [1, 1]} : vector<8x256xf32> to vector<8x64xf32>
    %386 = vector.extract_strided_slice %383 {offsets = [0, 128], sizes = [8, 64], strides = [1, 1]} : vector<8x256xf32> to vector<8x64xf32>
    %387 = vector.extract_strided_slice %382 {offsets = [0, 192], sizes = [8, 64], strides = [1, 1]} : vector<8x256xf32> to vector<8x64xf32>
    %388 = arith.mulf %385, %372 : vector<8x64xf32>
    %389 = arith.mulf %384, %386 : vector<8x64xf32>
    %390 = arith.addf %388, %389 : vector<8x64xf32>
    %391 = math.tanh %390 : vector<8x64xf32>
    %392 = arith.mulf %387, %391 : vector<8x64xf32>
    %393 = arith.truncf %392 : vector<8x64xf32> to vector<8x64xbf16>
    %cst_78 = arith.constant dense<0.000000e+00> : vector<8x256xf32>
    %394 = tpu.matmul %393, %242, %cst_78 {dimension_numbers = #tpu.dot_dimension_numbers<[1], [0], [0], [1], [0, 0, 1, 1], [], []>} : vector<8x64xbf16>, vector<64x256xbf16>, vector<8x256xf32> -> vector<8x256xf32>
    %395 = arith.addf %277, %394 : vector<8x256xf32>
    %396 = arith.negf %395 : vector<8x256xf32>
    %397 = math.exp %396 : vector<8x256xf32>
    %cst_79 = arith.constant 1.000000e+00 : f32
    %398 = vector.broadcast %cst_79 : f32 to vector<8x256xf32>
    %399 = arith.addf %398, %397 : vector<8x256xf32>
    %400 = arith.divf %398, %399 : vector<8x256xf32>
    %401 = math.tanh %395 : vector<8x256xf32>
    %402 = vector.extract_strided_slice %400 {offsets = [0, 0], sizes = [8, 64], strides = [1, 1]} : vector<8x256xf32> to vector<8x64xf32>
    %403 = vector.extract_strided_slice %400 {offsets = [0, 64], sizes = [8, 64], strides = [1, 1]} : vector<8x256xf32> to vector<8x64xf32>
    %404 = vector.extract_strided_slice %401 {offsets = [0, 128], sizes = [8, 64], strides = [1, 1]} : vector<8x256xf32> to vector<8x64xf32>
    %405 = vector.extract_strided_slice %400 {offsets = [0, 192], sizes = [8, 64], strides = [1, 1]} : vector<8x256xf32> to vector<8x64xf32>
    %406 = arith.mulf %403, %390 : vector<8x64xf32>
    %407 = arith.mulf %402, %404 : vector<8x64xf32>
    %408 = arith.addf %406, %407 : vector<8x64xf32>
    %409 = math.tanh %408 : vector<8x64xf32>
    %410 = arith.mulf %405, %409 : vector<8x64xf32>
    %411 = arith.truncf %410 : vector<8x64xf32> to vector<8x64xbf16>
    %cst_80 = arith.constant dense<0.000000e+00> : vector<8x256xf32>
    %412 = tpu.matmul %411, %242, %cst_80 {dimension_numbers = #tpu.dot_dimension_numbers<[1], [0], [0], [1], [0, 0, 1, 1], [], []>} : vector<8x64xbf16>, vector<64x256xbf16>, vector<8x256xf32> -> vector<8x256xf32>
    %413 = arith.addf %282, %412 : vector<8x256xf32>
    %414 = arith.negf %413 : vector<8x256xf32>
    %415 = math.exp %414 : vector<8x256xf32>
    %cst_81 = arith.constant 1.000000e+00 : f32
    %416 = vector.broadcast %cst_81 : f32 to vector<8x256xf32>
    %417 = arith.addf %416, %415 : vector<8x256xf32>
    %418 = arith.divf %416, %417 : vector<8x256xf32>
    %419 = math.tanh %413 : vector<8x256xf32>
    %420 = vector.extract_strided_slice %418 {offsets = [0, 0], sizes = [8, 64], strides = [1, 1]} : vector<8x256xf32> to vector<8x64xf32>
    %421 = vector.extract_strided_slice %418 {offsets = [0, 64], sizes = [8, 64], strides = [1, 1]} : vector<8x256xf32> to vector<8x64xf32>
    %422 = vector.extract_strided_slice %419 {offsets = [0, 128], sizes = [8, 64], strides = [1, 1]} : vector<8x256xf32> to vector<8x64xf32>
    %423 = vector.extract_strided_slice %418 {offsets = [0, 192], sizes = [8, 64], strides = [1, 1]} : vector<8x256xf32> to vector<8x64xf32>
    %424 = arith.mulf %421, %408 : vector<8x64xf32>
    %425 = arith.mulf %420, %422 : vector<8x64xf32>
    %426 = arith.addf %424, %425 : vector<8x64xf32>
    %427 = math.tanh %426 : vector<8x64xf32>
    %428 = arith.mulf %423, %427 : vector<8x64xf32>
    %429 = arith.truncf %428 : vector<8x64xf32> to vector<8x64xbf16>
    %c0_82 = arith.constant 0 : index
    %c0_83 = arith.constant 0 : index
    %430 = vector.load %arg8[%c0_82, %c0_83] : memref<64x64xbf16, #tpu.memory_space<vmem>>, vector<64x64xbf16>
    %cst_84 = arith.constant dense<0.000000e+00> : vector<8x64xf32>
    %431 = tpu.matmul %429, %430, %cst_84 {dimension_numbers = #tpu.dot_dimension_numbers<[1], [0], [0], [1], [0, 0, 1, 1], [], []>} : vector<8x64xbf16>, vector<64x64xbf16>, vector<8x64xf32> -> vector<8x64xf32>
    %c0_85 = arith.constant 0 : index
    %c0_86 = arith.constant 0 : index
    %432 = vector.load %arg9[%c0_85, %c0_86] : memref<1x64xf32, #tpu.memory_space<vmem>>, vector<1x64xf32>
    %433 = vector.broadcast %432 : vector<1x64xf32> to vector<8x64xf32>
    %434 = arith.addf %431, %433 : vector<8x64xf32>
    %cst_87 = arith.constant 0.000000e+00 : f32
    %435 = vector.broadcast %cst_87 : f32 to vector<8x64xf32>
    %436 = arith.maximumf %434, %435 : vector<8x64xf32>
    %437 = arith.truncf %436 : vector<8x64xf32> to vector<8x64xbf16>
    %c0_88 = arith.constant 0 : index
    %c0_89 = arith.constant 0 : index
    %438 = vector.load %arg10[%c0_88, %c0_89] : memref<64x4xbf16, #tpu.memory_space<vmem>>, vector<64x4xbf16>
    %cst_90 = arith.constant dense<0.000000e+00> : vector<8x4xf32>
    %439 = tpu.matmul %437, %438, %cst_90 {dimension_numbers = #tpu.dot_dimension_numbers<[1], [0], [0], [1], [0, 0, 1, 1], [], []>} : vector<8x64xbf16>, vector<64x4xbf16>, vector<8x4xf32> -> vector<8x4xf32>
    %c0_91 = arith.constant 0 : index
    %c0_92 = arith.constant 0 : index
    %440 = vector.load %arg11[%c0_91, %c0_92] : memref<1x4xf32, #tpu.memory_space<vmem>>, vector<1x4xf32>
    %441 = vector.broadcast %440 : vector<1x4xf32> to vector<8x4xf32>
    %442 = arith.addf %439, %441 : vector<8x4xf32>
    %c0_93 = arith.constant 0 : index
    %c0_94 = arith.constant 0 : index
    %443 = vector.load %arg12[%c0_93, %c0_94] : memref<8x4xf32, #tpu.memory_space<vmem>>, vector<8x4xf32>
    tpu.vector_store %arg12[%c0_93, %c0_94], %442 {strides = array<i32>} : memref<8x4xf32, #tpu.memory_space<vmem>>, vector<8x4xf32>,
    return
  }
}

</mosaic_0001>

<bundles_post_ra>
// kernel: lstm_module_forward.1
= control target key start
LH: loop header
LB: loop body
LE: loop exit
PB: predicated region body
PF: predicated region fallthrough
CT: control target
= control target key end

     0   :  { %17 = vsyncpa [#allocation5], 0  ;;  %s3717_s0 = inlined_call_operand.vmem [shape: bf16[64,32], index: 0, kind: input, shape index: {}]   ;;  %s3718_s1 = inlined_call_operand.vmem [shape: bf16[32,256], index: 1, kind: input, shape index: {}]   ;;  %s3719_s2 = inlined_call_operand.vmem [shape: bf16[64,256], index: 2, kind: input, shape index: {}]   ;;  %s3720_s3 = inlined_call_operand.hbm [shape: f32[1,256], index: 3, kind: input, shape index: {}]   ;;  %s3721_s4 = inlined_call_operand.hbm [shape: bf16[32,256], index: 4, kind: input, shape index: {}]   ;;  %s3722_s5 = inlined_call_operand.hbm [shape: bf16[32,256], index: 5, kind: input, shape index: {}]   ;;  %s3723_s6 = inlined_call_operand.vmem [shape: bf16[64,256], index: 6, kind: input, shape index: {}]   ;;  %s3724_s7 = inlined_call_operand.hbm [shape: f32[1,256], index: 7, kind: input, shape index: {}]   ;;  %s3725_s8 = inlined_call_operand.hbm [shape: bf16[64,64], index: 8, kind: input, shape index: {}]   ;;  %s3726_s9 = inlined_call_operand.vmem [shape: f32[1,64], index: 9, kind: input, shape index: {}]   ;;  %s3727_s10 = inlined_call_operand.vmem [shape: bf16[64,4], index: 10, kind: input, shape index: {}]   ;;  %s3728_s11 = inlined_call_operand.vmem [shape: f32[1,4], index: 11, kind: input, shape index: {}]   ;;  %s3729_s12 = inlined_call_operand.vmem [shape: f32[8,4], index: 12, kind: output, shape index: {}]  }
   0x1   :  { %18 = vsyncpa [#allocation7], 0  ;;  %s41_s23 = sshll.u32 %s3721_s4, 4  ;;  %s42_s23 = int_to_ptr.hbm [resolvable:$true] %s41_s23 }
   0x2   :  { %19 = vsyncpa [#allocation10], 0  ;;  %s2744_s24 = smov [#allocation6]   ;;  %s70_s28 = sshll.u32 %s3724_s7, 4  ;;  %s71_s28 = int_to_ptr.hbm [resolvable:$true] %s70_s28 }
   0x3   :  { %s43_s25 = sshll.u32 %s2744_s24, 4  ;;  %s2745_s29 = smov 128   ;;  %s44_s25 = int_to_ptr.vmem [resolvable:$true] %s43_s25 }
   0x4   :  { %s2746_s30 = smov 8   ;;  %s2747_s13 = smov [#allocation9]  }
   0x5   :  { %49 = dma.hbm_to_vmem [thread:$0]  %s42_s23, 512, %s44_s25, [#allocation7], %s2745_s29, %s2745_s29, %s2746_s30  }
   0x6   :  { %s72_s14 = sshll.u32 %s2747_s13, 4  ;;  %s31_s17 = sshll.u32 %s3720_s3, 4  ;;  %s73_s14 = int_to_ptr.vmem [resolvable:$true] %s72_s14  ;;  %s32_s17 = int_to_ptr.hbm [resolvable:$true] %s31_s17 }
   0x7   :  { %75 = dma.hbm_to_vmem [thread:$0]  %s71_s28, 32, %s73_s14, [#allocation10]  }
   0x8   :  { %s54_s19 = sshll.u32 %s3722_s5, 4  ;;  %s2748_s20 = smov [#allocation4]   ;;  %s55_s19 = int_to_ptr.hbm [resolvable:$true] %s54_s19 }
   0x9   :  { %s33_s21 = sshll.u32 %s2748_s20, 4  ;;  %s2749_s7 = smov [#allocation8]   ;;  %s34_s21 = int_to_ptr.vmem [resolvable:$true] %s33_s21 }
   0xa   :  { %36 = dma.hbm_to_vmem [thread:$0]  %s32_s17, 32, %s34_s21, [#allocation5]  }
   0xb   :  { %s56_s22 = sshll.u32 %s2749_s7, 4  ;;  %s80_s25 = sshll.u32 %s3725_s8, 4  ;;  %s57_s22 = int_to_ptr.vmem [resolvable:$true] %s56_s22  ;;  %s81_s25 = int_to_ptr.hbm [resolvable:$true] %s80_s25 }
   0xc   :  { %62 = dma.hbm_to_vmem [thread:$0]  %s55_s19, 512, %s57_s22, [#allocation7], %s2745_s29, %s2745_s29, %s2746_s30  }
   0xd   :  { %s2750_s3 = smov [#allocation11]   ;;  %s2751_s27 = smov 64  }
   0xe   :  { %s82_s26 = sshll.u32 %s2750_s3, 4  ;;  %s2752_s28 = smov 4   ;;  %s83_s26 = int_to_ptr.vmem [resolvable:$true] %s82_s26 }
   0xf   :  { %88 = dma.hbm_to_vmem [thread:$0]  %s81_s25, 512, %s83_s26, [#allocation10], %s2751_s27, %s2751_s27, %s2752_s28  }
  0x10   :  { %2738 = dma.done.wait [#allocation5], 32  }
  0x11   :  { %2739 = vsyncadd [#allocation5], 4294967264 }
  0x12   :  { %2740 = dma.done.wait [#allocation7], 1024  }
  0x13   :  { %2741 = vsyncadd [#allocation7], 4294966272 }
  0x14   :  { %2742 = dma.done.wait [#allocation10], 544  }
  0x15   :  { %2743 = vsyncadd [#allocation10], 4294966752  ;;  %v2153_v0 = vld [vmem:[%s3718_s1 + $0x10] sm:$0xf]  ;;  %v2380_v1 = vld [vmem:[%s3718_s1 + $0x14] sm:$0xf0]  ;;  %v116_v52 = vlaneseq }
  0x16   :  { %v2379_v2 = vld [vmem:[%s3718_s1 + $0x14] sm:$0xf]  ;;  %v2154_v3 = vor.u32 %v2380_v1, %v2153_v0  ;;  %v2155_v4 = vld [vmem:[%s3718_s1 + $0x18] sm:$0xf0]  ;;  %v2145_v5 = vld [vmem:[%s3718_s1] sm:$0xf] }
  0x17   :  { %v2378_v6 = vld [vmem:[%s3718_s1 + $0x4] sm:$0xf0]  ;;  %v2158_v7 = vor.u32 %v2379_v2, %v2155_v4  ;;  %v2377_v8 = vld [vmem:[%s3718_s1 + $0x4] sm:$0xf]  ;;  %v2147_v9 = vld [vmem:[%s3718_s1 + $0x8] sm:$0xf0] }
  0x18   :  { %200 = vmatpush.bf16.msra.mxu0 %v2154_v3  ;;  %v2146_v10 = vor.u32 %v2378_v6, %v2145_v5  ;;  %v2193_v11 = vld [vmem:[%s3719_s2 + $0x30] sm:$0xf]  ;;  %v2388_v12 = vld [vmem:[%s3719_s2 + $0x34] sm:$0xf0]  ;;  %v2150_v13 = vor.u32 %v2377_v8, %v2147_v9  ;;  %v2373_v15 = vld [vmem:[%s3717_s0] sm:$0xff]  ;;  %vm181_vm0 = vcmask 261120  }
  0x19   :  { %229 = vmatpush.bf16.msra.mxu1 %v2158_v7  ;;  %v2867_v14 = vor.u32 %v2388_v12, %v2193_v11  ;;  %v2185_v16 = vld [vmem:[%s3719_s2 + $0x20] sm:$0xf]  ;;  %v2386_v17 = vld [vmem:[%s3719_s2 + $0x24] sm:$0xf0]  ;;  %v2177_v19 = vld [vmem:[%s3719_s2 + $0x10] sm:$0xf] }
  0x1a   :  { %v2882_v18 = vor.u32 %v2386_v17, %v2185_v16  ;;  %v2384_v20 = vld [vmem:[%s3719_s2 + $0x14] sm:$0xf0]  ;;  %v2387_v21 = vld [vmem:[%s3719_s2 + $0x34] sm:$0xf]  ;;  %v2195_v22 = vld [vmem:[%s3719_s2 + $0x38] sm:$0xf0] }
  0x1b   :  { %328 = vmatpush.bf16.msra.mxu2 %v2867_v14  ;;  %v2897_v23 = vor.u32 %v2384_v20, %v2177_v19  ;;  %v2899_v24 = vor.u32 %v2387_v21, %v2195_v22  ;;  %v2385_v25 = vld [vmem:[%s3719_s2 + $0x24] sm:$0xf]  ;;  %v2187_v26 = vld [vmem:[%s3719_s2 + $0x28] sm:$0xf0]  ;;  %v2169_v27 = vld [vmem:[%s3719_s2] sm:$0xf] }
  0x1c   :  { %201 = vmatpush.bf16.msra.mxu0 %v2146_v10  ;;  %v2382_v28 = vld [vmem:[%s3719_s2 + $0x4] sm:$0xf0]  ;;  %v2915_v29 = vor.u32 %v2385_v25, %v2187_v26  ;;  %v2383_v30 = vld [vmem:[%s3719_s2 + $0x14] sm:$0xf]  ;;  %v2179_v31 = vld [vmem:[%s3719_s2 + $0x18] sm:$0xf0] }
  0x1d   :  { %230 = vmatpush.bf16.msra.mxu1 %v2150_v13  ;;  %341 = vmatpush.bf16.msra.mxu3 %v2899_v24  ;;  %v2925_v32 = vor.u32 %v2382_v28, %v2169_v27  ;;  %v2929_v33 = vor.u32 %v2383_v30, %v2179_v31  ;;  %v2374_v34 = vld [vmem:[%s3717_s0 + $0x8] sm:$0xff]  ;;  %v2753_v35 = vmov 0   ;;  %v2381_v36 = vld [vmem:[%s3719_s2 + $0x4] sm:$0xf]  ;;  %v2375_v39 = vld [vmem:[%s3717_s0 + $0x10] sm:$0xff]  ;;  %v117_v54 = vand.u32 127, %v116_v52 }
  0x1e   :  { %v2171_v37 = vld [vmem:[%s3719_s2 + $0x8] sm:$0xf0]  ;;  %v2376_v40 = vld [vmem:[%s3717_s0 + $0x18] sm:$0xff]  ;;  %v135_v45 = vld [vmem:[#allocation4] sm:$0x3]  ;;  %vm320_vm11 = vcmask 523264  }
  0x1f   :  { %2159 = vmatmul.msk.bf16.vlgmr.msra.gmra.mxu0 %vm181_vm0, %v2373_v15  ;;  %329 = vmatpush.bf16.msra.mxu2 %v2882_v18  ;;  %v2951_v38 = vor.u32 %v2381_v36, %v2171_v37  ;;  %v137_v46 = vperm.slane %v135_v45, 0  ;;  %v138_v47 = vperm.slane %v135_v45, 1  ;;  %v118_v57 = vadd.s32 128, %v117_v54  ;;  %s2754_s0 = smov 32  }
  0x20   :  { %696 = vmatpush.bf16.msrb.mxu0 %v2867_v14  ;;  %2163 = vmatmul.msk.bf16.vlgmr.msra.gmra.mxu1 %vm181_vm0, %v2373_v15  ;;  %v119_v58 = vand.u32 32, %v117_v54 }
  0x21   :  { %709 = vmatpush.bf16.msrb.mxu1 %v2899_v24  ;;  %342 = vmatpush.bf16.msra.mxu3 %v2915_v29  ;;  %v120_v61 = vand.u32 32, %v118_v57 }
  0x22   :  { %vm2993_vm1 = vcmp.eq.s32.totalorder %v119_v58, 0 }
  0x23   :  { %330 = vmatpush.bf16.msra.mxu2 %v2897_v23  ;;  %vm3001_vm2 = vcmp.eq.s32.totalorder %v120_v61, 0 }
  0x24   :  { %697 = vmatpush.bf16.msrb.mxu0 %v2882_v18 }
  0x25   :  { %710 = vmatpush.bf16.msrb.mxu1 %v2915_v29  ;;  %343 = vmatpush.bf16.msra.mxu3 %v2929_v33 }
  0x27   :  { %331 = vmatpush.bf16.msra.mxu2 %v2925_v32 }
  0x28   :  { %698 = vmatpush.bf16.msrb.mxu0 %v2897_v23 }
  0x29   :  { %711 = vmatpush.bf16.msrb.mxu1 %v2929_v33  ;;  %344 = vmatpush.bf16.msra.mxu3 %v2951_v38 }
  0x2a   :  { %332 = vmatmul.bf16.vlgmr.msra.gmra.mxu2 %v2753_v35 }
  0x2b   :  { %420 = vmatpush.bf16.msrb.mxu2 %v2867_v14 }
  0x2c   :  { %699 = vmatpush.bf16.msrb.mxu0 %v2925_v32  ;;  %345 = vmatmul.bf16.vlgmr.msra.gmra.mxu3 %v2753_v35 }
  0x2d   :  { %712 = vmatpush.bf16.msrb.mxu1 %v2951_v38  ;;  %433 = vmatpush.bf16.msrb.mxu3 %v2899_v24 }
  0x2f   :  { %2160 = vmatmul.msk.bf16.gmra.mxu0 %vm181_vm0, %v2374_v34  ;;  %421 = vmatpush.bf16.msrb.mxu2 %v2882_v18 }
  0x30   :  { %880 = vmatpush.bf16.msra.mxu0 %v2867_v14  ;;  %2164 = vmatmul.msk.bf16.gmra.mxu1 %vm181_vm0, %v2374_v34 }
  0x31   :  { %893 = vmatpush.bf16.msra.mxu1 %v2899_v24  ;;  %434 = vmatpush.bf16.msrb.mxu3 %v2915_v29 }
  0x33   :  { %422 = vmatpush.bf16.msrb.mxu2 %v2897_v23 }
  0x34   :  { %881 = vmatpush.bf16.msra.mxu0 %v2882_v18 }
  0x35   :  { %894 = vmatpush.bf16.msra.mxu1 %v2915_v29  ;;  %435 = vmatpush.bf16.msrb.mxu3 %v2929_v33 }
  0x37   :  { %423 = vmatpush.bf16.msrb.mxu2 %v2925_v32 }
  0x38   :  { %882 = vmatpush.bf16.msra.mxu0 %v2897_v23 }
  0x39   :  { %895 = vmatpush.bf16.msra.mxu1 %v2929_v33  ;;  %436 = vmatpush.bf16.msrb.mxu3 %v2951_v38 }
  0x3b   :  { %512 = vmatpush.bf16.msra.mxu2 %v2867_v14 }
  0x3c   :  { %883 = vmatpush.bf16.msra.mxu0 %v2925_v32 }
  0x3d   :  { %525 = vmatpush.bf16.msra.mxu3 %v2899_v24  ;;  %896 = vmatpush.bf16.msra.mxu1 %v2951_v38 }
  0x3f   :  { %513 = vmatpush.bf16.msra.mxu2 %v2882_v18  ;;  %2161 = vmatmul.msk.bf16.gmra.mxu0 %vm181_vm0, %v2375_v39 }
  0x40   :  { %2165 = vmatmul.msk.bf16.gmra.mxu1 %vm181_vm0, %v2375_v39 }
  0x41   :  { %526 = vmatpush.bf16.msra.mxu3 %v2915_v29 }
  0x43   :  { %514 = vmatpush.bf16.msra.mxu2 %v2897_v23 }
  0x45   :  { %527 = vmatpush.bf16.msra.mxu3 %v2929_v33 }
  0x47   :  { %515 = vmatpush.bf16.msra.mxu2 %v2925_v32 }
  0x49   :  { %528 = vmatpush.bf16.msra.mxu3 %v2951_v38 }
  0x4f   :  { %2162 = vmatmul.msk.bf16.gmra.mxu0 %vm181_vm0, %v2376_v40 }
  0x50   :  { %2166 = vmatmul.msk.bf16.gmra.mxu1 %vm181_vm0, %v2376_v40 }
  0x9c   :  { %v203_v41 = vpop.f32.mrf.mxu0 }
  0x9d   :  { %v232_v42 = vpop.f32.mrf.mxu1  ;;  %v3067_v39 = vadd.f32 %v203_v41, %v137_v46 }
  0xa4   :  { %v205_v43 = vpop.f32.mrf.mxu0 }
  0xa5   :  { %v234_v44 = vpop.f32.mrf.mxu1  ;;  %v3043_v22 = vadd.f32 %v205_v43, %v137_v46 }
  0xa6   :  { %v3047_v27 = vadd.f32 %v234_v44, %v138_v47  ;;  %v3071_v44 = vadd.f32 %v232_v42, %v138_v47 }
  0xac   :  { %v208_v48 = vpop.f32.mrf.mxu0 }
  0xad   :  { %v2987_v49 = vadd.f32 %v208_v48, %v137_v46  ;;  %v237_v50 = vpop.f32.mrf.mxu1  ;;  %v333_v53 = vpop.f32.mrf.mxu2 }
  0xae   :  { %v2989_v51 = vadd.f32 %v237_v50, %v138_v47 }
  0xaf   :  { %v346_v60 = vpop.f32.mrf.mxu3 }
  0xb4   :  { %v210_v55 = vpop.f32.mrf.mxu0 }
  0xb5   :  { %v239_v56 = vpop.f32.mrf.mxu1  ;;  %v335_v59 = vpop.f32.mrf.mxu2  ;;  %v2997_v1 = vadd.f32 %v210_v55, %v137_v46 }
  0xb6   :  { %v2991_v62 = vadd.f32 %v239_v56, %v138_v47 }
  0xb7   :  { %v348_v8 = vpop.f32.mrf.mxu3 }
  0xbc   :  { %v213_v63 = vpop.f32.mrf.mxu0 }
  0xbd   :  { %v2999_v2 = vadd.f32 %v213_v63, %v137_v46  ;;  %v242_v3 = vpop.f32.mrf.mxu1 }
  0xbe   :  { %v3005_v5 = vadd.f32 %v242_v3, %v138_v47 }
  0xbf   :  { %v270_v6 = vsel %vm2993_vm1, %v2997_v1, %v2999_v2  ;;  %v272_v7 = vsel %vm2993_vm1, %v2999_v2, %v2997_v1 }
  0xc0   :  { %v271_v9 = vsel %vm3001_vm2, %v2991_v62, %v3005_v5  ;;  %v273_v10 = vsel %vm3001_vm2, %v3005_v5, %v2991_v62 }
  0xc4   :  { %v215_v11 = vpop.f32.mrf.mxu0 }
  0xc5   :  { %v3023_v12 = vadd.f32 %v215_v11, %v137_v46  ;;  %v244_v13 = vpop.f32.mrf.mxu1 }
  0xc6   :  { %v3025_v15 = vadd.f32 %v244_v13, %v138_v47 }
  0xc7   :  { %v268_v16 = vsel %vm2993_vm1, %v2987_v49, %v3023_v12  ;;  %v274_v17 = vsel %vm2993_vm1, %v3023_v12, %v2987_v49 }
  0xc8   :  { %v269_v19 = vsel %vm3001_vm2, %v2989_v51, %v3025_v15  ;;  %v275_v20 = vsel %vm3001_vm2, %v3025_v15, %v2989_v51 }
  0xcc   :  { %v218_v21 = vpop.f32.mrf.mxu0 }
  0xcd   :  { %v3045_v25 = vadd.f32 %v218_v21, %v137_v46  ;;  %v247_v26 = vpop.f32.mrf.mxu1 }
  0xce   :  { %v3049_v28 = vadd.f32 %v247_v26, %v138_v47 }
  0xcf   :  { %v266_v30 = vsel %vm2993_vm1, %v3043_v22, %v3045_v25  ;;  %v276_v31 = vsel %vm2993_vm1, %v3045_v25, %v3043_v22 }
  0xd0   :  { %v267_v34 = vsel %vm3001_vm2, %v3047_v27, %v3049_v28  ;;  %v277_v36 = vsel %vm3001_vm2, %v3049_v28, %v3047_v27 }
  0xd4   :  { %v220_v37 = vpop.f32.mrf.mxu0 }
  0xd5   :  { %v3069_v40 = vadd.f32 %v220_v37, %v137_v46  ;;  %v249_v43 = vpop.f32.mrf.mxu1 }
  0xd6   :  { %v3073_v45 = vadd.f32 %v249_v43, %v138_v47 }
  0xd7   :  { %v264_v48 = vsel %vm2993_vm1, %v3067_v39, %v3069_v40  ;;  %v278_v50 = vsel %vm2993_vm1, %v3069_v40, %v3067_v39 }
  0xd8   :  { %v350_v52 = vadd.f32 %v333_v53, %v264_v48  ;;  %v279_v41 = vsel %vm3001_vm2, %v3073_v45, %v3071_v44  ;;  %v265_v54 = vsel %vm3001_vm2, %v3071_v44, %v3073_v45 }
  0xd9   :  { %v351_v56 = vadd.f32 %v346_v60, %v265_v54 }
  0xda   :  { %v2199_v42 = vmul.f32 -1.442695, %v350_v52 }
  0xdb   :  { %v2200_v26 = vmul.f32 -1.442695, %v351_v56 }
  0xdc   :  { %2426 = vpow2.f32 %v2199_v42 }
  0xe2   :  { %v2427_v46 = vpop.eup %2426 }
  0xe3   :  { %v358_v47 = vadd.f32 1.0, %v2427_v46 }
  0xe5   :  { %2428 = vrcp.f32 %v358_v47  ;;  %v371_v53 = vand.u32 2147483648, %v358_v47  ;;  %v369_v61 = vand.u32 2147483647, %v358_v47  ;;  %vm365_vm4 = vweird.f32 %v358_v47 }
  0xe6   :  { %2430 = vtanh.f32 %v351_v56 }
  0xe7   :  { %v372_v3 = vor.u32 1.1754944e-38, %v371_v53  ;;  %vm370_vm6 = vcmp.eq.f32.partialorder %v369_v61, 8.507059e+37  ;;  %2432 = vpow2.f32 %v2200_v26 }
  0xeb   :  { %v2429_v55 = vpop.eup %2428 }
  0xec   :  { %v361_v57 = vmul.f32 %v2429_v55, %v358_v47  ;;  %vm366_vm3 = vweird.f32 %v2429_v55  ;;  %v2431_v11 = vpop.eup %2430 }
  0xed   :  { %vm367_vm5 = vmor %vm365_vm4, %vm366_vm3  ;;  %v2433_v60 = vpop.eup %2432 }
  0xee   :  { %v362_v58 = vsub.f32 1.0, %v361_v57  ;;  %v359_v37 = vadd.f32 1.0, %v2433_v60 }
  0xf0   :  { %v363_v59 = vmul.f32 %v2429_v55, %v362_v58  ;;  %2434 = vrcp.f32 %v359_v37  ;;  %v386_v57 = vand.u32 2147483648, %v359_v37  ;;  %vm380_vm8 = vweird.f32 %v359_v37 }
  0xf1   :  { %v384_v58 = vand.u32 2147483647, %v359_v37 }
  0xf2   :  { %v364_v63 = vadd.f32 %v2429_v55, %v363_v59  ;;  %v387_v53 = vor.u32 1.1754944e-38, %v386_v57 }
  0xf3   :  { %vm385_vm10 = vcmp.eq.f32.partialorder %v384_v58, 8.507059e+37 }
  0xf4   :  { %v368_v8 = vsel %vm367_vm5, %v2429_v55, %v364_v63 }
  0xf5   :  { %v373_v13 = vsel %vm370_vm6, %v372_v3, %v368_v8 }
  0xf6   :  { %v392_v21 = vmul.f32 %v2431_v11, %v373_v13  ;;  %v2435_v43 = vpop.eup %2434  ;;  %v391_v46 = vmul.f32 0.0, %v373_v13 }
  0xf7   :  { %v376_v48 = vmul.f32 %v2435_v43, %v359_v37  ;;  %vm381_vm7 = vweird.f32 %v2435_v43 }
  0xf8   :  { %394 = vrot.lane.b32.xlu0 %v392_v21, %s2751_s27  ;;  %vm382_vm9 = vmor %vm380_vm8, %vm381_vm7 }
  0xf9   :  { %v377_v52 = vsub.f32 1.0, %v376_v48 }
  0xfb   :  { %v378_v42 = vmul.f32 %v2435_v43, %v377_v52 }
  0xfd   :  { %v379_v55 = vadd.f32 %v2435_v43, %v378_v42 }
  0xff   :  { %v383_v56 = vsel %vm382_vm9, %v2435_v43, %v379_v55 }
 0x100   :  { %v388_v61 = vsel %vm385_vm10, %v387_v53, %v383_v56 }
 0x16a   :  { %v395_v47 = vpop.permute.xlu0 %394 }
 0x16b   :  { %v3092_v54 = vadd.f32 %v395_v47, %v391_v46 }
 0x16d   :  { %2436 = vtanh.f32 %v3092_v54 }
 0x173   :  { %v2437_v59 = vpop.eup %2436 }
 0x174   :  { %v3095_v63 = vmul.f32 %v2437_v59, %v388_v61 }
 0x176   :  { %v400_v3 = vpack.c.bf16 %v3095_v63, %v3095_v63 }
 0x178   :  { %411 = vrot.lane.b32.xlu0 %v400_v3, %s2751_s27 }
 0x1ea   :  { %v412_v8 = vpop.permute.xlu0 %411 }
 0x1eb   :  { %2201 = vmatmul.msk.bf16.vlgmr.msrb.gmra.mxu2 %vm320_vm11, %v412_v8  ;;  %2202 = vmatmul.msk.bf16.vlgmr.msrb.gmra.mxu3 %vm320_vm11, %v412_v8 }
 0x1ec   :  { %604 = vmatpush.bf16.msrb.mxu2 %v2867_v14  ;;  %617 = vmatpush.bf16.msrb.mxu3 %v2899_v24 }
 0x1f0   :  { %605 = vmatpush.bf16.msrb.mxu2 %v2882_v18  ;;  %618 = vmatpush.bf16.msrb.mxu3 %v2915_v29 }
 0x1f4   :  { %606 = vmatpush.bf16.msrb.mxu2 %v2897_v23  ;;  %619 = vmatpush.bf16.msrb.mxu3 %v2929_v33 }
 0x1f8   :  { %607 = vmatpush.bf16.msrb.mxu2 %v2925_v32  ;;  %620 = vmatpush.bf16.msrb.mxu3 %v2951_v38 }
 0x26e   :  { %v425_v11 = vpop.f32.mrf.mxu2  ;;  %v438_v13 = vpop.f32.mrf.mxu3 }
 0x26f   :  { %v442_v21 = vadd.f32 %v425_v11, %v266_v30  ;;  %v443_v42 = vadd.f32 %v438_v13, %v267_v34 }
 0x271   :  { %v2203_v26 = vmul.f32 -1.442695, %v442_v21  ;;  %v2204_v8 = vmul.f32 -1.442695, %v443_v42 }
 0x273   :  { %2438 = vpow2.f32 %v2203_v26 }
 0x276   :  { %v427_v60 = vpop.f32.mrf.mxu2  ;;  %v440_v37 = vpop.f32.mrf.mxu3 }
 0x279   :  { %v2439_v43 = vpop.eup %2438 }
 0x27a   :  { %v450_v48 = vadd.f32 1.0, %v2439_v43 }
 0x27c   :  { %2440 = vrcp.f32 %v450_v48  ;;  %v463_v55 = vand.u32 2147483648, %v450_v48  ;;  %v461_v30 = vand.u32 2147483647, %v450_v48  ;;  %vm457_vm13 = vweird.f32 %v450_v48 }
 0x27d   :  { %2442 = vtanh.f32 %v443_v42 }
 0x27e   :  { %v464_v56 = vor.u32 1.1754944e-38, %v463_v55  ;;  %vm462_vm15 = vcmp.eq.f32.partialorder %v461_v30, 8.507059e+37  ;;  %2444 = vpow2.f32 %v2204_v8 }
 0x282   :  { %v2441_v52 = vpop.eup %2440 }
 0x283   :  { %v453_v46 = vmul.f32 %v2441_v52, %v450_v48  ;;  %vm458_vm12 = vweird.f32 %v2441_v52  ;;  %v2443_v59 = vpop.eup %2442 }
 0x284   :  { %vm459_vm14 = vmor %vm457_vm13, %vm458_vm12  ;;  %v2445_v34 = vpop.eup %2444 }
 0x285   :  { %v454_v47 = vsub.f32 1.0, %v453_v46  ;;  %v451_v11 = vadd.f32 1.0, %v2445_v34 }
 0x287   :  { %v455_v57 = vmul.f32 %v2441_v52, %v454_v47  ;;  %2446 = vrcp.f32 %v451_v11  ;;  %v478_v46 = vand.u32 2147483648, %v451_v11  ;;  %vm472_vm4 = vweird.f32 %v451_v11 }
 0x288   :  { %v476_v42 = vand.u32 2147483647, %v451_v11 }
 0x289   :  { %v456_v58 = vadd.f32 %v2441_v52, %v455_v57  ;;  %v479_v55 = vor.u32 1.1754944e-38, %v478_v46 }
 0x28a   :  { %vm477_vm6 = vcmp.eq.f32.partialorder %v476_v42, 8.507059e+37 }
 0x28b   :  { %v460_v53 = vsel %vm459_vm14, %v2441_v52, %v456_v58 }
 0x28c   :  { %v465_v61 = vsel %vm462_vm15, %v464_v56, %v460_v53 }
 0x28d   :  { %v484_v3 = vmul.f32 %v2443_v59, %v465_v61  ;;  %v2447_v13 = vpop.eup %2446  ;;  %v483_v37 = vmul.f32 %v465_v61, %v3092_v54 }
 0x28e   :  { %v468_v21 = vmul.f32 %v2447_v13, %v451_v11  ;;  %vm473_vm3 = vweird.f32 %v2447_v13 }
 0x28f   :  { %486 = vrot.lane.b32.xlu1 %v484_v3, %s2751_s27  ;;  %vm474_vm5 = vmor %vm472_vm4, %vm473_vm3 }
 0x290   :  { %v469_v26 = vsub.f32 1.0, %v468_v21 }
 0x292   :  { %v470_v60 = vmul.f32 %v2447_v13, %v469_v26 }
 0x294   :  { %v471_v52 = vadd.f32 %v2447_v13, %v470_v60 }
 0x296   :  { %v475_v47 = vsel %vm474_vm5, %v2447_v13, %v471_v52 }
 0x297   :  { %v480_v30 = vsel %vm477_vm6, %v479_v55, %v475_v47 }
 0x301   :  { %v487_v43 = vpop.permute.xlu1 %486 }
 0x302   :  { %v3122_v48 = vadd.f32 %v487_v43, %v483_v37 }
 0x304   :  { %2448 = vtanh.f32 %v3122_v48 }
 0x30a   :  { %v2449_v57 = vpop.eup %2448 }
 0x30b   :  { %v3125_v58 = vmul.f32 %v2449_v57, %v480_v30 }
 0x30d   :  { %v492_v54 = vpack.c.bf16 %v3125_v58, %v3125_v58 }
 0x30f   :  { %503 = vrot.lane.b32.xlu1 %v492_v54, %s2751_s27 }
 0x381   :  { %v504_v56 = vpop.permute.xlu1 %503 }
 0x382   :  { %2205 = vmatmul.msk.bf16.vlgmr.msra.gmra.mxu2 %vm320_vm11, %v504_v56  ;;  %2206 = vmatmul.msk.bf16.vlgmr.msra.gmra.mxu3 %vm320_vm11, %v504_v56 }
 0x383   :  { %788 = vmatpush.bf16.msra.mxu2 %v2867_v14  ;;  %801 = vmatpush.bf16.msra.mxu3 %v2899_v24 }
 0x387   :  { %789 = vmatpush.bf16.msra.mxu2 %v2882_v18  ;;  %802 = vmatpush.bf16.msra.mxu3 %v2915_v29 }
 0x38b   :  { %790 = vmatpush.bf16.msra.mxu2 %v2897_v23  ;;  %803 = vmatpush.bf16.msra.mxu3 %v2929_v33 }
 0x38f   :  { %791 = vmatpush.bf16.msra.mxu2 %v2925_v32  ;;  %804 = vmatpush.bf16.msra.mxu3 %v2951_v38 }
 0x405   :  { %v517_v53 = vpop.f32.mrf.mxu2  ;;  %v530_v59 = vpop.f32.mrf.mxu3 }
 0x406   :  { %v534_v61 = vadd.f32 %v517_v53, %v268_v16  ;;  %v535_v26 = vadd.f32 %v530_v59, %v269_v19 }
 0x408   :  { %v2207_v3 = vmul.f32 -1.442695, %v534_v61  ;;  %v2208_v54 = vmul.f32 -1.442695, %v535_v26 }
 0x40a   :  { %2450 = vpow2.f32 %v2207_v3 }
 0x40d   :  { %v519_v8 = vpop.f32.mrf.mxu2  ;;  %v532_v34 = vpop.f32.mrf.mxu3 }
 0x410   :  { %v2451_v11 = vpop.eup %2450 }
 0x411   :  { %v542_v13 = vadd.f32 1.0, %v2451_v11 }
 0x413   :  { %2452 = vrcp.f32 %v542_v13  ;;  %v555_v43 = vand.u32 2147483648, %v542_v13  ;;  %v553_v16 = vand.u32 2147483647, %v542_v13  ;;  %vm549_vm8 = vweird.f32 %v542_v13 }
 0x414   :  { %2454 = vtanh.f32 %v535_v26 }
 0x415   :  { %v556_v42 = vor.u32 1.1754944e-38, %v555_v43  ;;  %vm554_vm10 = vcmp.eq.f32.partialorder %v553_v16, 8.507059e+37  ;;  %2456 = vpow2.f32 %v2208_v54 }
 0x419   :  { %v2453_v21 = vpop.eup %2452 }
 0x41a   :  { %v545_v60 = vmul.f32 %v2453_v21, %v542_v13  ;;  %vm550_vm7 = vweird.f32 %v2453_v21  ;;  %v2455_v55 = vpop.eup %2454 }
 0x41b   :  { %vm551_vm9 = vmor %vm549_vm8, %vm550_vm7  ;;  %v2457_v19 = vpop.eup %2456 }
 0x41c   :  { %v546_v37 = vsub.f32 1.0, %v545_v60  ;;  %v543_v56 = vadd.f32 1.0, %v2457_v19 }
 0x41e   :  { %v547_v52 = vmul.f32 %v2453_v21, %v546_v37  ;;  %2458 = vrcp.f32 %v543_v56  ;;  %vm564_vm13 = vweird.f32 %v543_v56  ;;  %v568_v26 = vand.u32 2147483647, %v543_v56 }
 0x420   :  { %v548_v46 = vadd.f32 %v2453_v21, %v547_v52  ;;  %vm569_vm15 = vcmp.eq.f32.partialorder %v568_v26, 8.507059e+37 }
 0x422   :  { %v552_v47 = vsel %vm551_vm9, %v2453_v21, %v548_v46  ;;  %v570_v21 = vand.u32 2147483648, %v543_v56 }
 0x423   :  { %v557_v57 = vsel %vm554_vm10, %v556_v42, %v552_v47 }
 0x424   :  { %v576_v30 = vmul.f32 %v2455_v55, %v557_v57  ;;  %v2459_v53 = vpop.eup %2458  ;;  %v575_v8 = vmul.f32 %v557_v57, %v3122_v48  ;;  %v571_v37 = vor.u32 1.1754944e-38, %v570_v21 }
 0x425   :  { %v560_v59 = vmul.f32 %v2459_v53, %v543_v56  ;;  %vm565_vm12 = vweird.f32 %v2459_v53 }
 0x426   :  { %578 = vrot.lane.b32.xlu2 %v576_v30, %s2751_s27  ;;  %vm566_vm14 = vmor %vm564_vm13, %vm565_vm12 }
 0x427   :  { %v561_v61 = vsub.f32 1.0, %v560_v59 }
 0x429   :  { %v562_v3 = vmul.f32 %v2459_v53, %v561_v61 }
 0x42b   :  { %v563_v13 = vadd.f32 %v2459_v53, %v562_v3 }
 0x42d   :  { %v567_v60 = vsel %vm566_vm14, %v2459_v53, %v563_v13 }
 0x42e   :  { %v572_v52 = vsel %vm569_vm15, %v571_v37, %v567_v60 }
 0x480   :  { %v579_v34 = vpop.permute.xlu2 %578 }
 0x481   :  { %v3152_v11 = vadd.f32 %v579_v34, %v575_v8 }
 0x483   :  { %2460 = vtanh.f32 %v3152_v11 }
 0x489   :  { %v2461_v43 = vpop.eup %2460 }
 0x48a   :  { %v3155_v16 = vmul.f32 %v2461_v43, %v572_v52 }
 0x48c   :  { %v584_v48 = vpack.c.bf16 %v3155_v16, %v3155_v16 }
 0x48e   :  { %595 = vrot.lane.b32.xlu2 %v584_v48, %s2751_s27 }
 0x4e8   :  { %v596_v46 = vpop.permute.xlu2 %595 }
 0x4e9   :  { %2209 = vmatmul.msk.bf16.vlgmr.msrb.gmra.mxu2 %vm320_vm11, %v596_v46  ;;  %2210 = vmatmul.msk.bf16.vlgmr.msrb.gmra.mxu3 %vm320_vm11, %v596_v46 }
 0x4ea   :  { %972 = vmatpush.bf16.msrb.mxu2 %v2867_v14  ;;  %985 = vmatpush.bf16.msrb.mxu3 %v2899_v24 }
 0x4ee   :  { %973 = vmatpush.bf16.msrb.mxu2 %v2882_v18  ;;  %986 = vmatpush.bf16.msrb.mxu3 %v2915_v29 }
 0x4f2   :  { %974 = vmatpush.bf16.msrb.mxu2 %v2897_v23  ;;  %987 = vmatpush.bf16.msrb.mxu3 %v2929_v33 }
 0x4f6   :  { %975 = vmatpush.bf16.msrb.mxu2 %v2925_v32  ;;  %988 = vmatpush.bf16.msrb.mxu3 %v2951_v38 }
 0x56c   :  { %v609_v42 = vpop.f32.mrf.mxu2  ;;  %v622_v47 = vpop.f32.mrf.mxu3 }
 0x56d   :  { %v626_v14 = vadd.f32 %v609_v42, %v270_v6  ;;  %v627_v32 = vadd.f32 %v622_v47, %v271_v9 }
 0x56f   :  { %v2211_v24 = vmul.f32 -1.442695, %v626_v14  ;;  %v2212_v8 = vmul.f32 -1.442695, %v627_v32 }
 0x571   :  { %2462 = vpow2.f32 %v2211_v24 }
 0x574   :  { %v611_v18 = vpop.f32.mrf.mxu2  ;;  %v624_v29 = vpop.f32.mrf.mxu3 }
 0x577   :  { %v2463_v55 = vpop.eup %2462 }
 0x578   :  { %v634_v23 = vadd.f32 1.0, %v2463_v55 }
 0x57a   :  { %2464 = vrcp.f32 %v634_v23  ;;  %v647_v30 = vand.u32 2147483648, %v634_v23  ;;  %v645_v6 = vand.u32 2147483647, %v634_v23  ;;  %vm641_vm4 = vweird.f32 %v634_v23 }
 0x57b   :  { %2466 = vtanh.f32 %v627_v32 }
 0x57c   :  { %v648_v56 = vor.u32 1.1754944e-38, %v647_v30  ;;  %vm646_vm6 = vcmp.eq.f32.partialorder %v645_v6, 8.507059e+37  ;;  %2468 = vpow2.f32 %v2212_v8 }
 0x580   :  { %v2465_v33 = vpop.eup %2464 }
 0x581   :  { %v637_v38 = vmul.f32 %v2465_v33, %v634_v23  ;;  %vm642_vm3 = vweird.f32 %v2465_v33  ;;  %v2467_v59 = vpop.eup %2466 }
 0x582   :  { %vm643_vm5 = vmor %vm641_vm4, %vm642_vm3  ;;  %v2469_v9 = vpop.eup %2468 }
 0x583   :  { %v638_v57 = vsub.f32 1.0, %v637_v38  ;;  %v635_v34 = vadd.f32 1.0, %v2469_v9 }
 0x585   :  { %v639_v54 = vmul.f32 %v2465_v33, %v638_v57  ;;  %2470 = vrcp.f32 %v635_v34  ;;  %v662_v46 = vand.u32 2147483648, %v635_v34  ;;  %vm656_vm8 = vweird.f32 %v635_v34 }
 0x586   :  { %v660_v42 = vand.u32 2147483647, %v635_v34 }
 0x587   :  { %v640_v19 = vadd.f32 %v2465_v33, %v639_v54  ;;  %v663_v14 = vor.u32 1.1754944e-38, %v662_v46 }
 0x588   :  { %vm661_vm10 = vcmp.eq.f32.partialorder %v660_v42, 8.507059e+37 }
 0x589   :  { %v644_v53 = vsel %vm643_vm5, %v2465_v33, %v640_v19 }
 0x58a   :  { %v649_v61 = vsel %vm646_vm6, %v648_v56, %v644_v53 }
 0x58b   :  { %v668_v3 = vmul.f32 %v2467_v59, %v649_v61  ;;  %v2471_v13 = vpop.eup %2470  ;;  %v667_v37 = vmul.f32 %v649_v61, %v3152_v11 }
 0x58c   :  { %v652_v21 = vmul.f32 %v2471_v13, %v635_v34  ;;  %vm657_vm7 = vweird.f32 %v2471_v13 }
 0x58d   :  { %670 = vrot.lane.b32.xlu0 %v668_v3, %s2751_s27  ;;  %vm658_vm9 = vmor %vm656_vm8, %vm657_vm7 }
 0x58e   :  { %v653_v26 = vsub.f32 1.0, %v652_v21 }
 0x590   :  { %v654_v60 = vmul.f32 %v2471_v13, %v653_v26 }
 0x592   :  { %v655_v48 = vadd.f32 %v2471_v13, %v654_v60 }
 0x594   :  { %v659_v47 = vsel %vm658_vm9, %v2471_v13, %v655_v48 }
 0x595   :  { %v664_v18 = vsel %vm661_vm10, %v663_v14, %v659_v47 }
 0x5ff   :  { %v671_v43 = vpop.permute.xlu0 %670 }
 0x600   :  { %v673_v52 = vadd.f32 %v671_v43, %v667_v37 }
 0x602   :  { %2472 = vtanh.f32 %v673_v52 }
 0x608   :  { %v2473_v24 = vpop.eup %2472 }
 0x609   :  { %v3182_v29 = vmul.f32 %v2473_v24, %v664_v18 }
 0x60b   :  { %v676_v55 = vpack.c.bf16 %v3182_v29, %v3182_v29 }
 0x60d   :  { %687 = vrot.lane.b32.xlu1 %v676_v55, %s2751_s27 }
 0x67f   :  { %v688_v11 = vpop.permute.xlu1 %687 }
 0x680   :  { %2213 = vmatmul.msk.bf16.vlgmr.msrb.gmra.mxu0 %vm320_vm11, %v688_v11  ;;  %2214 = vmatmul.msk.bf16.vlgmr.msrb.gmra.mxu1 %vm320_vm11, %v688_v11 }
 0x6fd   :  { %v701_v23 = vpop.f32.mrf.mxu0  ;;  %v714_v33 = vpop.f32.mrf.mxu1 }
 0x6fe   :  { %v718_v32 = vadd.f32 %v701_v23, %v272_v7  ;;  %v719_v56 = vadd.f32 %v714_v33, %v273_v10 }
 0x700   :  { %v2215_v38 = vmul.f32 -1.442695, %v718_v32  ;;  %v2216_v62 = vmul.f32 -1.442695, %v719_v56 }
 0x702   :  { %2474 = vpow2.f32 %v2215_v38 }
 0x705   :  { %v703_v57 = vpop.f32.mrf.mxu0  ;;  %v716_v30 = vpop.f32.mrf.mxu1 }
 0x708   :  { %v2475_v54 = vpop.eup %2474 }
 0x709   :  { %v726_v6 = vadd.f32 1.0, %v2475_v54 }
 0x70b   :  { %2476 = vrcp.f32 %v726_v6  ;;  %v739_v61 = vand.u32 2147483648, %v726_v6  ;;  %v737_v2 = vand.u32 2147483647, %v726_v6  ;;  %vm733_vm13 = vweird.f32 %v726_v6 }
 0x70c   :  { %2478 = vtanh.f32 %v719_v56 }
 0x70d   :  { %v740_v3 = vor.u32 1.1754944e-38, %v739_v61  ;;  %vm738_vm15 = vcmp.eq.f32.partialorder %v737_v2, 8.507059e+37  ;;  %2480 = vpow2.f32 %v2216_v62 }
 0x711   :  { %v2477_v19 = vpop.eup %2476 }
 0x712   :  { %v729_v53 = vmul.f32 %v2477_v19, %v726_v6  ;;  %vm734_vm12 = vweird.f32 %v2477_v19  ;;  %v2479_v9 = vpop.eup %2478 }
 0x713   :  { %vm735_vm14 = vmor %vm733_vm13, %vm734_vm12  ;;  %v2481_v5 = vpop.eup %2480 }
 0x714   :  { %v730_v59 = vsub.f32 1.0, %v729_v53  ;;  %v727_v10 = vadd.f32 1.0, %v2481_v5 }
 0x716   :  { %v731_v1 = vmul.f32 %v2477_v19, %v730_v59  ;;  %2482 = vrcp.f32 %v727_v10  ;;  %v754_v47 = vand.u32 2147483648, %v727_v10  ;;  %vm748_vm4 = vweird.f32 %v727_v10 }
 0x717   :  { %v752_v14 = vand.u32 2147483647, %v727_v10 }
 0x718   :  { %v732_v7 = vadd.f32 %v2477_v19, %v731_v1  ;;  %v755_v18 = vor.u32 1.1754944e-38, %v754_v47 }
 0x719   :  { %vm753_vm6 = vcmp.eq.f32.partialorder %v752_v14, 8.507059e+37 }
 0x71a   :  { %v736_v8 = vsel %vm735_vm14, %v2477_v19, %v732_v7 }
 0x71b   :  { %v741_v34 = vsel %vm738_vm15, %v740_v3, %v736_v8 }
 0x71c   :  { %v760_v13 = vmul.f32 %v2479_v9, %v741_v34  ;;  %v2483_v21 = vpop.eup %2482  ;;  %v759_v43 = vmul.f32 %v741_v34, %v673_v52 }
 0x71d   :  { %v744_v26 = vmul.f32 %v2483_v21, %v727_v10  ;;  %vm749_vm3 = vweird.f32 %v2483_v21 }
 0x71e   :  { %762 = vrot.lane.b32.xlu2 %v760_v13, %s2751_s27  ;;  %vm750_vm5 = vmor %vm748_vm4, %vm749_vm3 }
 0x71f   :  { %v745_v60 = vsub.f32 1.0, %v744_v26 }
 0x721   :  { %v746_v37 = vmul.f32 %v2483_v21, %v745_v60 }
 0x723   :  { %v747_v42 = vadd.f32 %v2483_v21, %v746_v37 }
 0x725   :  { %v751_v24 = vsel %vm750_vm5, %v2483_v21, %v747_v42 }
 0x726   :  { %v756_v11 = vsel %vm753_vm6, %v755_v18, %v751_v24 }
 0x778   :  { %v763_v48 = vpop.permute.xlu2 %762 }
 0x779   :  { %v765_v46 = vadd.f32 %v763_v48, %v759_v43 }
 0x77b   :  { %2484 = vtanh.f32 %v765_v46 }
 0x781   :  { %v2485_v55 = vpop.eup %2484 }
 0x782   :  { %v3200_v23 = vmul.f32 %v2485_v55, %v756_v11 }
 0x784   :  { %v768_v33 = vpack.c.bf16 %v3200_v23, %v3200_v23 }
 0x786   :  { %779 = vrot.lane.b32.xlu0 %v768_v33, %s2751_s27 }
 0x7f8   :  { %v780_v52 = vpop.permute.xlu0 %779 }
 0x7f9   :  { %2217 = vmatmul.msk.bf16.vlgmr.msra.gmra.mxu2 %vm320_vm11, %v780_v52  ;;  %2218 = vmatmul.msk.bf16.vlgmr.msra.gmra.mxu3 %vm320_vm11, %v780_v52 }
 0x87c   :  { %v793_v32 = vpop.f32.mrf.mxu2  ;;  %v806_v38 = vpop.f32.mrf.mxu3 }
 0x87d   :  { %v810_v57 = vadd.f32 %v793_v32, %v274_v17  ;;  %v811_v59 = vadd.f32 %v806_v38, %v275_v20 }
 0x87f   :  { %v2219_v30 = vmul.f32 -1.442695, %v810_v57  ;;  %v2220_v51 = vmul.f32 -1.442695, %v811_v59 }
 0x881   :  { %2486 = vpow2.f32 %v2219_v30 }
 0x884   :  { %v795_v54 = vpop.f32.mrf.mxu2  ;;  %v808_v6 = vpop.f32.mrf.mxu3 }
 0x887   :  { %v2487_v19 = vpop.eup %2486 }
 0x888   :  { %v818_v56 = vadd.f32 1.0, %v2487_v19 }
 0x88a   :  { %2488 = vrcp.f32 %v818_v56  ;;  %v831_v2 = vand.u32 2147483648, %v818_v56  ;;  %v829_v12 = vand.u32 2147483647, %v818_v56  ;;  %vm825_vm8 = vweird.f32 %v818_v56 }
 0x88b   :  { %2490 = vtanh.f32 %v811_v59 }
 0x88c   :  { %v832_v7 = vor.u32 1.1754944e-38, %v831_v2  ;;  %vm830_vm10 = vcmp.eq.f32.partialorder %v829_v12, 8.507059e+37  ;;  %2492 = vpow2.f32 %v2220_v51 }
 0x890   :  { %v2489_v53 = vpop.eup %2488 }
 0x891   :  { %v821_v61 = vmul.f32 %v2489_v53, %v818_v56  ;;  %vm826_vm7 = vweird.f32 %v2489_v53  ;;  %v2491_v8 = vpop.eup %2490 }
 0x892   :  { %vm827_vm9 = vmor %vm825_vm8, %vm826_vm7  ;;  %v2493_v15 = vpop.eup %2492 }
 0x893   :  { %v822_v1 = vsub.f32 1.0, %v821_v61  ;;  %v819_v20 = vadd.f32 1.0, %v2493_v15 }
 0x895   :  { %v823_v49 = vmul.f32 %v2489_v53, %v822_v1  ;;  %2494 = vrcp.f32 %v819_v20  ;;  %v846_v43 = vand.u32 2147483648, %v819_v20  ;;  %vm840_vm13 = vweird.f32 %v819_v20 }
 0x896   :  { %v844_v48 = vand.u32 2147483647, %v819_v20 }
 0x897   :  { %v824_v17 = vadd.f32 %v2489_v53, %v823_v49  ;;  %v847_v47 = vor.u32 1.1754944e-38, %v846_v43  ;;  %v2263_v43 = vld [vmem:[#allocation6 + $0x10] sm:$0xf] }
 0x898   :  { %vm845_vm15 = vcmp.eq.f32.partialorder %v844_v48, 8.507059e+37  ;;  %v2392_v48 = vld [vmem:[#allocation6 + $0x14] sm:$0xf0] }
 0x899   :  { %v828_v3 = vsel %vm827_vm9, %v2489_v53, %v824_v17 }
 0x89a   :  { %v833_v9 = vsel %vm830_vm10, %v832_v7, %v828_v3 }
 0x89b   :  { %v852_v34 = vmul.f32 %v2491_v8, %v833_v9  ;;  %v2495_v13 = vpop.eup %2494  ;;  %v851_v21 = vmul.f32 %v833_v9, %v765_v46 }
 0x89c   :  { %v836_v62 = vmul.f32 %v2495_v13, %v819_v20  ;;  %vm841_vm12 = vweird.f32 %v2495_v13 }
 0x89d   :  { %854 = vrot.lane.b32.xlu1 %v852_v34, %s2751_s27  ;;  %vm842_vm14 = vmor %vm840_vm13, %vm841_vm12 }
 0x89e   :  { %v837_v5 = vsub.f32 1.0, %v836_v62 }
 0x8a0   :  { %v838_v10 = vmul.f32 %v2495_v13, %v837_v5 }
 0x8a2   :  { %v839_v37 = vadd.f32 %v2495_v13, %v838_v10 }
 0x8a4   :  { %v843_v42 = vsel %vm842_vm14, %v2495_v13, %v839_v37 }
 0x8a5   :  { %v848_v24 = vsel %vm845_vm15, %v847_v47, %v843_v42  ;;  %v2391_v42 = vld [vmem:[#allocation6 + $0x14] sm:$0xf]  ;;  %v2264_v47 = vor.u32 %v2392_v48, %v2263_v43 }
 0x8a7   :  { %1213 = vmatpush.bf16.msra.mxu2 %v2264_v47 }
 0x90f   :  { %v855_v26 = vpop.permute.xlu1 %854 }
 0x910   :  { %v857_v60 = vadd.f32 %v855_v26, %v851_v21 }
 0x912   :  { %2496 = vtanh.f32 %v857_v60 }
 0x918   :  { %v2497_v14 = vpop.eup %2496 }
 0x919   :  { %v3218_v18 = vmul.f32 %v2497_v14, %v848_v24  ;;  %v2265_v14 = vld [vmem:[#allocation6 + $0x18] sm:$0xf0]  ;;  %v2255_v24 = vld [vmem:[#allocation6] sm:$0xf] }
 0x91b   :  { %v860_v55 = vpack.c.bf16 %v3218_v18, %v3218_v18 }
 0x91d   :  { %871 = vrot.lane.b32.xlu2 %v860_v55, %s2751_s27  ;;  %v2390_v55 = vld [vmem:[#allocation6 + $0x4] sm:$0xf0] }
 0x977   :  { %v872_v46 = vpop.permute.xlu2 %871 }
 0x978   :  { %2221 = vmatmul.msk.bf16.vlgmr.msra.gmra.mxu0 %vm320_vm11, %v872_v46  ;;  %2222 = vmatmul.msk.bf16.vlgmr.msra.gmra.mxu1 %vm320_vm11, %v872_v46  ;;  %v2268_v46 = vor.u32 %v2391_v42, %v2265_v14  ;;  %v2396_v14 = vld [vmem:[#allocation8 + $0x14] sm:$0xf0] }
 0x97a   :  { %1242 = vmatpush.bf16.msra.mxu3 %v2268_v46 }
 0x9f5   :  { %v885_v11 = vpop.f32.mrf.mxu0  ;;  %v898_v33 = vpop.f32.mrf.mxu1 }
 0x9f6   :  { %v902_v52 = vadd.f32 %v885_v11, %v276_v31  ;;  %v903_v19 = vadd.f32 %v898_v33, %v277_v36  ;;  %v2389_v11 = vld [vmem:[#allocation6 + $0x4] sm:$0xf]  ;;  %v2257_v33 = vld [vmem:[#allocation6 + $0x8] sm:$0xf0] }
 0x9f8   :  { %v2223_v32 = vmul.f32 -1.442695, %v902_v52  ;;  %v2224_v27 = vmul.f32 -1.442695, %v903_v19  ;;  %v2256_v52 = vor.u32 %v2390_v55, %v2255_v24 }
 0x9fa   :  { %2498 = vpow2.f32 %v2223_v32  ;;  %v2260_v32 = vor.u32 %v2389_v11, %v2257_v33  ;;  %1214 = vmatpush.bf16.msra.mxu2 %v2256_v52 }
 0x9fc   :  { %1243 = vmatpush.bf16.msra.mxu3 %v2260_v32 }
 0x9fd   :  { %v887_v38 = vpop.f32.mrf.mxu0  ;;  %v900_v57 = vpop.f32.mrf.mxu1 }
 0xa00   :  { %v2499_v30 = vpop.eup %2498 }
 0xa01   :  { %v910_v54 = vadd.f32 1.0, %v2499_v30 }
 0xa03   :  { %2500 = vrcp.f32 %v910_v54  ;;  %v923_v59 = vand.u32 2147483648, %v910_v54  ;;  %v921_v25 = vand.u32 2147483647, %v910_v54  ;;  %vm917_vm4 = vweird.f32 %v910_v54 }
 0xa04   :  { %2502 = vtanh.f32 %v903_v19 }
 0xa05   :  { %v924_v61 = vor.u32 1.1754944e-38, %v923_v59  ;;  %vm922_vm6 = vcmp.eq.f32.partialorder %v921_v25, 8.507059e+37  ;;  %2504 = vpow2.f32 %v2224_v27 }
 0xa09   :  { %v2501_v6 = vpop.eup %2500 }
 0xa0a   :  { %v913_v56 = vmul.f32 %v2501_v6, %v910_v54  ;;  %vm918_vm3 = vweird.f32 %v2501_v6  ;;  %v2503_v2 = vpop.eup %2502 }
 0xa0b   :  { %vm919_vm5 = vmor %vm917_vm4, %vm918_vm3  ;;  %v2505_v28 = vpop.eup %2504 }
 0xa0c   :  { %v914_v53 = vsub.f32 1.0, %v913_v56  ;;  %v911_v36 = vadd.f32 1.0, %v2505_v28 }
 0xa0e   :  { %v915_v22 = vmul.f32 %v2501_v6, %v914_v53  ;;  %2506 = vrcp.f32 %v911_v36  ;;  %v938_v20 = vand.u32 2147483648, %v911_v36  ;;  %vm932_vm8 = vweird.f32 %v911_v36 }
 0xa0f   :  { %v936_v13 = vand.u32 2147483647, %v911_v36 }
 0xa10   :  { %v916_v31 = vadd.f32 %v2501_v6, %v915_v22  ;;  %v939_v5 = vor.u32 1.1754944e-38, %v938_v20 }
 0xa11   :  { %vm937_vm10 = vcmp.eq.f32.partialorder %v936_v13, 8.507059e+37 }
 0xa12   :  { %v920_v1 = vsel %vm919_vm5, %v2501_v6, %v916_v31 }
 0xa13   :  { %v925_v49 = vsel %vm922_vm6, %v924_v61, %v920_v1 }
 0xa14   :  { %v944_v12 = vmul.f32 %v2503_v2, %v925_v49  ;;  %v2507_v17 = vpop.eup %2506  ;;  %v943_v9 = vmul.f32 %v925_v49, %v857_v60 }
 0xa15   :  { %v928_v7 = vmul.f32 %v2507_v17, %v911_v36  ;;  %vm933_vm7 = vweird.f32 %v2507_v17 }
 0xa16   :  { %946 = vrot.lane.b32.xlu0 %v944_v12, %s2751_s27  ;;  %vm934_vm9 = vmor %vm932_vm8, %vm933_vm7 }
 0xa17   :  { %v929_v3 = vsub.f32 1.0, %v928_v7 }
 0xa19   :  { %v930_v8 = vmul.f32 %v2507_v17, %v929_v3 }
 0xa1b   :  { %v931_v15 = vadd.f32 %v2507_v17, %v930_v8 }
 0xa1d   :  { %v935_v62 = vsel %vm934_vm9, %v2507_v17, %v931_v15 }
 0xa1e   :  { %402 = vrot.lane.b32.xlu0 %v3095_v63, %s2751_s27  ;;  %v940_v26 = vsel %vm937_vm10, %v939_v5, %v935_v62 }
 0xa88   :  { %v947_v34 = vpop.permute.xlu0 %946 }
 0xa89   :  { %v3238_v51 = vadd.f32 %v947_v34, %v943_v9 }
 0xa8b   :  { %2508 = vtanh.f32 %v3238_v51 }
 0xa90   :  { %v403_v10 = vpop.permute.xlu0 %402 }
 0xa91   :  { %v2509_v21 = vpop.eup %2508  ;;  %405 = vst.msk [vmem:[#allocation2] sm:$0xff] %vm181_vm0, %v403_v10 }
 0xa92   :  { %v3242_v60 = vmul.f32 %v2509_v21, %v940_v26 }
 0xa94   :  { %v952_v37 = vpack.c.bf16 %v3242_v60, %v3242_v60 }
 0xa96   :  { %963 = vrot.lane.b32.xlu1 %v952_v37, %s2751_s27 }
 0xa98   :  { %v1053_v30 = vld [vmem:[#allocation2] sm:$0xff] }
 0xa9e   :  { %494 = vrot.lane.b32.xlu1 %v3125_v58, %s2751_s27 }
 0xaa6   :  { %586 = vrot.lane.b32.xlu1 %v3155_v16, %s2751_s27 }
 0xaae   :  { %866 = vrot.lane.b32.xlu1 %v3218_v18, %s2754_s0 }
 0xab6   :  { %590 = vrot.lane.b32.xlu1 %v3155_v16, %s2754_s0 }
 0xb08   :  { %v964_v38 = vpop.permute.xlu1 %963 }
 0xb09   :  { %2225 = vmatmul.msk.bf16.vlgmr.msrb.gmra.mxu2 %vm320_vm11, %v964_v38  ;;  %2226 = vmatmul.msk.bf16.vlgmr.msrb.gmra.mxu3 %vm320_vm11, %v964_v38  ;;  %v2231_v38 = vld [vmem:[#allocation8] sm:$0xf] }
 0xb10   :  { %v495_v16 = vpop.permute.xlu1 %494 }
 0xb11   :  { %497 = vst.msk [vmem:[#allocation2 + $0x8] sm:$0xff] %vm181_vm0, %v495_v16  ;;  %v2394_v16 = vld [vmem:[#allocation8 + $0x4] sm:$0xf0] }
 0xb18   :  { %v587_v57 = vpop.permute.xlu1 %586  ;;  %v1054_v54 = vld [vmem:[#allocation2 + $0x8] sm:$0xff] }
 0xb19   :  { %589 = vst.msk [vmem:[#allocation2 + $0x10] sm:$0xff] %vm181_vm0, %v587_v57  ;;  %v1061_v6 = vpack.c.bf16 %v1054_v54, %v1053_v30  ;;  %v2395_v57 = vld [vmem:[#allocation8 + $0x14] sm:$0xf]  ;;  %v2232_v30 = vor.u32 %v2394_v16, %v2231_v38  ;;  %v2241_v54 = vld [vmem:[#allocation8 + $0x18] sm:$0xf0] }
 0xb1a   :  { %v1265_v16 = vld [vmem:[#allocation9] sm:$0x3] }
 0xb1b   :  { %2269 = vmatmul.msk.bf16.vlgmr.msra.gmra.mxu2 %vm181_vm0, %v1061_v6  ;;  %2273 = vmatmul.msk.bf16.vlgmr.msra.gmra.mxu3 %vm181_vm0, %v1061_v6  ;;  %v2393_v6 = vld [vmem:[#allocation8 + $0x4] sm:$0xf] }
 0xb20   :  { %v867_v19 = vpop.permute.xlu1 %866  ;;  %v1055_v11 = vld [vmem:[#allocation2 + $0x10] sm:$0xff] }
 0xb21   :  { %869 = vst.msk [vmem:[#allocation3 + $0x10] sm:$0xff] %vm181_vm0, %v867_v19  ;;  %v2233_v19 = vld [vmem:[#allocation8 + $0x8] sm:$0xf0] }
 0xb28   :  { %v591_v56 = vpop.permute.xlu1 %590 }
 0xb29   :  { %593 = vst.msk [vmem:[#allocation3 + $0x28] sm:$0xff] %vm181_vm0, %v591_v56  ;;  %v2236_v56 = vor.u32 %v2393_v6, %v2233_v19  ;;  %v3434_v19 = vperm.slane %v1265_v16, 0 }
 0xb8c   :  { %v977_v53 = vpop.f32.mrf.mxu2  ;;  %v990_v59 = vpop.f32.mrf.mxu3 }
 0xb8d   :  { %v994_v22 = vadd.f32 %v977_v53, %v278_v50  ;;  %v995_v12 = vadd.f32 %v990_v59, %v279_v41  ;;  %v2295_v59 = vld [vmem:[%s3723_s6 + $0x20] sm:$0xf] }
 0xb8f   :  { %v2227_v25 = vmul.f32 -1.442695, %v994_v22  ;;  %v2228_v44 = vmul.f32 -1.442695, %v995_v12  ;;  %v2402_v22 = vld [vmem:[%s3723_s6 + $0x24] sm:$0xf0] }
 0xb91   :  { %2510 = vpow2.f32 %v2227_v25  ;;  %v3318_v25 = vor.u32 %v2402_v22, %v2295_v59 }
 0xb94   :  { %v979_v31 = vpop.f32.mrf.mxu2  ;;  %v992_v61 = vpop.f32.mrf.mxu3 }
 0xb97   :  { %v2511_v1 = vpop.eup %2510 }
 0xb98   :  { %v1002_v2 = vadd.f32 1.0, %v2511_v1  ;;  %v2403_v1 = vld [vmem:[%s3723_s6 + $0x34] sm:$0xf] }
 0xb9a   :  { %2512 = vrcp.f32 %v1002_v2  ;;  %v1015_v36 = vand.u32 2147483648, %v1002_v2  ;;  %v1013_v40 = vand.u32 2147483647, %v1002_v2  ;;  %vm1009_vm13 = vweird.f32 %v1002_v2 }
 0xb9b   :  { %2514 = vtanh.f32 %v995_v12 }
 0xb9c   :  { %v1016_v17 = vor.u32 1.1754944e-38, %v1015_v36  ;;  %vm1014_vm15 = vcmp.eq.f32.partialorder %v1013_v40, 8.507059e+37  ;;  %2516 = vpow2.f32 %v2228_v44  ;;  %v2400_v40 = vld [vmem:[%s3723_s6 + $0x14] sm:$0xf0] }
 0xba0   :  { %v2513_v49 = vpop.eup %2512 }
 0xba1   :  { %v1005_v27 = vmul.f32 %v2513_v49, %v1002_v2  ;;  %vm1010_vm12 = vweird.f32 %v2513_v49  ;;  %v2515_v3 = vpop.eup %2514  ;;  %v2305_v2 = vld [vmem:[%s3723_s6 + $0x38] sm:$0xf0] }
 0xba2   :  { %vm1011_vm14 = vmor %vm1009_vm13, %vm1010_vm12  ;;  %v2517_v45 = vpop.eup %2516 }
 0xba3   :  { %v1006_v28 = vsub.f32 1.0, %v1005_v27  ;;  %v1003_v41 = vadd.f32 1.0, %v2517_v45 }
 0xba5   :  { %v1007_v39 = vmul.f32 %v2513_v49, %v1006_v28  ;;  %2518 = vrcp.f32 %v1003_v41  ;;  %vm1024_vm4 = vweird.f32 %v1003_v41  ;;  %v1028_v26 = vand.u32 2147483647, %v1003_v41 }
 0xba7   :  { %v1008_v50 = vadd.f32 %v2513_v49, %v1007_v39  ;;  %vm1029_vm6 = vcmp.eq.f32.partialorder %v1028_v26, 8.507059e+37  ;;  %v2287_v39 = vld [vmem:[%s3723_s6 + $0x10] sm:$0xf]  ;;  %v2281_v26 = vld [vmem:[%s3723_s6 + $0x8] sm:$0xf0] }
 0xba9   :  { %v1012_v7 = vsel %vm1011_vm14, %v2513_v49, %v1008_v50  ;;  %v3329_v49 = vor.u32 %v2403_v1, %v2305_v2  ;;  %v2401_v50 = vld [vmem:[%s3723_s6 + $0x24] sm:$0xf] }
 0xbaa   :  { %v1017_v8 = vsel %vm1014_vm15, %v1016_v17, %v1012_v7  ;;  %v3346_v17 = vor.u32 %v2400_v40, %v2287_v39  ;;  %v2297_v7 = vld [vmem:[%s3723_s6 + $0x28] sm:$0xf0] }
 0xbab   :  { %v1036_v9 = vmul.f32 %v2515_v3, %v1017_v8  ;;  %v2519_v34 = vpop.eup %2518  ;;  %v1035_v62 = vmul.f32 %v1017_v8, %v3238_v51  ;;  %v2239_v51 = vld [vmem:[#allocation8 + $0x10] sm:$0xf]  ;;  %1451 = vmatpush.bf16.msrb.mxu3 %v3329_v49  ;;  %v3351_v3 = vor.u32 %v2401_v50, %v2297_v7 }
 0xbac   :  { %v1020_v15 = vmul.f32 %v2519_v34, %v1003_v41  ;;  %vm1025_vm3 = vweird.f32 %v2519_v34  ;;  %v2240_v24 = vor.u32 %v2396_v14, %v2239_v51  ;;  %v1070_v51 = vld [vmem:[#allocation3 + $0x28] sm:$0xff] }
 0xbad   :  { %1038 = vrot.lane.b32.xlu2 %v1036_v9, %s2751_s27  ;;  %vm1026_vm5 = vmor %vm1024_vm4, %vm1025_vm3 }
 0xbae   :  { %v1021_v20 = vsub.f32 1.0, %v1020_v15  ;;  %1123 = vmatpush.bf16.msrb.mxu0 %v2240_v24 }
 0xbaf   :  { %1452 = vmatpush.bf16.msrb.mxu3 %v3351_v3 }
 0xbb0   :  { %v1022_v13 = vmul.f32 %v2519_v34, %v1021_v20 }
 0xbb2   :  { %v1023_v21 = vadd.f32 %v2519_v34, %v1022_v13  ;;  %1124 = vmatpush.bf16.msrb.mxu0 %v2232_v30  ;;  %v2279_v13 = vld [vmem:[%s3723_s6] sm:$0xf] }
 0xbb5   :  { %958 = vrot.lane.b32.xlu2 %v3242_v60, %s2754_s0 }
 0xbbd   :  { %678 = vrot.lane.b32.xlu2 %v3182_v29, %s2751_s27 }
 0xbc5   :  { %770 = vrot.lane.b32.xlu2 %v3200_v23, %s2751_s27 }
 0xbcd   :  { %682 = vrot.lane.b32.xlu2 %v3182_v29, %s2754_s0  ;;  %v1030_v29 = vand.u32 2147483648, %v1003_v41 }
 0xbcf   :  { %v1031_v37 = vor.u32 1.1754944e-38, %v1030_v29  ;;  %v2397_v29 = vld [vmem:[%s3723_s6 + $0x4] sm:$0xf] }
 0xbd5   :  { %406 = vrot.lane.b32.xlu2 %v3095_v63, %s2754_s0  ;;  %v1027_v63 = vsel %vm1026_vm5, %v2519_v34, %v1023_v21  ;;  %v1067_v34 = vld [vmem:[#allocation3 + $0x10] sm:$0xff]  ;;  %v2289_v21 = vld [vmem:[%s3723_s6 + $0x18] sm:$0xf0] }
 0xbd6   :  { %v1032_v42 = vsel %vm1029_vm6, %v1031_v37, %v1027_v63 }
 0xc07   :  { %v1039_v5 = vpop.permute.xlu2 %1038 }
 0xc08   :  { %v1041_v10 = vadd.f32 %v1039_v5, %v1035_v62  ;;  %v2398_v62 = vld [vmem:[%s3723_s6 + $0x4] sm:$0xf0]  ;;  %v2399_v5 = vld [vmem:[%s3723_s6 + $0x14] sm:$0xf] }
 0xc09   :  { %v3383_v63 = vor.u32 %v2399_v5, %v2289_v21 }
 0xc0a   :  { %2520 = vtanh.f32 %v1041_v10  ;;  %v3372_v10 = vor.u32 %v2398_v62, %v2279_v13 }
 0xc0b   :  { %1453 = vmatpush.bf16.msrb.mxu3 %v3383_v63 }
 0xc0f   :  { %v959_v43 = vpop.permute.xlu2 %958 }
 0xc10   :  { %v2521_v48 = vpop.eup %2520  ;;  %961 = vst.msk [vmem:[#allocation3 + $0x8] sm:$0xff] %vm181_vm0, %v959_v43  ;;  %v3388_v43 = vor.u32 %v2397_v29, %v2281_v26 }
 0xc11   :  { %v1043_v47 = vmul.f32 %v2521_v48, %v1032_v42 }
 0xc12   :  { %1454 = vmatpush.bf16.msrb.mxu3 %v3388_v43 }
 0xc13   :  { %1045 = vrot.lane.b32.xlu1 %v1043_v47, %s2751_s27  ;;  %1049 = vrot.lane.b32.xlu0 %v1043_v47, %s2754_s0 }
 0xc16   :  { %1617 = vmatpush.bf16.msra.mxu3 %v3329_v49 }
 0xc17   :  { %v679_v55 = vpop.permute.xlu2 %678  ;;  %v1066_v28 = vld [vmem:[#allocation3 + $0x8] sm:$0xff] }
 0xc18   :  { %681 = vst.msk [vmem:[#allocation2 + $0x18] sm:$0xff] %vm181_vm0, %v679_v55 }
 0xc1a   :  { %1618 = vmatpush.bf16.msra.mxu3 %v3351_v3 }
 0xc1b   :  { %774 = vrot.lane.b32.xlu0 %v3200_v23, %s2754_s0 }
 0xc1e   :  { %1619 = vmatpush.bf16.msra.mxu3 %v3383_v63 }
 0xc1f   :  { %v771_v46 = vpop.permute.xlu2 %770  ;;  %v1056_v33 = vld [vmem:[#allocation2 + $0x18] sm:$0xff] }
 0xc20   :  { %773 = vst.msk [vmem:[#allocation2 + $0x20] sm:$0xff] %vm181_vm0, %v771_v46  ;;  %v1062_v52 = vpack.c.bf16 %v1056_v33, %v1055_v11  ;;  %v3426_v33 = vpop.f32.mrf.mxu2 }
 0xc22   :  { %2270 = vmatmul.msk.bf16.gmra.mxu2 %vm181_vm0, %v1062_v52  ;;  %2274 = vmatmul.msk.bf16.gmra.mxu3 %vm181_vm0, %v1062_v52  ;;  %v3428_v52 = vpop.f32.mrf.mxu3 }
 0xc23   :  { %862 = vrot.lane.b32.xlu0 %v3218_v18, %s2751_s27  ;;  %v2244_v18 = vor.u32 %v2395_v57, %v2241_v54  ;;  %1620 = vmatpush.bf16.msra.mxu3 %v3388_v43 }
 0xc25   :  { %1152 = vmatpush.bf16.msrb.mxu1 %v2244_v18  ;;  %v3436_v18 = vperm.slane %v1265_v16, 1 }
 0xc27   :  { %v683_v32 = vpop.permute.xlu2 %682  ;;  %v1057_v45 = vld [vmem:[#allocation2 + $0x20] sm:$0xff] }
 0xc28   :  { %685 = vst.msk [vmem:[#allocation3 + $0x20] sm:$0xff] %vm181_vm0, %v683_v32 }
 0xc29   :  { %1153 = vmatpush.bf16.msrb.mxu1 %v2236_v56 }
 0xc2a   :  { %v1247_v32 = vpop.f32.mrf.mxu3 }
 0xc2b   :  { %954 = vrot.lane.b32.xlu0 %v3242_v60, %s2751_s27  ;;  %v2303_v60 = vld [vmem:[%s3723_s6 + $0x30] sm:$0xf] }
 0xc2d   :  { %1368 = vmatpush.bf16.msra.mxu1 %v3329_v49 }
 0xc2f   :  { %v407_v23 = vpop.permute.xlu2 %406  ;;  %v1069_v42 = vld [vmem:[#allocation3 + $0x20] sm:$0xff] }
 0xc30   :  { %409 = vst.msk [vmem:[#allocation3 + $0x38] sm:$0xff] %vm181_vm0, %v407_v23  ;;  %v1075_v24 = vpack.c.bf16 %v1070_v51, %v1069_v42 }
 0xc31   :  { %1369 = vmatpush.bf16.msra.mxu1 %v3351_v3 }
 0xc33   :  { %498 = vrot.lane.b32.xlu0 %v3125_v58, %s2754_s0  ;;  %v2404_v58 = vld [vmem:[%s3723_s6 + $0x34] sm:$0xf0] }
 0xc34   :  { %v3308_v53 = vor.u32 %v2404_v58, %v2303_v60 }
 0xc35   :  { %1370 = vmatpush.bf16.msra.mxu1 %v3383_v63 }
 0xc36   :  { %1355 = vmatpush.bf16.msra.mxu0 %v3308_v53  ;;  %1438 = vmatpush.bf16.msrb.mxu2 %v3308_v53 }
 0xc37   :  { %v1072_v46 = vld [vmem:[#allocation3 + $0x38] sm:$0xff] }
 0xc39   :  { %1371 = vmatpush.bf16.msra.mxu1 %v3388_v43 }
 0xc3a   :  { %1356 = vmatpush.bf16.msra.mxu0 %v3318_v25  ;;  %1439 = vmatpush.bf16.msrb.mxu2 %v3318_v25 }
 0xc3e   :  { %1357 = vmatpush.bf16.msra.mxu0 %v3346_v17  ;;  %1440 = vmatpush.bf16.msrb.mxu2 %v3346_v17 }
 0xc42   :  { %1358 = vmatpush.bf16.msra.mxu0 %v3372_v10  ;;  %1441 = vmatpush.bf16.msrb.mxu2 %v3372_v10 }
 0xc46   :  { %1604 = vmatpush.bf16.msra.mxu2 %v3308_v53 }
 0xc4a   :  { %1605 = vmatpush.bf16.msra.mxu2 %v3318_v25 }
 0xc4e   :  { %1606 = vmatpush.bf16.msra.mxu2 %v3346_v17 }
 0xc52   :  { %1607 = vmatpush.bf16.msra.mxu2 %v3372_v10 }
 0xc85   :  { %v1046_v31 = vpop.permute.xlu1 %1045  ;;  %v1050_v61 = vpop.permute.xlu0 %1049 }
 0xc86   :  { %1048 = vst.msk [vmem:[#allocation2 + $0x38] sm:$0xff] %vm181_vm0, %v1046_v31 }
 0xc87   :  { %1052 = vst.msk [vmem:[#allocation3] sm:$0xff] %vm181_vm0, %v1050_v61 }
 0xc8d   :  { %v775_v12 = vpop.permute.xlu0 %774  ;;  %v1060_v47 = vld [vmem:[#allocation2 + $0x38] sm:$0xff] }
 0xc8e   :  { %777 = vst.msk [vmem:[#allocation3 + $0x18] sm:$0xff] %vm181_vm0, %v775_v12  ;;  %v1065_v27 = vld [vmem:[#allocation3] sm:$0xff] }
 0xc8f   :  { %v1073_v36 = vpack.c.bf16 %v1066_v28, %v1065_v27 }
 0xc91   :  { %2245 = vmatmul.msk.bf16.vlgmr.msrb.gmra.mxu0 %vm181_vm0, %v1073_v36  ;;  %2249 = vmatmul.msk.bf16.vlgmr.msrb.gmra.mxu1 %vm181_vm0, %v1073_v36 }
 0xc92   :  { %1521 = vmatpush.bf16.msrb.mxu0 %v3308_v53  ;;  %1534 = vmatpush.bf16.msrb.mxu1 %v3329_v49 }
 0xc95   :  { %v863_v8 = vpop.permute.xlu0 %862  ;;  %v1068_v9 = vld [vmem:[#allocation3 + $0x18] sm:$0xff] }
 0xc96   :  { %865 = vst.msk [vmem:[#allocation2 + $0x28] sm:$0xff] %vm181_vm0, %v863_v8  ;;  %v1074_v20 = vpack.c.bf16 %v1068_v9, %v1067_v34  ;;  %1522 = vmatpush.bf16.msrb.mxu0 %v3318_v25  ;;  %1535 = vmatpush.bf16.msrb.mxu1 %v3351_v3 }
 0xc9a   :  { %1523 = vmatpush.bf16.msrb.mxu0 %v3346_v17  ;;  %1536 = vmatpush.bf16.msrb.mxu1 %v3383_v63 }
 0xc9d   :  { %v955_v44 = vpop.permute.xlu0 %954  ;;  %v1058_v41 = vld [vmem:[#allocation2 + $0x28] sm:$0xff] }
 0xc9e   :  { %957 = vst.msk [vmem:[#allocation2 + $0x30] sm:$0xff] %vm181_vm0, %v955_v44  ;;  %v1063_v15 = vpack.c.bf16 %v1058_v41, %v1057_v45  ;;  %1524 = vmatpush.bf16.msrb.mxu0 %v3372_v10  ;;  %1537 = vmatpush.bf16.msrb.mxu1 %v3388_v43 }
 0xca0   :  { %2271 = vmatmul.msk.bf16.gmra.mxu2 %vm181_vm0, %v1063_v15  ;;  %2275 = vmatmul.msk.bf16.gmra.mxu3 %vm181_vm0, %v1063_v15 }
 0xca1   :  { %2246 = vmatmul.msk.bf16.gmra.mxu0 %vm181_vm0, %v1074_v20  ;;  %2250 = vmatmul.msk.bf16.gmra.mxu1 %vm181_vm0, %v1074_v20 }
 0xca5   :  { %v499_v37 = vpop.permute.xlu0 %498  ;;  %v1059_v48 = vld [vmem:[#allocation2 + $0x30] sm:$0xff]  ;;  %v1250_v57 = vpop.f32.mrf.mxu3 }
 0xca6   :  { %501 = vst.msk [vmem:[#allocation3 + $0x30] sm:$0xff] %vm181_vm0, %v499_v37  ;;  %v1064_v14 = vpack.c.bf16 %v1060_v47, %v1059_v48 }
 0xcad   :  { %v1071_v55 = vld [vmem:[#allocation3 + $0x30] sm:$0xff]  ;;  %v1252_v1 = vpop.f32.mrf.mxu3 }
 0xcae   :  { %v1076_v11 = vpack.c.bf16 %v1072_v46, %v1071_v55 }
 0xcb0   :  { %2272 = vmatmul.msk.bf16.gmra.mxu2 %vm181_vm0, %v1064_v14  ;;  %2276 = vmatmul.msk.bf16.gmra.mxu3 %vm181_vm0, %v1064_v14 }
 0xcb1   :  { %2247 = vmatmul.msk.bf16.gmra.mxu0 %vm181_vm0, %v1075_v24  ;;  %2251 = vmatmul.msk.bf16.gmra.mxu1 %vm181_vm0, %v1075_v24 }
 0xcc1   :  { %2248 = vmatmul.msk.bf16.gmra.mxu0 %vm181_vm0, %v1076_v11  ;;  %2252 = vmatmul.msk.bf16.gmra.mxu1 %vm181_vm0, %v1076_v11 }
 0xcd1   :  { %1359 = vmatmul.bf16.vlgmr.msra.gmra.mxu0 %v2753_v35  ;;  %1372 = vmatmul.bf16.vlgmr.msra.gmra.mxu1 %v2753_v35  ;;  %v1218_v35 = vpop.f32.mrf.mxu2 }
 0xcd2   :  { %1687 = vmatpush.bf16.msra.mxu0 %v3308_v53  ;;  %1700 = vmatpush.bf16.msra.mxu1 %v3329_v49 }
 0xcd6   :  { %1688 = vmatpush.bf16.msra.mxu0 %v3318_v25  ;;  %1701 = vmatpush.bf16.msra.mxu1 %v3351_v3 }
 0xcd9   :  { %v1221_v30 = vpop.f32.mrf.mxu2 }
 0xcda   :  { %1689 = vmatpush.bf16.msra.mxu0 %v3346_v17  ;;  %1702 = vmatpush.bf16.msra.mxu1 %v3383_v63 }
 0xcde   :  { %1690 = vmatpush.bf16.msra.mxu0 %v3372_v10  ;;  %1703 = vmatpush.bf16.msra.mxu1 %v3388_v43 }
 0xce1   :  { %v1223_v61 = vpop.f32.mrf.mxu2 }
 0xd0e   :  { %v3430_v23 = vpop.f32.mrf.mxu0  ;;  %v3432_v38 = vpop.f32.mrf.mxu1 }
 0xd16   :  { %v1128_v54 = vpop.f32.mrf.mxu0  ;;  %v1157_v6 = vpop.f32.mrf.mxu1 }
 0xd17   :  { %v1219_v56 = vadd.f32 %v1218_v35, %v1128_v54  ;;  %v1248_v60 = vadd.f32 %v1247_v32, %v1157_v6 }
 0xd19   :  { %v3439_v58 = vadd.f32 %v3434_v19, %v1219_v56  ;;  %v3442_v59 = vadd.f32 %v3436_v18, %v1248_v60 }
 0xd1e   :  { %v1131_v22 = vpop.f32.mrf.mxu0  ;;  %v1160_v31 = vpop.f32.mrf.mxu1 }
 0xd1f   :  { %v1222_v2 = vadd.f32 %v1221_v30, %v1131_v22  ;;  %v1251_v12 = vadd.f32 %v1250_v57, %v1160_v31 }
 0xd21   :  { %v3445_v27 = vadd.f32 %v3434_v19, %v1222_v2  ;;  %v3448_v28 = vadd.f32 %v3436_v18, %v1251_v12  ;;  %v1217_v2 = vadd.f32 %v3426_v33, %v3430_v23  ;;  %v1246_v12 = vadd.f32 %v3428_v52, %v3432_v38 }
 0xd23   :  { %v1226_v40 = vpop.f32.mrf.mxu2  ;;  %v1255_v50 = vpop.f32.mrf.mxu3 }
 0xd26   :  { %v1133_v36 = vpop.f32.mrf.mxu0  ;;  %v1162_v39 = vpop.f32.mrf.mxu1 }
 0xd27   :  { %v1224_v7 = vadd.f32 %v1223_v61, %v1133_v36  ;;  %v1253_v8 = vadd.f32 %v1252_v1, %v1162_v39 }
 0xd29   :  { %v3451_v9 = vadd.f32 %v3434_v19, %v1224_v7  ;;  %v3454_v44 = vadd.f32 %v3436_v18, %v1253_v8 }
 0xd2b   :  { %v1228_v20 = vpop.f32.mrf.mxu2  ;;  %v1257_v13 = vpop.f32.mrf.mxu3 }
 0xd2e   :  { %v1136_v45 = vpop.f32.mrf.mxu0  ;;  %v1165_v41 = vpop.f32.mrf.mxu1 }
 0xd2f   :  { %v1227_v34 = vadd.f32 %v1226_v40, %v1136_v45  ;;  %v1256_v15 = vadd.f32 %v1255_v50, %v1165_v41  ;;  %v3527_v45 = vadd.f32 %v3434_v19, %v1217_v2  ;;  %v3530_v41 = vadd.f32 %v3436_v18, %v1246_v12 }
 0xd31   :  { %v3457_v62 = vadd.f32 %v3434_v19, %v1227_v34  ;;  %v3460_v5 = vadd.f32 %v3436_v18, %v1256_v15 }
 0xd33   :  { %v1301_v21 = vsel %vm2993_vm1, %v3451_v9, %v3457_v62  ;;  %v1302_v29 = vsel %vm3001_vm2, %v3454_v44, %v3460_v5  ;;  %v1303_v26 = vsel %vm2993_vm1, %v3457_v62, %v3451_v9  ;;  %v1304_v37 = vsel %vm3001_vm2, %v3460_v5, %v3454_v44  ;;  %v1231_v55 = vpop.f32.mrf.mxu2  ;;  %v1260_v46 = vpop.f32.mrf.mxu3 }
 0xd36   :  { %v1138_v48 = vpop.f32.mrf.mxu0  ;;  %v1167_v42 = vpop.f32.mrf.mxu1 }
 0xd37   :  { %v1229_v47 = vadd.f32 %v1228_v20, %v1138_v48  ;;  %v1258_v51 = vadd.f32 %v1257_v13, %v1167_v42 }
 0xd39   :  { %v3479_v14 = vadd.f32 %v3434_v19, %v1229_v47  ;;  %v3482_v24 = vadd.f32 %v3436_v18, %v1258_v51 }
 0xd3b   :  { %v1299_v11 = vsel %vm2993_vm1, %v3445_v27, %v3479_v14  ;;  %v1300_v35 = vsel %vm3001_vm2, %v3448_v28, %v3482_v24  ;;  %v1305_v32 = vsel %vm2993_vm1, %v3479_v14, %v3445_v27  ;;  %v1306_v16 = vsel %vm3001_vm2, %v3482_v24, %v3448_v28  ;;  %v1233_v36 = vpop.f32.mrf.mxu2  ;;  %v1262_v39 = vpop.f32.mrf.mxu3 }
 0xd3e   :  { %v1141_v57 = vpop.f32.mrf.mxu0  ;;  %v1170_v30 = vpop.f32.mrf.mxu1 }
 0xd3f   :  { %v1232_v54 = vadd.f32 %v1231_v55, %v1141_v57  ;;  %v1261_v6 = vadd.f32 %v1260_v46, %v1170_v30 }
 0xd41   :  { %v3501_v56 = vadd.f32 %v3434_v19, %v1232_v54  ;;  %v3504_v60 = vadd.f32 %v3436_v18, %v1261_v6 }
 0xd43   :  { %v1297_v22 = vsel %vm2993_vm1, %v3439_v58, %v3501_v56  ;;  %v1298_v31 = vsel %vm3001_vm2, %v3442_v59, %v3504_v60  ;;  %v1307_v61 = vsel %vm2993_vm1, %v3501_v56, %v3439_v58  ;;  %v1308_v1 = vsel %vm3001_vm2, %v3504_v60, %v3442_v59 }
 0xd46   :  { %v1143_v40 = vpop.f32.mrf.mxu0  ;;  %v1172_v50 = vpop.f32.mrf.mxu1 }
 0xd47   :  { %v1234_v7 = vadd.f32 %v1233_v36, %v1143_v40  ;;  %v1263_v8 = vadd.f32 %v1262_v39, %v1172_v50 }
 0xd49   :  { %v3533_v34 = vadd.f32 %v3434_v19, %v1234_v7  ;;  %v3536_v33 = vadd.f32 %v3436_v18, %v1263_v8 }
 0xd4b   :  { %v1309_v52 = vsel %vm2993_vm1, %v3533_v34, %v3527_v45  ;;  %v1310_v23 = vsel %vm3001_vm2, %v3536_v33, %v3530_v41  ;;  %v1295_v38 = vsel %vm2993_vm1, %v3527_v45, %v3533_v34  ;;  %v1296_v51 = vsel %vm3001_vm2, %v3530_v41, %v3536_v33 }
 0xd4e   :  { %v1360_v19 = vpop.f32.mrf.mxu0  ;;  %v1373_v15 = vpop.f32.mrf.mxu1 }
 0xd4f   :  { %v1377_v20 = vadd.f32 %v1360_v19, %v1295_v38  ;;  %v1378_v46 = vadd.f32 %v1373_v15, %v1296_v51 }
 0xd51   :  { %v2309_v18 = vmul.f32 -1.442695, %v1377_v20  ;;  %v2310_v8 = vmul.f32 -1.442695, %v1378_v46 }
 0xd53   :  { %2522 = vpow2.f32 %v2309_v18 }
 0xd56   :  { %v1362_v13 = vpop.f32.mrf.mxu0  ;;  %v1375_v48 = vpop.f32.mrf.mxu1 }
 0xd59   :  { %v2523_v42 = vpop.eup %2522 }
 0xd5a   :  { %v1385_v47 = vadd.f32 1.0, %v2523_v42 }
 0xd5c   :  { %2524 = vrcp.f32 %v1385_v47  ;;  %v1398_v54 = vand.u32 2147483648, %v1385_v47  ;;  %v1396_v2 = vand.u32 2147483647, %v1385_v47  ;;  %vm1392_vm7 = vweird.f32 %v1385_v47 }
 0xd5d   :  { %2526 = vtanh.f32 %v1378_v46 }
 0xd5e   :  { %v1399_v36 = vor.u32 1.1754944e-38, %v1398_v54  ;;  %vm1397_vm9 = vcmp.eq.f32.partialorder %v1396_v2, 8.507059e+37  ;;  %2528 = vpow2.f32 %v2310_v8 }
 0xd62   :  { %v2525_v55 = vpop.eup %2524 }
 0xd63   :  { %v1388_v57 = vmul.f32 %v2525_v55, %v1385_v47  ;;  %vm1393_vm0 = vweird.f32 %v2525_v55  ;;  %v2527_v40 = vpop.eup %2526 }
 0xd64   :  { %vm1394_vm8 = vmor %vm1392_vm7, %vm1393_vm0  ;;  %v2529_v38 = vpop.eup %2528 }
 0xd65   :  { %v1389_v30 = vsub.f32 1.0, %v1388_v57  ;;  %v1386_v19 = vadd.f32 1.0, %v2529_v38 }
 0xd67   :  { %v1390_v6 = vmul.f32 %v2525_v55, %v1389_v30  ;;  %2530 = vrcp.f32 %v1386_v19  ;;  %vm1407_vm12 = vweird.f32 %v1386_v19  ;;  %v1411_v57 = vand.u32 2147483647, %v1386_v19 }
 0xd69   :  { %v1391_v12 = vadd.f32 %v2525_v55, %v1390_v6  ;;  %vm1412_vm14 = vcmp.eq.f32.partialorder %v1411_v57, 8.507059e+37 }
 0xd6b   :  { %v1395_v39 = vsel %vm1394_vm8, %v2525_v55, %v1391_v12  ;;  %v1413_v55 = vand.u32 2147483648, %v1386_v19 }
 0xd6c   :  { %v1400_v50 = vsel %vm1397_vm9, %v1399_v36, %v1395_v39 }
 0xd6d   :  { %v1419_v7 = vmul.f32 %v2527_v40, %v1400_v50  ;;  %v2531_v15 = vpop.eup %2530  ;;  %v1418_v48 = vmul.f32 0.0, %v1400_v50  ;;  %v1414_v30 = vor.u32 1.1754944e-38, %v1413_v55 }
 0xd6e   :  { %v1403_v20 = vmul.f32 %v2531_v15, %v1386_v19  ;;  %vm1408_vm10 = vweird.f32 %v2531_v15 }
 0xd6f   :  { %1421 = vrot.lane.b32.xlu1 %v1419_v7, %s2751_s27  ;;  %vm1409_vm13 = vmor %vm1407_vm12, %vm1408_vm10 }
 0xd70   :  { %v1404_v18 = vsub.f32 1.0, %v1403_v20 }
 0xd72   :  { %v1405_v13 = vmul.f32 %v2531_v15, %v1404_v18 }
 0xd74   :  { %v1406_v51 = vadd.f32 %v2531_v15, %v1405_v13 }
 0xd76   :  { %v1410_v46 = vsel %vm1409_vm13, %v2531_v15, %v1406_v51 }
 0xd77   :  { %v1415_v6 = vsel %vm1412_vm14, %v1414_v30, %v1410_v46 }
 0xde1   :  { %v1422_v42 = vpop.permute.xlu1 %1421 }
 0xde2   :  { %v3555_v47 = vadd.f32 %v1422_v42, %v1418_v48 }
 0xde4   :  { %2532 = vtanh.f32 %v3555_v47 }
 0xdea   :  { %v2533_v54 = vpop.eup %2532 }
 0xdeb   :  { %v1426_v2 = vmul.f32 %v2533_v54, %v1415_v6 }
 0xded   :  { %v1427_v12 = vpack.c.bf16 %v1426_v2, %v1426_v2 }
 0xdef   :  { %1429 = vrot.lane.b32.xlu2 %v1427_v12, %s2751_s27 }
 0xe49   :  { %v1430_v36 = vpop.permute.xlu2 %1429 }
 0xe4a   :  { %2311 = vmatmul.msk.bf16.vlgmr.msrb.gmra.mxu2 %vm320_vm11, %v1430_v36  ;;  %2312 = vmatmul.msk.bf16.vlgmr.msrb.gmra.mxu3 %vm320_vm11, %v1430_v36 }
 0xe4b   :  { %1770 = vmatpush.bf16.msrb.mxu2 %v3308_v53  ;;  %1783 = vmatpush.bf16.msrb.mxu3 %v3329_v49 }
 0xe4f   :  { %1771 = vmatpush.bf16.msrb.mxu2 %v3318_v25  ;;  %1784 = vmatpush.bf16.msrb.mxu3 %v3351_v3 }
 0xe53   :  { %1772 = vmatpush.bf16.msrb.mxu2 %v3346_v17  ;;  %1785 = vmatpush.bf16.msrb.mxu3 %v3383_v63 }
 0xe57   :  { %1773 = vmatpush.bf16.msrb.mxu2 %v3372_v10  ;;  %1786 = vmatpush.bf16.msrb.mxu3 %v3388_v43 }
 0xecd   :  { %v1443_v39 = vpop.f32.mrf.mxu2  ;;  %v1456_v40 = vpop.f32.mrf.mxu3 }
 0xece   :  { %v1460_v50 = vadd.f32 %v1443_v39, %v1297_v22  ;;  %v1461_v18 = vadd.f32 %v1456_v40, %v1298_v31 }
 0xed0   :  { %v2313_v7 = vmul.f32 -1.442695, %v1460_v50  ;;  %v2314_v2 = vmul.f32 -1.442695, %v1461_v18 }
 0xed2   :  { %2534 = vpow2.f32 %v2313_v7 }
 0xed5   :  { %v1445_v8 = vpop.f32.mrf.mxu2  ;;  %v1458_v38 = vpop.f32.mrf.mxu3 }
 0xed8   :  { %v2535_v19 = vpop.eup %2534 }
 0xed9   :  { %v1468_v15 = vadd.f32 1.0, %v2535_v19 }
 0xedb   :  { %2536 = vrcp.f32 %v1468_v15  ;;  %v1481_v42 = vand.u32 2147483648, %v1468_v15  ;;  %v1479_v22 = vand.u32 2147483647, %v1468_v15  ;;  %vm1475_vm3 = vweird.f32 %v1468_v15 }
 0xedc   :  { %2538 = vtanh.f32 %v1461_v18 }
 0xedd   :  { %v1482_v57 = vor.u32 1.1754944e-38, %v1481_v42  ;;  %vm1480_vm5 = vcmp.eq.f32.partialorder %v1479_v22, 8.507059e+37  ;;  %2540 = vpow2.f32 %v2314_v2 }
 0xee1   :  { %v2537_v20 = vpop.eup %2536 }
 0xee2   :  { %v1471_v13 = vmul.f32 %v2537_v20, %v1468_v15  ;;  %vm1476_vm15 = vweird.f32 %v2537_v20  ;;  %v2539_v30 = vpop.eup %2538 }
 0xee3   :  { %vm1477_vm4 = vmor %vm1475_vm3, %vm1476_vm15  ;;  %v2541_v31 = vpop.eup %2540 }
 0xee4   :  { %v1472_v48 = vsub.f32 1.0, %v1471_v13  ;;  %v1469_v12 = vadd.f32 1.0, %v2541_v31 }
 0xee6   :  { %v1473_v51 = vmul.f32 %v2537_v20, %v1472_v48  ;;  %2542 = vrcp.f32 %v1469_v12  ;;  %v1496_v15 = vand.u32 2147483648, %v1469_v12  ;;  %vm1490_vm0 = vweird.f32 %v1469_v12 }
 0xee8   :  { %v1474_v55 = vadd.f32 %v2537_v20, %v1473_v51  ;;  %v1497_v13 = vor.u32 1.1754944e-38, %v1496_v15 }
 0xeea   :  { %v1478_v46 = vsel %vm1477_vm4, %v2537_v20, %v1474_v55  ;;  %v1494_v20 = vand.u32 2147483647, %v1469_v12 }
 0xeeb   :  { %v1483_v54 = vsel %vm1480_vm5, %v1482_v57, %v1478_v46 }
 0xeec   :  { %v1502_v6 = vmul.f32 %v2539_v30, %v1483_v54  ;;  %v2543_v36 = vpop.eup %2542  ;;  %v1501_v7 = vmul.f32 %v1483_v54, %v3555_v47  ;;  %vm1495_vm8 = vcmp.eq.f32.partialorder %v1494_v20, 8.507059e+37 }
 0xeed   :  { %v1486_v39 = vmul.f32 %v2543_v36, %v1469_v12  ;;  %vm1491_vm6 = vweird.f32 %v2543_v36 }
 0xeee   :  { %1504 = vrot.lane.b32.xlu0 %v1502_v6, %s2751_s27  ;;  %vm1492_vm7 = vmor %vm1490_vm0, %vm1491_vm6 }
 0xeef   :  { %v1487_v40 = vsub.f32 1.0, %v1486_v39 }
 0xef1   :  { %v1488_v50 = vmul.f32 %v2543_v36, %v1487_v40 }
 0xef3   :  { %v1489_v19 = vadd.f32 %v2543_v36, %v1488_v50 }
 0xef5   :  { %v1493_v18 = vsel %vm1492_vm7, %v2543_v36, %v1489_v19 }
 0xef6   :  { %v1498_v42 = vsel %vm1495_vm8, %v1497_v13, %v1493_v18 }
 0xf60   :  { %v1505_v8 = vpop.permute.xlu0 %1504 }
 0xf61   :  { %v3581_v38 = vadd.f32 %v1505_v8, %v1501_v7 }
 0xf63   :  { %2544 = vtanh.f32 %v3581_v38 }
 0xf69   :  { %v2545_v48 = vpop.eup %2544 }
 0xf6a   :  { %v1509_v51 = vmul.f32 %v2545_v48, %v1498_v42 }
 0xf6c   :  { %v1510_v22 = vpack.c.bf16 %v1509_v51, %v1509_v51 }
 0xf6e   :  { %1512 = vrot.lane.b32.xlu1 %v1510_v22, %s2751_s27 }
 0xfe0   :  { %v1513_v47 = vpop.permute.xlu1 %1512 }
 0xfe1   :  { %2315 = vmatmul.msk.bf16.vlgmr.msrb.gmra.mxu0 %vm320_vm11, %v1513_v47  ;;  %2316 = vmatmul.msk.bf16.vlgmr.msrb.gmra.mxu1 %vm320_vm11, %v1513_v47 }
 0xfe2   :  { %1853 = vmatpush.bf16.msrb.mxu0 %v3308_v53  ;;  %1866 = vmatpush.bf16.msrb.mxu1 %v3329_v49 }
 0xfe6   :  { %1854 = vmatpush.bf16.msrb.mxu0 %v3318_v25  ;;  %1867 = vmatpush.bf16.msrb.mxu1 %v3351_v3 }
 0xfea   :  { %1855 = vmatpush.bf16.msrb.mxu0 %v3346_v17  ;;  %1868 = vmatpush.bf16.msrb.mxu1 %v3383_v63 }
 0xfee   :  { %1856 = vmatpush.bf16.msrb.mxu0 %v3372_v10  ;;  %1869 = vmatpush.bf16.msrb.mxu1 %v3388_v43 }
0x105e   :  { %v1526_v55 = vpop.f32.mrf.mxu0  ;;  %v1539_v57 = vpop.f32.mrf.mxu1 }
0x105f   :  { %v1543_v46 = vadd.f32 %v1526_v55, %v1299_v11  ;;  %v1544_v36 = vadd.f32 %v1539_v57, %v1300_v35 }
0x1061   :  { %v2317_v30 = vmul.f32 -1.442695, %v1543_v46  ;;  %v2318_v48 = vmul.f32 -1.442695, %v1544_v36 }
0x1063   :  { %2546 = vpow2.f32 %v2317_v30 }
0x1066   :  { %v1528_v54 = vpop.f32.mrf.mxu0  ;;  %v1541_v6 = vpop.f32.mrf.mxu1 }
0x1069   :  { %v2547_v2 = vpop.eup %2546 }
0x106a   :  { %v1551_v31 = vadd.f32 1.0, %v2547_v2 }
0x106c   :  { %2548 = vrcp.f32 %v1551_v31  ;;  %v1564_v50 = vand.u32 2147483648, %v1551_v31  ;;  %v1562_v11 = vand.u32 2147483647, %v1551_v31  ;;  %vm1558_vm10 = vweird.f32 %v1551_v31 }
0x106d   :  { %2550 = vtanh.f32 %v1544_v36 }
0x106e   :  { %v1565_v19 = vor.u32 1.1754944e-38, %v1564_v50  ;;  %vm1563_vm13 = vcmp.eq.f32.partialorder %v1562_v11, 8.507059e+37  ;;  %2552 = vpow2.f32 %v2318_v48 }
0x1072   :  { %v2549_v12 = vpop.eup %2548 }
0x1073   :  { %v1554_v39 = vmul.f32 %v2549_v12, %v1551_v31  ;;  %vm1559_vm9 = vweird.f32 %v2549_v12  ;;  %v2551_v20 = vpop.eup %2550 }
0x1074   :  { %vm1560_vm12 = vmor %vm1558_vm10, %vm1559_vm9  ;;  %v2553_v35 = vpop.eup %2552 }
0x1075   :  { %v1555_v40 = vsub.f32 1.0, %v1554_v39  ;;  %v1552_v42 = vadd.f32 1.0, %v2553_v35 }
0x1077   :  { %v1556_v7 = vmul.f32 %v2549_v12, %v1555_v40  ;;  %2554 = vrcp.f32 %v1552_v42  ;;  %v1579_v6 = vand.u32 2147483648, %v1552_v42  ;;  %vm1573_vm15 = vweird.f32 %v1552_v42 }
0x1078   :  { %v1577_v2 = vand.u32 2147483647, %v1552_v42 }
0x1079   :  { %v1557_v8 = vadd.f32 %v2549_v12, %v1556_v7 }
0x107a   :  { %vm1578_vm4 = vcmp.eq.f32.partialorder %v1577_v2, 8.507059e+37 }
0x107b   :  { %v1561_v15 = vsel %vm1560_vm12, %v2549_v12, %v1557_v8  ;;  %v1580_v12 = vor.u32 1.1754944e-38, %v1579_v6 }
0x107c   :  { %v1566_v18 = vsel %vm1563_vm13, %v1565_v19, %v1561_v15 }
0x107d   :  { %v1585_v13 = vmul.f32 %v2551_v20, %v1566_v18  ;;  %v2555_v51 = vpop.eup %2554  ;;  %v1584_v57 = vmul.f32 %v1566_v18, %v3581_v38 }
0x107e   :  { %v1569_v22 = vmul.f32 %v2555_v51, %v1552_v42  ;;  %vm1574_vm14 = vweird.f32 %v2555_v51 }
0x107f   :  { %1587 = vrot.lane.b32.xlu2 %v1585_v13, %s2751_s27  ;;  %vm1575_vm3 = vmor %vm1573_vm15, %vm1574_vm14 }
0x1080   :  { %v1570_v47 = vsub.f32 1.0, %v1569_v22 }
0x1082   :  { %v1571_v55 = vmul.f32 %v2555_v51, %v1570_v47 }
0x1084   :  { %v1572_v54 = vadd.f32 %v2555_v51, %v1571_v55 }
0x1086   :  { %v1576_v31 = vsel %vm1575_vm3, %v2555_v51, %v1572_v54 }
0x1087   :  { %v1581_v39 = vsel %vm1578_vm4, %v1580_v12, %v1576_v31 }
0x10d9   :  { %v1588_v46 = vpop.permute.xlu2 %1587 }
0x10da   :  { %v3607_v30 = vadd.f32 %v1588_v46, %v1584_v57 }
0x10dc   :  { %2556 = vtanh.f32 %v3607_v30 }
0x10e2   :  { %v2557_v36 = vpop.eup %2556 }
0x10e3   :  { %v1592_v40 = vmul.f32 %v2557_v36, %v1581_v39 }
0x10e5   :  { %v1593_v50 = vpack.c.bf16 %v1592_v40, %v1592_v40 }
0x10e7   :  { %1595 = vrot.lane.b32.xlu0 %v1593_v50, %s2751_s27 }
0x1159   :  { %v1596_v38 = vpop.permute.xlu0 %1595 }
0x115a   :  { %2319 = vmatmul.msk.bf16.vlgmr.msra.gmra.mxu2 %vm320_vm11, %v1596_v38  ;;  %2320 = vmatmul.msk.bf16.vlgmr.msra.gmra.mxu3 %vm320_vm11, %v1596_v38 }
0x115b   :  { %1936 = vmatpush.bf16.msra.mxu2 %v3308_v53  ;;  %1949 = vmatpush.bf16.msra.mxu3 %v3329_v49 }
0x115f   :  { %1937 = vmatpush.bf16.msra.mxu2 %v3318_v25  ;;  %1950 = vmatpush.bf16.msra.mxu3 %v3351_v3 }
0x1163   :  { %1938 = vmatpush.bf16.msra.mxu2 %v3346_v17  ;;  %1951 = vmatpush.bf16.msra.mxu3 %v3383_v63 }
0x1167   :  { %1939 = vmatpush.bf16.msra.mxu2 %v3372_v10  ;;  %1952 = vmatpush.bf16.msra.mxu3 %v3388_v43 }
0x11dd   :  { %v1609_v7 = vpop.f32.mrf.mxu2  ;;  %v1622_v11 = vpop.f32.mrf.mxu3 }
0x11de   :  { %v1626_v53 = vadd.f32 %v1609_v7, %v1301_v21  ;;  %v1627_v10 = vadd.f32 %v1622_v11, %v1302_v29 }
0x11e0   :  { %v2321_v49 = vmul.f32 -1.442695, %v1626_v53  ;;  %v2322_v22 = vmul.f32 -1.442695, %v1627_v10 }
0x11e2   :  { %2558 = vpow2.f32 %v2321_v49 }
0x11e5   :  { %v1611_v25 = vpop.f32.mrf.mxu2  ;;  %v1624_v3 = vpop.f32.mrf.mxu3 }
0x11e8   :  { %v2559_v8 = vpop.eup %2558 }
0x11e9   :  { %v1634_v17 = vadd.f32 1.0, %v2559_v8 }
0x11eb   :  { %2560 = vrcp.f32 %v1634_v17  ;;  %v1647_v15 = vand.u32 2147483648, %v1634_v17  ;;  %v1645_v21 = vand.u32 2147483647, %v1634_v17  ;;  %vm1641_vm6 = vweird.f32 %v1634_v17 }
0x11ec   :  { %2562 = vtanh.f32 %v1627_v10 }
0x11ed   :  { %v1648_v13 = vor.u32 1.1754944e-38, %v1647_v15  ;;  %vm1646_vm7 = vcmp.eq.f32.partialorder %v1645_v21, 8.507059e+37  ;;  %2564 = vpow2.f32 %v2322_v22 }
0x11f1   :  { %v2561_v63 = vpop.eup %2560 }
0x11f2   :  { %v1637_v43 = vmul.f32 %v2561_v63, %v1634_v17  ;;  %vm1642_vm5 = vweird.f32 %v2561_v63  ;;  %v2563_v35 = vpop.eup %2562 }
0x11f3   :  { %vm1643_vm0 = vmor %vm1641_vm6, %vm1642_vm5  ;;  %v2565_v29 = vpop.eup %2564 }
0x11f4   :  { %v1638_v19 = vsub.f32 1.0, %v1637_v43  ;;  %v1635_v47 = vadd.f32 1.0, %v2565_v29 }
0x11f6   :  { %v1639_v20 = vmul.f32 %v2561_v63, %v1638_v19  ;;  %2566 = vrcp.f32 %v1635_v47  ;;  %v1662_v36 = vand.u32 2147483648, %v1635_v47  ;;  %vm1656_vm9 = vweird.f32 %v1635_v47 }
0x11f7   :  { %v1660_v39 = vand.u32 2147483647, %v1635_v47 }
0x11f8   :  { %v1640_v18 = vadd.f32 %v2561_v63, %v1639_v20  ;;  %v1663_v50 = vor.u32 1.1754944e-38, %v1662_v36 }
0x11f9   :  { %vm1661_vm12 = vcmp.eq.f32.partialorder %v1660_v39, 8.507059e+37 }
0x11fa   :  { %v1644_v48 = vsel %vm1643_vm0, %v2561_v63, %v1640_v18 }
0x11fb   :  { %v1649_v42 = vsel %vm1646_vm7, %v1648_v13, %v1644_v48 }
0x11fc   :  { %v1668_v51 = vmul.f32 %v2563_v35, %v1649_v42  ;;  %v2567_v55 = vpop.eup %2566  ;;  %v1667_v6 = vmul.f32 %v1649_v42, %v3607_v30 }
0x11fd   :  { %v1652_v57 = vmul.f32 %v2567_v55, %v1635_v47  ;;  %vm1657_vm8 = vweird.f32 %v2567_v55 }
0x11fe   :  { %1670 = vrot.lane.b32.xlu1 %v1668_v51, %s2751_s27  ;;  %vm1658_vm10 = vmor %vm1656_vm9, %vm1657_vm8 }
0x11ff   :  { %v1653_v46 = vsub.f32 1.0, %v1652_v57 }
0x1201   :  { %v1654_v54 = vmul.f32 %v2567_v55, %v1653_v46 }
0x1203   :  { %v1655_v12 = vadd.f32 %v2567_v55, %v1654_v54 }
0x1205   :  { %v1659_v40 = vsel %vm1658_vm10, %v2567_v55, %v1655_v12 }
0x1206   :  { %v1664_v7 = vsel %vm1661_vm12, %v1663_v50, %v1659_v40 }
0x1270   :  { %v1671_v2 = vpop.permute.xlu1 %1670 }
0x1271   :  { %v1673_v31 = vadd.f32 %v1671_v2, %v1667_v6 }
0x1273   :  { %2568 = vtanh.f32 %v1673_v31 }
0x1279   :  { %v2569_v38 = vpop.eup %2568 }
0x127a   :  { %v1675_v11 = vmul.f32 %v2569_v38, %v1664_v7 }
0x127c   :  { %v1676_v53 = vpack.c.bf16 %v1675_v11, %v1675_v11 }
0x127e   :  { %1678 = vrot.lane.b32.xlu2 %v1676_v53, %s2751_s27 }
0x12d8   :  { %v1679_v49 = vpop.permute.xlu2 %1678 }
0x12d9   :  { %2323 = vmatmul.msk.bf16.vlgmr.msra.gmra.mxu0 %vm320_vm11, %v1679_v49  ;;  %2324 = vmatmul.msk.bf16.vlgmr.msra.gmra.mxu1 %vm320_vm11, %v1679_v49 }
0x1356   :  { %v1692_v30 = vpop.f32.mrf.mxu0  ;;  %v1705_v25 = vpop.f32.mrf.mxu1 }
0x1357   :  { %v1709_v3 = vadd.f32 %v1692_v30, %v1303_v26  ;;  %v1710_v15 = vadd.f32 %v1705_v25, %v1304_v37 }
0x1359   :  { %v2325_v8 = vmul.f32 -1.442695, %v1709_v3  ;;  %v2326_v44 = vmul.f32 -1.442695, %v1710_v15 }
0x135b   :  { %2570 = vpow2.f32 %v2325_v8 }
0x135e   :  { %v1694_v17 = vpop.f32.mrf.mxu0  ;;  %v1707_v63 = vpop.f32.mrf.mxu1 }
0x1361   :  { %v2571_v10 = vpop.eup %2570 }
0x1362   :  { %v1717_v43 = vadd.f32 1.0, %v2571_v10 }
0x1364   :  { %2572 = vrcp.f32 %v1717_v43  ;;  %v1730_v18 = vand.u32 2147483648, %v1717_v43  ;;  %v1728_v62 = vand.u32 2147483647, %v1717_v43  ;;  %vm1724_vm14 = vweird.f32 %v1717_v43 }
0x1365   :  { %2574 = vtanh.f32 %v1710_v15 }
0x1366   :  { %v1731_v13 = vor.u32 1.1754944e-38, %v1730_v18  ;;  %vm1729_vm3 = vcmp.eq.f32.partialorder %v1728_v62, 8.507059e+37  ;;  %2576 = vpow2.f32 %v2326_v44 }
0x136a   :  { %v2573_v19 = vpop.eup %2572 }
0x136b   :  { %v1720_v20 = vmul.f32 %v2573_v19, %v1717_v43  ;;  %vm1725_vm13 = vweird.f32 %v2573_v19  ;;  %v2575_v35 = vpop.eup %2574 }
0x136c   :  { %vm1726_vm15 = vmor %vm1724_vm14, %vm1725_vm13  ;;  %v2577_v5 = vpop.eup %2576 }
0x136d   :  { %v1721_v21 = vsub.f32 1.0, %v1720_v20  ;;  %v1718_v37 = vadd.f32 1.0, %v2577_v5 }
0x136f   :  { %v1722_v9 = vmul.f32 %v2573_v19, %v1721_v21  ;;  %2578 = vrcp.f32 %v1718_v37  ;;  %v1745_v2 = vand.u32 2147483648, %v1718_v37  ;;  %vm1739_vm5 = vweird.f32 %v1718_v37 }
0x1370   :  { %v1743_v12 = vand.u32 2147483647, %v1718_v37 }
0x1371   :  { %v1723_v26 = vadd.f32 %v2573_v19, %v1722_v9  ;;  %v1746_v39 = vor.u32 1.1754944e-38, %v1745_v2 }
0x1372   :  { %vm1744_vm0 = vcmp.eq.f32.partialorder %v1743_v12, 8.507059e+37 }
0x1373   :  { %v1727_v48 = vsel %vm1726_vm15, %v2573_v19, %v1723_v26 }
0x1374   :  { %v1732_v42 = vsel %vm1729_vm3, %v1731_v13, %v1727_v48 }
0x1375   :  { %v1751_v51 = vmul.f32 %v2575_v35, %v1732_v42  ;;  %v2579_v22 = vpop.eup %2578  ;;  %v1750_v57 = vmul.f32 %v1732_v42, %v1673_v31 }
0x1376   :  { %v1735_v29 = vmul.f32 %v2579_v22, %v1718_v37  ;;  %vm1740_vm4 = vweird.f32 %v2579_v22 }
0x1377   :  { %1753 = vrot.lane.b32.xlu0 %v1751_v51, %s2751_s27  ;;  %vm1741_vm6 = vmor %vm1739_vm5, %vm1740_vm4 }
0x1378   :  { %v1736_v47 = vsub.f32 1.0, %v1735_v29 }
0x137a   :  { %v1737_v55 = vmul.f32 %v2579_v22, %v1736_v47 }
0x137c   :  { %v1738_v6 = vadd.f32 %v2579_v22, %v1737_v55 }
0x137e   :  { %v1742_v36 = vsel %vm1741_vm6, %v2579_v22, %v1738_v6 }
0x137f   :  { %v1747_v50 = vsel %vm1744_vm0, %v1746_v39, %v1742_v36 }
0x13e9   :  { %v1754_v46 = vpop.permute.xlu0 %1753 }
0x13ea   :  { %v1756_v54 = vadd.f32 %v1754_v46, %v1750_v57 }
0x13ec   :  { %2580 = vtanh.f32 %v1756_v54 }
0x13f2   :  { %v2581_v40 = vpop.eup %2580 }
0x13f3   :  { %v1758_v38 = vmul.f32 %v2581_v40, %v1747_v50 }
0x13f5   :  { %v1759_v7 = vpack.c.bf16 %v1758_v38, %v1758_v38 }
0x13f7   :  { %1761 = vrot.lane.b32.xlu1 %v1759_v7, %s2751_s27 }
0x1469   :  { %v1762_v11 = vpop.permute.xlu1 %1761 }
0x146a   :  { %2327 = vmatmul.msk.bf16.vlgmr.msrb.gmra.mxu2 %vm320_vm11, %v1762_v11  ;;  %2328 = vmatmul.msk.bf16.vlgmr.msrb.gmra.mxu3 %vm320_vm11, %v1762_v11 }
0x14ed   :  { %v1775_v31 = vpop.f32.mrf.mxu2  ;;  %v1788_v53 = vpop.f32.mrf.mxu3 }
0x14ee   :  { %v1792_v49 = vadd.f32 %v1775_v31, %v1305_v32  ;;  %v1793_v10 = vadd.f32 %v1788_v53, %v1306_v16 }
0x14f0   :  { %v2329_v30 = vmul.f32 -1.442695, %v1792_v49  ;;  %v2330_v28 = vmul.f32 -1.442695, %v1793_v10 }
0x14f2   :  { %2582 = vpow2.f32 %v2329_v30 }
0x14f5   :  { %v1777_v25 = vpop.f32.mrf.mxu2  ;;  %v1790_v3 = vpop.f32.mrf.mxu3 }
0x14f8   :  { %v2583_v8 = vpop.eup %2582 }
0x14f9   :  { %v1800_v17 = vadd.f32 1.0, %v2583_v8 }
0x14fb   :  { %2584 = vrcp.f32 %v1800_v17  ;;  %v1813_v15 = vand.u32 2147483648, %v1800_v17  ;;  %v1811_v14 = vand.u32 2147483647, %v1800_v17  ;;  %vm1807_vm8 = vweird.f32 %v1800_v17 }
0x14fc   :  { %2586 = vtanh.f32 %v1793_v10 }
0x14fd   :  { %v1814_v20 = vor.u32 1.1754944e-38, %v1813_v15  ;;  %vm1812_vm10 = vcmp.eq.f32.partialorder %v1811_v14, 8.507059e+37  ;;  %2588 = vpow2.f32 %v2330_v28 }
0x1501   :  { %v2585_v63 = vpop.eup %2584 }
0x1502   :  { %v1803_v43 = vmul.f32 %v2585_v63, %v1800_v17  ;;  %vm1808_vm7 = vweird.f32 %v2585_v63  ;;  %v2587_v18 = vpop.eup %2586 }
0x1503   :  { %vm1809_vm9 = vmor %vm1807_vm8, %vm1808_vm7  ;;  %v2589_v24 = vpop.eup %2588 }
0x1504   :  { %v1804_v19 = vsub.f32 1.0, %v1803_v43  ;;  %v1801_v16 = vadd.f32 1.0, %v2589_v24 }
0x1506   :  { %v1805_v27 = vmul.f32 %v2585_v63, %v1804_v19  ;;  %2590 = vrcp.f32 %v1801_v16  ;;  %v1828_v37 = vand.u32 2147483648, %v1801_v16  ;;  %vm1822_vm13 = vweird.f32 %v1801_v16 }
0x1507   :  { %v1826_v22 = vand.u32 2147483647, %v1801_v16 }
0x1508   :  { %v1806_v32 = vadd.f32 %v2585_v63, %v1805_v27  ;;  %v1829_v47 = vor.u32 1.1754944e-38, %v1828_v37 }
0x1509   :  { %vm1827_vm15 = vcmp.eq.f32.partialorder %v1826_v22, 8.507059e+37 }
0x150a   :  { %v1810_v21 = vsel %vm1809_vm9, %v2585_v63, %v1806_v32 }
0x150b   :  { %v1815_v9 = vsel %vm1812_vm10, %v1814_v20, %v1810_v21 }
0x150c   :  { %v1834_v62 = vmul.f32 %v2587_v18, %v1815_v9  ;;  %v2591_v26 = vpop.eup %2590  ;;  %v1833_v42 = vmul.f32 %v1815_v9, %v1756_v54 }
0x150d   :  { %v1818_v13 = vmul.f32 %v2591_v26, %v1801_v16  ;;  %vm1823_vm12 = vweird.f32 %v2591_v26 }
0x150e   :  { %1836 = vrot.lane.b32.xlu2 %v1834_v62, %s2751_s27  ;;  %vm1824_vm14 = vmor %vm1822_vm13, %vm1823_vm12 }
0x150f   :  { %v1819_v48 = vsub.f32 1.0, %v1818_v13 }
0x1511   :  { %v1820_v35 = vmul.f32 %v2591_v26, %v1819_v48 }
0x1513   :  { %v1821_v5 = vadd.f32 %v2591_v26, %v1820_v35 }
0x1515   :  { %v1825_v29 = vsel %vm1824_vm14, %v2591_v26, %v1821_v5 }
0x1516   :  { %v1830_v57 = vsel %vm1827_vm15, %v1829_v47, %v1825_v29 }
0x1568   :  { %v1837_v51 = vpop.permute.xlu2 %1836 }
0x1569   :  { %v1839_v44 = vadd.f32 %v1837_v51, %v1833_v42 }
0x156b   :  { %2592 = vtanh.f32 %v1839_v44 }
0x1571   :  { %v2593_v55 = vpop.eup %2592 }
0x1572   :  { %v1841_v46 = vmul.f32 %v2593_v55, %v1830_v57 }
0x1574   :  { %v1842_v6 = vpack.c.bf16 %v1841_v46, %v1841_v46 }
0x1576   :  { %1844 = vrot.lane.b32.xlu0 %v1842_v6, %s2751_s27 }
0x15e8   :  { %v1845_v2 = vpop.permute.xlu0 %1844 }
0x15e9   :  { %2331 = vmatmul.msk.bf16.vlgmr.msrb.gmra.mxu0 %vm320_vm11, %v1845_v2  ;;  %2332 = vmatmul.msk.bf16.vlgmr.msrb.gmra.mxu1 %vm320_vm11, %v1845_v2 }
0x1666   :  { %v1858_v54 = vpop.f32.mrf.mxu0  ;;  %v1871_v12 = vpop.f32.mrf.mxu1 }
0x1667   :  { %v1875_v36 = vadd.f32 %v1858_v54, %v1307_v61  ;;  %v1876_v31 = vadd.f32 %v1871_v12, %v1308_v1  ;;  %v2408_v12 = vld [vmem:[#allocation11 + $0x18] sm:$0xff] }
0x1668   :  { %2055 = vmatpush.bf16.msra.mxu0 %v2408_v12 }
0x1669   :  { %v2333_v39 = vmul.f32 -1.442695, %v1875_v36  ;;  %v2334_v59 = vmul.f32 -1.442695, %v1876_v31  ;;  %v2407_v36 = vld [vmem:[#allocation11 + $0x10] sm:$0xff] }
0x166b   :  { %2594 = vpow2.f32 %v2333_v39 }
0x166c   :  { %2056 = vmatpush.bf16.msra.mxu0 %v2407_v36 }
0x166e   :  { %v1860_v40 = vpop.f32.mrf.mxu0  ;;  %v1873_v50 = vpop.f32.mrf.mxu1 }
0x166f   :  { %v2406_v40 = vld [vmem:[#allocation11 + $0x8] sm:$0xff] }
0x1670   :  { %2057 = vmatpush.bf16.msra.mxu0 %v2406_v40 }
0x1671   :  { %v2595_v38 = vpop.eup %2594 }
0x1672   :  { %v1883_v7 = vadd.f32 1.0, %v2595_v38  ;;  %v2405_v38 = vld [vmem:[#allocation11] sm:$0xff] }
0x1674   :  { %2596 = vrcp.f32 %v1883_v7  ;;  %v1896_v30 = vand.u32 2147483648, %v1883_v7  ;;  %v1894_v56 = vand.u32 2147483647, %v1883_v7  ;;  %vm1890_vm4 = vweird.f32 %v1883_v7  ;;  %2058 = vmatpush.bf16.msra.mxu0 %v2405_v38 }
0x1675   :  { %2598 = vtanh.f32 %v1876_v31 }
0x1676   :  { %v1897_v25 = vor.u32 1.1754944e-38, %v1896_v30  ;;  %vm1895_vm6 = vcmp.eq.f32.partialorder %v1894_v56, 8.507059e+37  ;;  %2600 = vpow2.f32 %v2334_v59  ;;  %v2412_v59 = vld [vmem:[%s3727_s10 + $0x18] sm:$0xff] }
0x1677   :  { %2109 = vmatpush.bf16.msra.mxu1 %v2412_v59 }
0x167a   :  { %v2597_v11 = vpop.eup %2596 }
0x167b   :  { %v1886_v53 = vmul.f32 %v2597_v11, %v1883_v7  ;;  %vm1891_vm3 = vweird.f32 %v2597_v11  ;;  %v2599_v8 = vpop.eup %2598 }
0x167c   :  { %vm1892_vm5 = vmor %vm1890_vm4, %vm1891_vm3  ;;  %v2601_v60 = vpop.eup %2600  ;;  %vm2118_vm4 = vcmask 31744  }
0x167d   :  { %v1887_v49 = vsub.f32 1.0, %v1886_v53  ;;  %v1884_v1 = vadd.f32 1.0, %v2601_v60  ;;  %v2411_v60 = vld [vmem:[%s3727_s10 + $0x10] sm:$0xff] }
0x167e   :  { %2110 = vmatpush.bf16.msra.mxu1 %v2411_v60 }
0x167f   :  { %v1888_v58 = vmul.f32 %v2597_v11, %v1887_v49  ;;  %2602 = vrcp.f32 %v1884_v1  ;;  %v1911_v21 = vand.u32 2147483648, %v1884_v1  ;;  %vm1905_vm7 = vweird.f32 %v1884_v1 }
0x1680   :  { %v1909_v18 = vand.u32 2147483647, %v1884_v1 }
0x1681   :  { %v1889_v61 = vadd.f32 %v2597_v11, %v1888_v58  ;;  %v1912_v62 = vor.u32 1.1754944e-38, %v1911_v21  ;;  %v2425_v21 = vld [vmem:[%s3728_s11] ss:$0 sm:$0xff] }
0x1682   :  { %vm1910_vm9 = vcmp.eq.f32.partialorder %v1909_v18, 8.507059e+37 }
0x1683   :  { %v1893_v3 = vsel %vm1892_vm5, %v2597_v11, %v1889_v61 }
0x1684   :  { %v1898_v17 = vsel %vm1895_vm6, %v1897_v25, %v1893_v3 }
0x1685   :  { %v1917_v63 = vmul.f32 %v2599_v8, %v1898_v17  ;;  %v2603_v10 = vpop.eup %2602  ;;  %v1916_v27 = vmul.f32 %v1898_v17, %v1839_v44 }
0x1686   :  { %v1901_v43 = vmul.f32 %v2603_v10, %v1884_v1  ;;  %vm1906_vm0 = vweird.f32 %v2603_v10  ;;  %v2410_v1 = vld [vmem:[%s3727_s10 + $0x8] sm:$0xff] }
0x1687   :  { %1919 = vrot.lane.b32.xlu1 %v1917_v63, %s2751_s27  ;;  %vm1907_vm8 = vmor %vm1905_vm7, %vm1906_vm0  ;;  %2111 = vmatpush.bf16.msra.mxu1 %v2410_v1 }
0x1688   :  { %v1902_v19 = vsub.f32 1.0, %v1901_v43  ;;  %v2409_v43 = vld [vmem:[%s3727_s10] sm:$0xff] }
0x168a   :  { %v1903_v15 = vmul.f32 %v2603_v10, %v1902_v19  ;;  %v2424_v19 = vld [vmem:[%s3726_s9] ss:$0 sm:$0xff] }
0x168b   :  { %2112 = vmatpush.bf16.msra.mxu1 %v2409_v43 }
0x168c   :  { %v1904_v20 = vadd.f32 %v2603_v10, %v1903_v15 }
0x168e   :  { %v1908_v9 = vsel %vm1907_vm8, %v2603_v10, %v1904_v20 }
0x168f   :  { %v1913_v24 = vsel %vm1910_vm9, %v1912_v62, %v1908_v9 }
0x16f9   :  { %v1920_v14 = vpop.permute.xlu1 %1919 }
0x16fa   :  { %v3675_v32 = vadd.f32 %v1920_v14, %v1916_v27 }
0x16fc   :  { %2604 = vtanh.f32 %v3675_v32 }
0x1702   :  { %v2605_v28 = vpop.eup %2604 }
0x1703   :  { %v1924_v16 = vmul.f32 %v2605_v28, %v1913_v24 }
0x1705   :  { %v1925_v26 = vpack.c.bf16 %v1924_v16, %v1924_v16 }
0x1707   :  { %1927 = vrot.lane.b32.xlu2 %v1925_v26, %s2751_s27 }
0x1761   :  { %v1928_v13 = vpop.permute.xlu2 %1927 }
0x1762   :  { %2335 = vmatmul.msk.bf16.vlgmr.msra.gmra.mxu2 %vm320_vm11, %v1928_v13  ;;  %2336 = vmatmul.msk.bf16.vlgmr.msra.gmra.mxu3 %vm320_vm11, %v1928_v13 }
0x17e5   :  { %v1941_v48 = vpop.f32.mrf.mxu2  ;;  %v1954_v35 = vpop.f32.mrf.mxu3 }
0x17e6   :  { %v1958_v42 = vadd.f32 %v1941_v48, %v1309_v52  ;;  %v1959_v47 = vadd.f32 %v1954_v35, %v1310_v23 }
0x17e8   :  { %v2337_v51 = vmul.f32 -1.442695, %v1958_v42  ;;  %v2338_v41 = vmul.f32 -1.442695, %v1959_v47 }
0x17ea   :  { %2606 = vpow2.f32 %v2337_v51 }
0x17ed   :  { %v1943_v44 = vpop.f32.mrf.mxu2  ;;  %v1956_v5 = vpop.f32.mrf.mxu3 }
0x17f0   :  { %v2607_v37 = vpop.eup %2606 }
0x17f1   :  { %v1966_v22 = vadd.f32 1.0, %v2607_v37 }
0x17f3   :  { %2608 = vrcp.f32 %v1966_v22  ;;  %v1979_v57 = vand.u32 2147483648, %v1966_v22  ;;  %v1977_v34 = vand.u32 2147483647, %v1966_v22  ;;  %vm1973_vm10 = vweird.f32 %v1966_v22 }
0x17f4   :  { %2610 = vtanh.f32 %v1959_v47 }
0x17f5   :  { %v1980_v46 = vor.u32 1.1754944e-38, %v1979_v57  ;;  %vm1978_vm13 = vcmp.eq.f32.partialorder %v1977_v34, 8.507059e+37  ;;  %2612 = vpow2.f32 %v2338_v41 }
0x17f9   :  { %v2609_v29 = vpop.eup %2608 }
0x17fa   :  { %v1969_v55 = vmul.f32 %v2609_v29, %v1966_v22  ;;  %vm1974_vm1 = vweird.f32 %v2609_v29  ;;  %v2611_v2 = vpop.eup %2610 }
0x17fb   :  { %vm1975_vm12 = vmor %vm1973_vm10, %vm1974_vm1  ;;  %v2613_v33 = vpop.eup %2612 }
0x17fc   :  { %v1970_v0 = vsub.f32 1.0, %v1969_v55  ;;  %v1967_v23 = vadd.f32 1.0, %v2613_v33 }
0x17fe   :  { %v1971_v45 = vmul.f32 %v2609_v29, %v1970_v0  ;;  %2614 = vrcp.f32 %v1967_v23  ;;  %v1994_v58 = vand.u32 2147483648, %v1967_v23  ;;  %vm1988_vm14 = vweird.f32 %v1967_v23 }
0x17ff   :  { %v1992_v56 = vand.u32 2147483647, %v1967_v23 }
0x1800   :  { %v1972_v52 = vadd.f32 %v2609_v29, %v1971_v45  ;;  %v1995_v25 = vor.u32 1.1754944e-38, %v1994_v58 }
0x1801   :  { %vm1993_vm3 = vcmp.eq.f32.partialorder %v1992_v56, 8.507059e+37 }
0x1802   :  { %v1976_v6 = vsel %vm1975_vm12, %v2609_v29, %v1972_v52 }
0x1803   :  { %v1981_v54 = vsel %vm1978_vm13, %v1980_v46, %v1976_v6 }
0x1804   :  { %v2000_v4 = vmul.f32 %v2611_v2, %v1981_v54  ;;  %v2615_v39 = vpop.eup %2614  ;;  %v1999_v31 = vmul.f32 %v1981_v54, %v3675_v32 }
0x1805   :  { %v1984_v50 = vmul.f32 %v2615_v39, %v1967_v23  ;;  %vm1989_vm2 = vweird.f32 %v2615_v39 }
0x1806   :  { %2002 = vrot.lane.b32.xlu0 %v2000_v4, %s2751_s27  ;;  %vm1990_vm15 = vmor %vm1988_vm14, %vm1989_vm2 }
0x1807   :  { %v1985_v7 = vsub.f32 1.0, %v1984_v50 }
0x1809   :  { %v1986_v11 = vmul.f32 %v2615_v39, %v1985_v7 }
0x180b   :  { %v1987_v30 = vadd.f32 %v2615_v39, %v1986_v11 }
0x180d   :  { %v1991_v61 = vsel %vm1990_vm15, %v2615_v39, %v1987_v30 }
0x180e   :  { %v1996_v8 = vsel %vm1993_vm3, %v1995_v25, %v1991_v61 }
0x1878   :  { %v2003_v53 = vpop.permute.xlu0 %2002 }
0x1879   :  { %v2005_v49 = vadd.f32 %v2003_v53, %v1999_v31 }
0x187b   :  { %2616 = vtanh.f32 %v2005_v49 }
0x1881   :  { %v2617_v3 = vpop.eup %2616 }
0x1882   :  { %v2007_v17 = vmul.f32 %v2617_v3, %v1996_v8 }
0x1884   :  { %v2008_v63 = vpack.c.bf16 %v2007_v17, %v2007_v17 }
0x1886   :  { %2022 = vrot.lane.b32.xlu1 %v2008_v63, %s2751_s27 }
0x18f8   :  { %v2023_v10 = vpop.permute.xlu1 %2022 }
0x18f9   :  { %2355 = vmatmul.msk.bf16.vlgmr.msra.gmra.mxu0 %vm320_vm11, %v2023_v10 }
0x1976   :  { %v2060_v15 = vpop.f32.mrf.mxu0 }
0x1977   :  { %v2061_v27 = vadd.f32 %v2424_v19, %v2060_v15 }
0x1979   :  { %v2064_v14 = vmax.f32 %v2061_v27, 0.0 }
0x197b   :  { %v2065_v32 = vpack.c.bf16 %v2064_v14, %v2064_v14 }
0x197d   :  { %2372 = vmatmul.msk.bf16.vlgmr.msra.gmra.mxu1 %vm320_vm11, %v2065_v32 }
0x197e   :  { %v2062_v20 = vpop.f32.mrf.mxu0 }
0x19fa   :  { %v2114_v18 = vpop.f32.mrf.mxu1 }
0x19fb   :  { %v2115_v9 = vadd.f32 %v2425_v21, %v2114_v18 }
0x19fd   :  { %2119 = vst.msk [vmem:[%s3729_s12] sm:$0xff] %vm2118_vm4, %v2115_v9 }
0x1a02   :  { %v2116_v62 = vpop.f32.mrf.mxu1 }
0x1a03   :  { %2124 = vsyncpa [#allocation5], 1 }
0x1a04   :  { %2125 = vsyncpa [#allocation7], 1 }
0x1a05   :  { %2126 = vsyncpa [#allocation10], 1 }

</bundles_post_ra>
